<compile_context>
chip_gen: v7x
topology: tpu7x:2x2x1
jax: 0.10.0
libtpu: 0.0.40
codegen_flags: <defaults>
</compile_context>

<pallas_src>
import functools

import jax
import jax.numpy as jnp
from jax.experimental import pallas as pl
from jax.experimental.pallas import tpu as pltpu


def _round_up(x, m):
    return (x + m - 1) // m * m


_TM_CAP = 1024  # bound on the (tm, hidden) f32 accumulator height


@functools.lru_cache(maxsize=None)
def _hw_config():
    """Per-generation knobs: (vmem_limit_bytes, n_row_tiles, tk_cap, w1_buffers).

    v5e/v6e (128 MiB VMEM, 1 TensorCore): one row tile so w1 streams from HBM
    exactly once, large K tiles, 3-deep w1 buffering, ~108 MiB VMEM budget.
    v7x (64 MiB VMEM, 2 TensorCores): two balanced row tiles so the "parallel"
    row axis shards one real tile per core; smaller K tiles and default 2-deep
    w1 buffering so the resident single-buffered w2 still fits at hidden=4096.
    """
    try:
        cap = int(pltpu.get_tpu_info().vmem_capacity_bytes)
    except Exception:
        cap = 0
    if cap <= 0:
        cap = 64 << 20                      # conservative (v7x-sized) fallback
    vmem_limit = int(cap * 0.85)
    if cap <= (64 << 20):                   # v7x-class chip
        return vmem_limit, 2, 512, 2
    return vmem_limit, 1, 2048, 3           # v5e / v6e class chip


def _row_tiling(n, n_row_tiles):
    """Minimal-padding row tiling: tm = round_up(cdiv(n, tiles), 8)."""
    n_tiles = max(n_row_tiles, pl.cdiv(n, _TM_CAP))
    tm = _round_up(pl.cdiv(n, n_tiles), 8)
    n_pad = _round_up(n, tm)
    return tm, n_pad


def _fc1_k_tile(f_pad, tk_cap):
    """Largest 128-multiple divisor of f_pad not exceeding tk_cap (f_pad % 128 == 0)."""
    best = 128
    t = 128
    while t <= min(tk_cap, f_pad):
        if f_pad % t == 0:
            best = t
        t += 128
    return best


def fast_rcnn_head_kernel(x_ref, w1_ref, b1_ref, w2_ref, b2_ref, wh_ref, bh_ref,
                          out_ref, acc_ref, h_ref):
    """One RoI row tile; fc1 streamed over the K grid axis, fc2 + heads on the last step."""
    k = pl.program_id(1)

    @pl.when(k == 0)
    def _init():
        acc_ref[...] = jnp.zeros_like(acc_ref)

    # fc1 partial product for this K tile (bf16 MXU inputs, f32 accumulation).
    acc_ref[...] += jnp.dot(x_ref[...], w1_ref[...],
                            preferred_element_type=jnp.float32)

    @pl.when(k == pl.num_programs(1) - 1)
    def _finish():
        # fc1 epilogue (bias + ReLU) in f32, staged to a bf16 VMEM scratch so the
        # live value feeding the MXU is half-width (less spill / vst pressure).
        # Dropout (eval mode) is the identity.
        h_ref[...] = jnp.maximum(acc_ref[...] + b1_ref[...], 0.0).astype(h_ref.dtype)
        # fc2 (+ bias + ReLU), f32 accumulation, restaged to the same bf16 scratch.
        h2 = jnp.dot(h_ref[...], w2_ref[...], preferred_element_type=jnp.float32)
        h_ref[...] = jnp.maximum(h2 + b2_ref[...], 0.0).astype(h_ref.dtype)
        # Fused cls_score + bbox_pred: single lane-dense (hidden, 128) matmul.
        out = jnp.dot(h_ref[...], wh_ref[...],
                      preferred_element_type=jnp.float32) + bh_ref[...]
        out_ref[...] = out.astype(out_ref.dtype)


def make_params(key, in_features, hidden, num_classes, dtype=jnp.float32):
    """Init mirroring FastRCNNHead._initialize_weights (weights stored (in, out))."""
    k1, k2, k3, k4 = jax.random.split(key, 4)
    return {
        "w1": 0.01 * jax.random.normal(k1, (in_features, hidden), dtype),
        "b1": jnp.zeros((1, hidden), dtype),
        "w2": 0.01 * jax.random.normal(k2, (hidden, hidden), dtype),
        "b2": jnp.zeros((1, hidden), dtype),
        "wc": 0.01 * jax.random.normal(k3, (hidden, num_classes), dtype),
        "bc": jnp.zeros((1, num_classes), dtype),
        "wb": 0.001 * jax.random.normal(k4, (hidden, num_classes * 4), dtype),
        "bb": jnp.zeros((1, num_classes * 4), dtype),
    }


def pack_params(params, num_classes):
    """One-time weight prep (hoisted out of the forward): pad + fuse heads + bf16 cast."""
    in_features, hidden = params["w1"].shape
    assert hidden % 128 == 0, "hidden must be a multiple of 128"
    f_pad = _round_up(in_features, 128)
    head_out = 5 * num_classes
    head_pad = _round_up(head_out, 128)

    w1 = params["w1"].astype(jnp.bfloat16)
    if f_pad != in_features:
        w1 = jnp.zeros((f_pad, hidden), jnp.bfloat16).at[:in_features].set(w1)
    w2 = params["w2"].astype(jnp.bfloat16)

    wh = jnp.zeros((hidden, head_pad), jnp.bfloat16)
    wh = wh.at[:, :num_classes].set(params["wc"].astype(jnp.bfloat16))
    wh = wh.at[:, num_classes:head_out].set(params["wb"].astype(jnp.bfloat16))
    bh = jnp.zeros((1, head_pad), jnp.float32)
    bh = bh.at[:, :num_classes].set(params["bc"].astype(jnp.float32))
    bh = bh.at[:, num_classes:head_out].set(params["bb"].astype(jnp.float32))

    return {
        "w1": w1, "b1": params["b1"].astype(jnp.float32),
        "w2": w2, "b2": params["b2"].astype(jnp.float32),
        "wh": wh, "bh": bh,
    }


@functools.partial(jax.jit, static_argnames=("num_classes", "out_dtype"))
def fast_rcnn_head_forward(x_nchw, packed, *, num_classes, out_dtype=jnp.float32):
    """x_nchw: (n_rois, C, H, W). Returns (cls_scores, bbox_preds)."""
    n = x_nchw.shape[0]
    x_flat = x_nchw.reshape(n, -1)                    # glue: torch .view
    in_features = x_flat.shape[1]

    f_pad, hidden = packed["w1"].shape
    head_pad = packed["wh"].shape[1]
    assert f_pad == _round_up(in_features, 128), \
        "packed params do not match input feature size"

    vmem_limit, n_row_tiles, tk_cap, w1_bufs = _hw_config()
    tm, n_pad = _row_tiling(n, n_row_tiles)
    tk = _fc1_k_tile(f_pad, tk_cap)
    n_k = f_pad // tk
    grid = (n_pad // tm, n_k)

    # Cast to bf16; only materialize a padded copy if padding is actually needed
    # (for 128-aligned in_features and tm-aligned n this copy disappears).
    x_bf = x_flat.astype(jnp.bfloat16)
    padded_copy = (n_pad != n) or (f_pad != in_features)
    if padded_copy:
        x_bf = jnp.zeros((n_pad, f_pad), jnp.bfloat16).at[:n, :in_features].set(x_bf)

    # w1 is the only operand whose block index changes along the K axis; when the
    # whole reduction is a single step its index is constant -> single-buffer it.
    w1_mode = pl.Buffered(1) if n_k == 1 else pl.Buffered(min(w1_bufs, n_k))
    const_mode = pl.Buffered(1)   # resident, constant-index operands

    flops = 2 * n_pad * (f_pad * hidden + hidden * hidden + hidden * head_pad)
    bytes_accessed = (
        x_bf.size * 2                                    # x streamed once
        + grid[0] * packed["w1"].size * 2                # w1 streamed once per row tile
        + packed["w2"].size * 2 + packed["wh"].size * 2
        + (packed["b1"].size + packed["b2"].size + packed["bh"].size) * 4
        + n_pad * head_pad * jnp.dtype(out_dtype).itemsize)
    if padded_copy:
        bytes_accessed += (x_flat.size * x_flat.dtype.itemsize + x_bf.size * 2)

    out = pl.pallas_call(
        fast_rcnn_head_kernel,
        out_shape=jax.ShapeDtypeStruct((n_pad, head_pad), out_dtype),
        grid_spec=pltpu.PrefetchScalarGridSpec(
            num_scalar_prefetch=0,
            grid=grid,
            in_specs=[
                pl.BlockSpec((tm, tk), lambda i, k: (i, k)),            # x tile
                pl.BlockSpec((tk, hidden), lambda i, k: (k, 0),         # w1 (K-streamed)
                             pipeline_mode=w1_mode),
                pl.BlockSpec((1, hidden), lambda i, k: (0, 0),          # b1 (resident)
                             pipeline_mode=const_mode),
                pl.BlockSpec((hidden, hidden), lambda i, k: (0, 0),     # w2 (resident)
                             pipeline_mode=const_mode),
                pl.BlockSpec((1, hidden), lambda i, k: (0, 0),          # b2 (resident)
                             pipeline_mode=const_mode),
                pl.BlockSpec((hidden, head_pad), lambda i, k: (0, 0),   # fused head W
                             pipeline_mode=const_mode),
                pl.BlockSpec((1, head_pad), lambda i, k: (0, 0),        # fused head b
                             pipeline_mode=const_mode),
            ],
            out_specs=pl.BlockSpec((tm, head_pad), lambda i, k: (i, 0)),
            scratch_shapes=[
                pltpu.VMEM((tm, hidden), jnp.float32),    # fc1 accumulator
                pltpu.VMEM((tm, hidden), jnp.bfloat16),   # bf16 activation staging
            ],
        ),
        compiler_params=pltpu.CompilerParams(
            dimension_semantics=("parallel", "arbitrary"),
            vmem_limit_bytes=vmem_limit,
        ),
        cost_estimate=pl.CostEstimate(flops=int(flops), transcendentals=0,
                                      bytes_accessed=int(bytes_accessed)),
    )(x_bf, packed["w1"], packed["b1"], packed["w2"], packed["b2"],
      packed["wh"], packed["bh"])

    # Padded rows (n..n_pad) contain bias-only values; they are sliced away here.
    cls_scores = out[:n, :num_classes]
    bbox_preds = out[:n, num_classes:5 * num_classes]
    return cls_scores, bbox_preds


def reference_forward(x_nchw, params):
    """Pure-JAX reference with the same bf16-weight / f32-accumulate numerics."""
    bf = jnp.bfloat16
    x = x_nchw.reshape(x_nchw.shape[0], -1)
    h = jnp.maximum(jnp.dot(x.astype(bf), params["w1"].astype(bf),
                            preferred_element_type=jnp.float32) + params["b1"], 0.0)
    h = jnp.maximum(jnp.dot(h.astype(bf), params["w2"].astype(bf),
                            preferred_element_type=jnp.float32) + params["b2"], 0.0)
    cls = jnp.dot(h.astype(bf), params["wc"].astype(bf),
                  preferred_element_type=jnp.float32) + params["bc"]
    bbox = jnp.dot(h.astype(bf), params["wb"].astype(bf),
                   preferred_element_type=jnp.float32) + params["bb"]
    return cls, bbox


if __name__ == "__main__":
    # Small, module-consistent shapes that still exercise the tiling logic:
    # 320 RoIs (1 row tile on v5e/v6e, 2x160 on v7x); in_channels=16, 6x6 RoI
    # pool -> in_features=576 (pads to 640); hidden=512 stands in for 4096;
    # num_classes=21 (fused head = 105 -> 128 lanes).
    n_rois, in_channels, roi_h, roi_w = 320, 16, 6, 6
    hidden, num_classes = 512, 21
    in_features = in_channels * roi_h * roi_w

    key = jax.random.PRNGKey(0)
    kx, kp = jax.random.split(key)
    x = jax.random.normal(kx, (n_rois, in_channels, roi_h, roi_w), jnp.float32)

    params = make_params(kp, in_features, hidden, num_classes)
    packed = pack_params(params, num_classes)

    cls_scores, bbox_preds = fast_rcnn_head_forward(x, packed, num_classes=num_classes)
    jax.block_until_ready((cls_scores, bbox_preds))

    cls_ref, bbox_ref = reference_forward(x, params)
    assert cls_scores.shape == (n_rois, num_classes)
    assert bbox_preds.shape == (n_rois, num_classes * 4)
    assert jnp.allclose(cls_scores, cls_ref, atol=2e-4, rtol=2e-2), \
        float(jnp.max(jnp.abs(cls_scores - cls_ref)))
    assert jnp.allclose(bbox_preds, bbox_ref, atol=2e-4, rtol=2e-2), \
        float(jnp.max(jnp.abs(bbox_preds - bbox_ref)))

    print("KERNEL_OK")
</pallas_src>

<mosaic_0001>
module attributes {stable_mosaic.version = 11 : i64} {
  func.func @fast_rcnn_head_kernel(%arg0: i32, %arg1: i32, %arg2: memref<160x128xbf16, #tpu.memory_space<vmem>>, %arg3: memref<128x512xbf16, #tpu.memory_space<vmem>>, %arg4: memref<1x512xf32, #tpu.memory_space<vmem>>, %arg5: memref<512x512xbf16, #tpu.memory_space<vmem>>, %arg6: memref<1x512xf32, #tpu.memory_space<vmem>>, %arg7: memref<512x128xbf16, #tpu.memory_space<vmem>>, %arg8: memref<1x128xf32, #tpu.memory_space<vmem>>, %arg9: memref<160x128xf32, #tpu.memory_space<vmem>>, %arg10: memref<160x512xf32, #tpu.memory_space<vmem>>, %arg11: memref<160x512xbf16, #tpu.memory_space<vmem>>) attributes {dimension_semantics = [#tpu.dimension_semantics<parallel>, #tpu.dimension_semantics<arbitrary>], iteration_bounds = array<i64: 2, 5>, scalar_prefetch = 0 : i64, scratch_operands = 2 : i64, tpu.core_type = #tpu.core_type<tc>, window_params = [{transform_indices = @transform_0, window_bounds = array<i64: 160, 128>}, {pipeline_mode = #tpu.pipeline_mode<double_buffered>, transform_indices = @transform_1, window_bounds = array<i64: 128, 512>}, {pipeline_mode = #tpu.pipeline_mode<synchronous>, transform_indices = @transform_2, window_bounds = array<i64: 1, 512>}, {pipeline_mode = #tpu.pipeline_mode<synchronous>, transform_indices = @transform_3, window_bounds = array<i64: 512, 512>}, {pipeline_mode = #tpu.pipeline_mode<synchronous>, transform_indices = @transform_4, window_bounds = array<i64: 1, 512>}, {pipeline_mode = #tpu.pipeline_mode<synchronous>, transform_indices = @transform_5, window_bounds = array<i64: 512, 128>}, {pipeline_mode = #tpu.pipeline_mode<synchronous>, transform_indices = @transform_6, window_bounds = array<i64: 1, 128>}, {transform_indices = @transform_7, window_bounds = array<i64: 160, 128>}]} {
    %c0_i32 = arith.constant 0 : i32
    %0 = arith.cmpi eq, %arg1, %c0_i32 : i32
    %1 = arith.extui %0 : i1 to i32
    %c0_i32_0 = arith.constant 0 : i32
    %2 = arith.cmpi ne, %1, %c0_i32_0 : i32
    scf.if %2 {
      %cst_9 = arith.constant 0.000000e+00 : f32
      %12 = vector.broadcast %cst_9 : f32 to vector<160x512xf32>
      %c0_10 = arith.constant 0 : index
      %c0_11 = arith.constant 0 : index
      %13 = vector.load %arg10[%c0_10, %c0_11] : memref<160x512xf32, #tpu.memory_space<vmem>>, vector<160x512xf32>
      tpu.vector_store %arg10[%c0_10, %c0_11], %12 {strides = array<i32>} : memref<160x512xf32, #tpu.memory_space<vmem>>, vector<160x512xf32>,
    } else {
    }
    %c0 = arith.constant 0 : index
    %c0_1 = arith.constant 0 : index
    %3 = vector.load %arg10[%c0, %c0_1] : memref<160x512xf32, #tpu.memory_space<vmem>>, vector<160x512xf32>
    %c0_2 = arith.constant 0 : index
    %c0_3 = arith.constant 0 : index
    %4 = vector.load %arg2[%c0_2, %c0_3] : memref<160x128xbf16, #tpu.memory_space<vmem>>, vector<160x128xbf16>
    %c0_4 = arith.constant 0 : index
    %c0_5 = arith.constant 0 : index
    %5 = vector.load %arg3[%c0_4, %c0_5] : memref<128x512xbf16, #tpu.memory_space<vmem>>, vector<128x512xbf16>
    %cst = arith.constant dense<0.000000e+00> : vector<160x512xf32>
    %6 = tpu.matmul %4, %5, %cst {dimension_numbers = #tpu.dot_dimension_numbers<[1], [0], [0], [1], [0, 0, 1, 1], [], []>} : vector<160x128xbf16>, vector<128x512xbf16>, vector<160x512xf32> -> vector<160x512xf32>
    %7 = arith.addf %3, %6 : vector<160x512xf32>
    %c0_6 = arith.constant 0 : index
    %c0_7 = arith.constant 0 : index
    %8 = vector.load %arg10[%c0_6, %c0_7] : memref<160x512xf32, #tpu.memory_space<vmem>>, vector<160x512xf32>
    tpu.vector_store %arg10[%c0_6, %c0_7], %7 {strides = array<i32>} : memref<160x512xf32, #tpu.memory_space<vmem>>, vector<160x512xf32>,
    %c4_i32 = arith.constant 4 : i32
    %9 = arith.cmpi eq, %arg1, %c4_i32 : i32
    %10 = arith.extui %9 : i1 to i32
    %c0_i32_8 = arith.constant 0 : i32
    %11 = arith.cmpi ne, %10, %c0_i32_8 : i32
    scf.if %11 {
      %c0_9 = arith.constant 0 : index
      %c0_10 = arith.constant 0 : index
      %12 = vector.load %arg10[%c0_9, %c0_10] : memref<160x512xf32, #tpu.memory_space<vmem>>, vector<160x512xf32>
      %c0_11 = arith.constant 0 : index
      %c0_12 = arith.constant 0 : index
      %13 = vector.load %arg4[%c0_11, %c0_12] : memref<1x512xf32, #tpu.memory_space<vmem>>, vector<1x512xf32>
      %14 = vector.broadcast %13 : vector<1x512xf32> to vector<160x512xf32>
      %15 = arith.addf %12, %14 : vector<160x512xf32>
      %cst_13 = arith.constant 0.000000e+00 : f32
      %16 = vector.broadcast %cst_13 : f32 to vector<160x512xf32>
      %17 = arith.maximumf %15, %16 : vector<160x512xf32>
      %18 = arith.truncf %17 : vector<160x512xf32> to vector<160x512xbf16>
      %c0_14 = arith.constant 0 : index
      %c0_15 = arith.constant 0 : index
      %19 = vector.load %arg11[%c0_14, %c0_15] : memref<160x512xbf16, #tpu.memory_space<vmem>>, vector<160x512xbf16>
      tpu.vector_store %arg11[%c0_14, %c0_15], %18 {strides = array<i32>} : memref<160x512xbf16, #tpu.memory_space<vmem>>, vector<160x512xbf16>,
      %c0_16 = arith.constant 0 : index
      %c0_17 = arith.constant 0 : index
      %20 = vector.load %arg11[%c0_16, %c0_17] : memref<160x512xbf16, #tpu.memory_space<vmem>>, vector<160x512xbf16>
      %c0_18 = arith.constant 0 : index
      %c0_19 = arith.constant 0 : index
      %21 = vector.load %arg5[%c0_18, %c0_19] : memref<512x512xbf16, #tpu.memory_space<vmem>>, vector<512x512xbf16>
      %cst_20 = arith.constant dense<0.000000e+00> : vector<160x512xf32>
      %22 = tpu.matmul %20, %21, %cst_20 {dimension_numbers = #tpu.dot_dimension_numbers<[1], [0], [0], [1], [0, 0, 1, 1], [], []>} : vector<160x512xbf16>, vector<512x512xbf16>, vector<160x512xf32> -> vector<160x512xf32>
      %c0_21 = arith.constant 0 : index
      %c0_22 = arith.constant 0 : index
      %23 = vector.load %arg6[%c0_21, %c0_22] : memref<1x512xf32, #tpu.memory_space<vmem>>, vector<1x512xf32>
      %24 = vector.broadcast %23 : vector<1x512xf32> to vector<160x512xf32>
      %25 = arith.addf %22, %24 : vector<160x512xf32>
      %cst_23 = arith.constant 0.000000e+00 : f32
      %26 = vector.broadcast %cst_23 : f32 to vector<160x512xf32>
      %27 = arith.maximumf %25, %26 : vector<160x512xf32>
      %28 = arith.truncf %27 : vector<160x512xf32> to vector<160x512xbf16>
      %c0_24 = arith.constant 0 : index
      %c0_25 = arith.constant 0 : index
      %29 = vector.load %arg11[%c0_24, %c0_25] : memref<160x512xbf16, #tpu.memory_space<vmem>>, vector<160x512xbf16>
      tpu.vector_store %arg11[%c0_24, %c0_25], %28 {strides = array<i32>} : memref<160x512xbf16, #tpu.memory_space<vmem>>, vector<160x512xbf16>,
      %c0_26 = arith.constant 0 : index
      %c0_27 = arith.constant 0 : index
      %30 = vector.load %arg11[%c0_26, %c0_27] : memref<160x512xbf16, #tpu.memory_space<vmem>>, vector<160x512xbf16>
      %c0_28 = arith.constant 0 : index
      %c0_29 = arith.constant 0 : index
      %31 = vector.load %arg7[%c0_28, %c0_29] : memref<512x128xbf16, #tpu.memory_space<vmem>>, vector<512x128xbf16>
      %cst_30 = arith.constant dense<0.000000e+00> : vector<160x128xf32>
      %32 = tpu.matmul %30, %31, %cst_30 {dimension_numbers = #tpu.dot_dimension_numbers<[1], [0], [0], [1], [0, 0, 1, 1], [], []>} : vector<160x512xbf16>, vector<512x128xbf16>, vector<160x128xf32> -> vector<160x128xf32>
      %c0_31 = arith.constant 0 : index
      %c0_32 = arith.constant 0 : index
      %33 = vector.load %arg8[%c0_31, %c0_32] : memref<1x128xf32, #tpu.memory_space<vmem>>, vector<1x128xf32>
      %34 = vector.broadcast %33 : vector<1x128xf32> to vector<160x128xf32>
      %35 = arith.addf %32, %34 : vector<160x128xf32>
      %c0_33 = arith.constant 0 : index
      %c0_34 = arith.constant 0 : index
      %36 = vector.load %arg9[%c0_33, %c0_34] : memref<160x128xf32, #tpu.memory_space<vmem>>, vector<160x128xf32>
      tpu.vector_store %arg9[%c0_33, %c0_34], %35 {strides = array<i32>} : memref<160x128xf32, #tpu.memory_space<vmem>>, vector<160x128xf32>,
    } else {
    }
    return
  }
  func.func @transform_0(%arg0: i32, %arg1: i32) -> (i32, i32) {
    %c0_i32 = arith.constant 0 : i32
    return %arg0, %arg1 : i32, i32
  }
  func.func @transform_1(%arg0: i32, %arg1: i32) -> (i32, i32) {
    %c0_i32 = arith.constant 0 : i32
    %c0_i32_0 = arith.constant 0 : i32
    return %arg1, %c0_i32 : i32, i32
  }
  func.func @transform_2(%arg0: i32, %arg1: i32) -> (i32, i32) {
    %c0_i32 = arith.constant 0 : i32
    %c0_i32_0 = arith.constant 0 : i32
    %c0_i32_1 = arith.constant 0 : i32
    return %c0_i32, %c0_i32_0 : i32, i32
  }
  func.func @transform_3(%arg0: i32, %arg1: i32) -> (i32, i32) {
    %c0_i32 = arith.constant 0 : i32
    %c0_i32_0 = arith.constant 0 : i32
    %c0_i32_1 = arith.constant 0 : i32
    return %c0_i32, %c0_i32_0 : i32, i32
  }
  func.func @transform_4(%arg0: i32, %arg1: i32) -> (i32, i32) {
    %c0_i32 = arith.constant 0 : i32
    %c0_i32_0 = arith.constant 0 : i32
    %c0_i32_1 = arith.constant 0 : i32
    return %c0_i32, %c0_i32_0 : i32, i32
  }
  func.func @transform_5(%arg0: i32, %arg1: i32) -> (i32, i32) {
    %c0_i32 = arith.constant 0 : i32
    %c0_i32_0 = arith.constant 0 : i32
    %c0_i32_1 = arith.constant 0 : i32
    return %c0_i32, %c0_i32_0 : i32, i32
  }
  func.func @transform_6(%arg0: i32, %arg1: i32) -> (i32, i32) {
    %c0_i32 = arith.constant 0 : i32
    %c0_i32_0 = arith.constant 0 : i32
    %c0_i32_1 = arith.constant 0 : i32
    return %c0_i32, %c0_i32_0 : i32, i32
  }
  func.func @transform_7(%arg0: i32, %arg1: i32) -> (i32, i32) {
    %c0_i32 = arith.constant 0 : i32
    %c0_i32_0 = arith.constant 0 : i32
    return %arg0, %c0_i32 : i32, i32
  }
}

</mosaic_0001>

<bundles_post_ra>
// kernel: fast_rcnn_head_forward.1
= control target key start
LH: loop header
LB: loop body
LE: loop exit
PB: predicated region body
PF: predicated region fallthrough
CT: control target
= control target key end

     0   :  { %s4780_s24 = smov 0   ;;  %s4782_s25 = smov 0   ;;  %s5801_s0 = inlined_call_operand.vmem [shape: bf16[320,640], index: 0, kind: input, shape index: {}]   ;;  %s5802_s1 = inlined_call_operand.vmem [shape: bf16[640,512], index: 1, kind: input, shape index: {}]   ;;  %s5803_s2 = inlined_call_operand.vmem [shape: f32[1,512], index: 2, kind: input, shape index: {}]   ;;  %s5804_s3 = inlined_call_operand.vmem [shape: bf16[512,512], index: 3, kind: input, shape index: {}]   ;;  %s5805_s4 = inlined_call_operand.vmem [shape: f32[1,512], index: 4, kind: input, shape index: {}]   ;;  %s5806_s5 = inlined_call_operand.vmem [shape: bf16[512,128], index: 5, kind: input, shape index: {}]   ;;  %s5807_s6 = inlined_call_operand.vmem [shape: f32[1,128], index: 6, kind: input, shape index: {}]   ;;  %s5808_s7 = inlined_call_operand.vmem [shape: f32[320,128], index: 7, kind: output, shape index: {}]  }
   0x1   :  { %s4784_s26 = smov 0   ;;  %s4786_s27 = smov 0  }
   0x2   :  { %s4788_s28 = smov 0   ;;  %s4790_s29 = smov 0  }
   0x3   :  { %s4792_s30 = smov 0  }
   0x4 LB: > { %s26_s8 = sadd.s32 1, %s4728_s28  ;;  %s29_s9 = sadd.s32 1, %s4732_s29  ;;  %s4736_s30 = sphi %s4792_s30, %s17_s30   ;;  %s4732_s29 = sphi %s4790_s29, %s5814_s29   ;;  %s4728_s28 = sphi %s4788_s28, %s5813_s28   ;;  %s4724_s27 = sphi %s4786_s27, %s5812_s27   ;;  %s4720_s26 = sphi %s4784_s26, %s5811_s26   ;;  %s4716_s25 = sphi %s4782_s25, %s5810_s25   ;;  %s4712_s24 = sphi %s4780_s24, %s5809_s24  }
   0x5   : > { %p27_p0 = scmp.ge.s32.totalorder %s26_s8, 5  ;;  %p45_p1 = scmp.ne.s32.totalorder %s4716_s25, %s4712_s24 }
   0x6   : > { %p46_p2 = scmp.eq.s32.totalorder %s4736_s30, 0  ;;  %s38_s13 = sadd.s32 1, %s4716_s25 }
   0x7   : > { %s5816_s8 = smov (%p27_p0, %s26_s8), 0  ;;  %s5818_s9 = smov (!%p27_p0, %s29_s9), %s4732_s29 }
   0x8   : > { %p47_p3 = por %p46_p2, %p45_p1  ;;  %p31_p4 = scmp.ge.s32.totalorder %s5818_s9, 2 }
   0x9   : > { %s34_s10 = ssub.s32 %s4728_s28, %s5816_s8  ;;  %p3811_p6 = scmp.ge.s32.totalorder %s4736_s30, 10 }
   0xa   : > { %s5820_s9 = smov (%p31_p4, %s5818_s9), 0 }
   0xb   : > { %s33_s11 = ssub.s32 %s4732_s29, %s5820_s9  ;;  %243 = sbr.rel (%p3811_p6) target bundleno = 39 (0x27), region = 36 }
   0xc   : > { %s35_s12 = sor.u32 %s34_s10, %s33_s11 }
   0xd   : > { %p36_p5 = scmp.eq.s32.totalorder %s35_s12, 0 }
   0xf   : > { %s4831_s14 = scalar_select %p36_p5, %s4716_s25, %s38_s13  }
  0x12   : > { %246 = sbr.rel (!%p47_p3) target bundleno = 39 (0x27), region = 40  ;;  %s248_s15 = sand.u32 (%p47_p3), 1, %s4716_s25  }
  0x13   : > { %s4338_s16 = smul.u32 (%p47_p3), 80, %s248_s15 }
  0x14   : > { %s4341_s17 = smul.u32 (%p47_p3), 100, %s4732_s29 }
  0x15   : > { %s4845_s23 = scalar_lea.vmem (%p47_p3), [#allocation4], %s4338_s16 }
  0x16   : > { %s253_s18 = sadd.s32 (%p47_p3), %s4728_s28, %s4341_s17 }
  0x17   : > { %s3812_s19 = sshll.u32 (%p47_p3), %s253_s18, 2 }
  0x18   : > { %s4840_s22 = scalar_lea.vmem (%p47_p3), %s5801_s0, %s3812_s19 }
  0x19   : > { %v271_v0 = vld [vmem:[%s4840_s22] sm:$0xf]  ;;  %v273_v1 = vld [vmem:[%s4840_s22 + $0x14] sm:$0xf]  ;;  %v275_v2 = vld [vmem:[%s4840_s22 + $0x28] sm:$0xf] }
  0x1a   : > { %272 = vst [vmem:[%s4845_s23] sm:$0xf] %v271_v0  ;;  %274 = vst [vmem:[%s4845_s23 + $0x4] sm:$0xf] %v273_v1  ;;  %v277_v3 = vld [vmem:[%s4840_s22 + $0x3c] sm:$0xf] }
  0x1b   : > { %276 = vst [vmem:[%s4845_s23 + $0x8] sm:$0xf] %v275_v2  ;;  %v279_v4 = vld [vmem:[%s4840_s22 + $0x50] sm:$0xf]  ;;  %v281_v5 = vld [vmem:[%s4840_s22 + $0x64] sm:$0xf] }
  0x1c   : > { %278 = vst [vmem:[%s4845_s23 + $0xc] sm:$0xf] %v277_v3  ;;  %280 = vst [vmem:[%s4845_s23 + $0x10] sm:$0xf] %v279_v4  ;;  %v283_v6 = vld [vmem:[%s4840_s22 + $0x78] sm:$0xf] }
  0x1d   : > { %282 = vst [vmem:[%s4845_s23 + $0x14] sm:$0xf] %v281_v5  ;;  %v285_v7 = vld [vmem:[%s4840_s22 + $0x8c] sm:$0xf]  ;;  %v287_v8 = vld [vmem:[%s4840_s22 + $0xa0] sm:$0xf] }
  0x1e   : > { %284 = vst [vmem:[%s4845_s23 + $0x18] sm:$0xf] %v283_v6  ;;  %286 = vst [vmem:[%s4845_s23 + $0x1c] sm:$0xf] %v285_v7  ;;  %v289_v9 = vld [vmem:[%s4840_s22 + $0xb4] sm:$0xf] }
  0x1f   : > { %288 = vst [vmem:[%s4845_s23 + $0x20] sm:$0xf] %v287_v8  ;;  %v291_v10 = vld [vmem:[%s4840_s22 + $0xc8] sm:$0xf]  ;;  %v293_v11 = vld [vmem:[%s4840_s22 + $0xdc] sm:$0xf] }
  0x20   : > { %290 = vst [vmem:[%s4845_s23 + $0x24] sm:$0xf] %v289_v9  ;;  %292 = vst [vmem:[%s4845_s23 + $0x28] sm:$0xf] %v291_v10  ;;  %v295_v12 = vld [vmem:[%s4840_s22 + $0xf0] sm:$0xf] }
  0x21   : > { %294 = vst [vmem:[%s4845_s23 + $0x2c] sm:$0xf] %v293_v11  ;;  %v297_v13 = vld [vmem:[%s4840_s22 + $0x104] sm:$0xf]  ;;  %v299_v14 = vld [vmem:[%s4840_s22 + $0x118] sm:$0xf] }
  0x22   : > { %296 = vst [vmem:[%s4845_s23 + $0x30] sm:$0xf] %v295_v12  ;;  %298 = vst [vmem:[%s4845_s23 + $0x34] sm:$0xf] %v297_v13  ;;  %v301_v15 = vld [vmem:[%s4840_s22 + $0x12c] sm:$0xf] }
  0x23   : > { %300 = vst [vmem:[%s4845_s23 + $0x38] sm:$0xf] %v299_v14  ;;  %v303_v16 = vld [vmem:[%s4840_s22 + $0x140] sm:$0xf]  ;;  %v305_v17 = vld [vmem:[%s4840_s22 + $0x154] sm:$0xf] }
  0x24   : > { %302 = vst [vmem:[%s4845_s23 + $0x3c] sm:$0xf] %v301_v15  ;;  %304 = vst [vmem:[%s4845_s23 + $0x40] sm:$0xf] %v303_v16  ;;  %v307_v18 = vld [vmem:[%s4840_s22 + $0x168] sm:$0xf] }
  0x25   : > { %306 = vst [vmem:[%s4845_s23 + $0x44] sm:$0xf] %v305_v17  ;;  %v309_v19 = vld [vmem:[%s4840_s22 + $0x17c] sm:$0xf]  ;;  %308 = vst [vmem:[%s4845_s23 + $0x48] sm:$0xf] %v307_v18 }
  0x26   : > { %310 = vst [vmem:[%s4845_s23 + $0x4c] sm:$0xf] %v309_v19 }
  0x27 PF: > { %p3813_p7 = scmp.ge.s32.totalorder %s4736_s30, 1  ;;  %p382_p8 = scmp.lt.s32.totalorder %s4736_s30, 11 }
  0x29   : > { %p383_p9 = pnand %p3813_p7, %p382_p8 }
  0x2a   : > { %s389_s10 = sand.u32 (!%p383_p9), 1, %s4712_s24   ;;  %s3814_s11 = sshll.u32 (!%p383_p9), %s4720_s26, 4 }
  0x2b   : > { %386 = sbr.rel (%p383_p9) target bundleno = 1057 (0x421), region = 85  ;;  %p428_p10 = scmp.lt.s32.totalorder (!%p383_p9), %s3814_s11, 79 }
  0x2c   : > { %s4340_s12 = smul.u32 (!%p383_p9), 80, %s389_s10  ;;  %p3818_p12 = scmp.ne.s32.totalorder (!%p383_p9), %s4720_s26, 0 }
  0x2d   : > { %s434_s13 = smul.u32 (!%p383_p9), 20, %s4724_s27 }
  0x2e   : > { %s4899_s24 = scalar_lea.vmem (!%p383_p9), [#allocation4], %s4340_s12 }
  0x2f   : > { %p435_p11 = scmp.lt.s32.totalorder (!%p383_p9), %s434_s13, 39 }
  0x32   : > { %s5822_s11 = smov (!%p428_p10, %s3814_s11), 79  ;;  %s5824_s13 = smov (!%p435_p11, %s434_s13), 39 }
  0x33   : > { %s4025_s15 = sshll.u32 %s5822_s11, 4  ;;  %s3817_s19 = sshll.u32 %s5824_s13, 3  ;;  %v4738_v20 = vmov (!%p3818_p12), 0.0  }
  0x34   : > { %s4892_s18 = scalar_lea.vmem %s5802_s1, %s4025_s15  ;;  %s4897_s22 = scalar_lea.vmem %s5808_s7, %s3817_s19  ;;  %445 = vst [vmem:[#allocation2] sm:$0xff] (!%p3818_p12), %v4738_v20  ;;  %446 = vst [vmem:[#allocation2 + $0x8] sm:$0xff] (!%p3818_p12), %v4738_v20 }
  0x35   : > { %444 = sbr.rel (%p3818_p12) target bundleno = 92 (0x5c), region = 93  ;;  %447 = vst [vmem:[#allocation2 + $0x10] sm:$0xff] (!%p3818_p12), %v4738_v20  ;;  %448 = vst [vmem:[#allocation2 + $0x18] sm:$0xff] (!%p3818_p12), %v4738_v20 }
  0x36   : > { %449 = vst [vmem:[#allocation2 + $0x20] sm:$0xff] (!%p3818_p12), %v4738_v20  ;;  %450 = vst [vmem:[#allocation2 + $0x28] sm:$0xff] (!%p3818_p12), %v4738_v20 }
  0x37   : > { %451 = vst [vmem:[#allocation2 + $0x30] sm:$0xff] (!%p3818_p12), %v4738_v20  ;;  %452 = vst [vmem:[#allocation2 + $0x38] sm:$0xff] (!%p3818_p12), %v4738_v20 }
  0x38   : > { %453 = vst [vmem:[#allocation2 + $0x40] sm:$0xff] (!%p3818_p12), %v4738_v20  ;;  %454 = vst [vmem:[#allocation2 + $0x48] sm:$0xff] (!%p3818_p12), %v4738_v20 }
  0x39   : > { %455 = vst [vmem:[#allocation2 + $0x50] sm:$0xff] (!%p3818_p12), %v4738_v20  ;;  %456 = vst [vmem:[#allocation2 + $0x58] sm:$0xff] (!%p3818_p12), %v4738_v20 }
  0x3a   : > { %457 = vst [vmem:[#allocation2 + $0x60] sm:$0xff] (!%p3818_p12), %v4738_v20  ;;  %458 = vst [vmem:[#allocation2 + $0x68] sm:$0xff] (!%p3818_p12), %v4738_v20 }
  0x3b   : > { %459 = vst [vmem:[#allocation2 + $0x70] sm:$0xff] (!%p3818_p12), %v4738_v20  ;;  %460 = vst [vmem:[#allocation2 + $0x78] sm:$0xff] (!%p3818_p12), %v4738_v20 }
  0x3c   : > { %461 = vst [vmem:[#allocation2 + $0x80] sm:$0xff] %v4738_v20  ;;  %462 = vst [vmem:[#allocation2 + $0x88] sm:$0xff] %v4738_v20 }
  0x3d   : > { %463 = vst [vmem:[#allocation2 + $0x90] sm:$0xff] %v4738_v20  ;;  %464 = vst [vmem:[#allocation2 + $0x98] sm:$0xff] %v4738_v20 }
  0x3e   : > { %465 = vst [vmem:[#allocation2 + $0xa0] sm:$0xff] %v4738_v20  ;;  %466 = vst [vmem:[#allocation2 + $0xa8] sm:$0xff] %v4738_v20 }
  0x3f   : > { %467 = vst [vmem:[#allocation2 + $0xb0] sm:$0xff] %v4738_v20  ;;  %468 = vst [vmem:[#allocation2 + $0xb8] sm:$0xff] %v4738_v20 }
  0x40   : > { %469 = vst [vmem:[#allocation2 + $0xc0] sm:$0xff] %v4738_v20  ;;  %470 = vst [vmem:[#allocation2 + $0xc8] sm:$0xff] %v4738_v20 }
  0x41   : > { %471 = vst [vmem:[#allocation2 + $0xd0] sm:$0xff] %v4738_v20  ;;  %472 = vst [vmem:[#allocation2 + $0xd8] sm:$0xff] %v4738_v20 }
  0x42   : > { %473 = vst [vmem:[#allocation2 + $0xe0] sm:$0xff] %v4738_v20  ;;  %474 = vst [vmem:[#allocation2 + $0xe8] sm:$0xff] %v4738_v20 }
  0x43   : > { %475 = vst [vmem:[#allocation2 + $0xf0] sm:$0xff] %v4738_v20  ;;  %476 = vst [vmem:[#allocation2 + $0xf8] sm:$0xff] %v4738_v20 }
  0x44   : > { %477 = vst [vmem:[#allocation2 + $0x100] sm:$0xff] %v4738_v20  ;;  %478 = vst [vmem:[#allocation2 + $0x108] sm:$0xff] %v4738_v20 }
  0x45   : > { %479 = vst [vmem:[#allocation2 + $0x110] sm:$0xff] %v4738_v20  ;;  %480 = vst [vmem:[#allocation2 + $0x118] sm:$0xff] %v4738_v20 }
  0x46   : > { %481 = vst [vmem:[#allocation2 + $0x120] sm:$0xff] %v4738_v20  ;;  %482 = vst [vmem:[#allocation2 + $0x128] sm:$0xff] %v4738_v20 }
  0x47   : > { %483 = vst [vmem:[#allocation2 + $0x130] sm:$0xff] %v4738_v20  ;;  %484 = vst [vmem:[#allocation2 + $0x138] sm:$0xff] %v4738_v20 }
  0x48   : > { %485 = vst [vmem:[#allocation2 + $0x140] sm:$0xff] %v4738_v20  ;;  %486 = vst [vmem:[#allocation2 + $0x148] sm:$0xff] %v4738_v20 }
  0x49   : > { %487 = vst [vmem:[#allocation2 + $0x150] sm:$0xff] %v4738_v20  ;;  %488 = vst [vmem:[#allocation2 + $0x158] sm:$0xff] %v4738_v20 }
  0x4a   : > { %489 = vst [vmem:[#allocation2 + $0x160] sm:$0xff] %v4738_v20  ;;  %490 = vst [vmem:[#allocation2 + $0x168] sm:$0xff] %v4738_v20 }
  0x4b   : > { %491 = vst [vmem:[#allocation2 + $0x170] sm:$0xff] %v4738_v20  ;;  %492 = vst [vmem:[#allocation2 + $0x178] sm:$0xff] %v4738_v20 }
  0x4c   : > { %493 = vst [vmem:[#allocation2 + $0x180] sm:$0xff] %v4738_v20  ;;  %494 = vst [vmem:[#allocation2 + $0x188] sm:$0xff] %v4738_v20 }
  0x4d   : > { %495 = vst [vmem:[#allocation2 + $0x190] sm:$0xff] %v4738_v20  ;;  %496 = vst [vmem:[#allocation2 + $0x198] sm:$0xff] %v4738_v20 }
  0x4e   : > { %497 = vst [vmem:[#allocation2 + $0x1a0] sm:$0xff] %v4738_v20  ;;  %498 = vst [vmem:[#allocation2 + $0x1a8] sm:$0xff] %v4738_v20 }
  0x4f   : > { %499 = vst [vmem:[#allocation2 + $0x1b0] sm:$0xff] %v4738_v20  ;;  %500 = vst [vmem:[#allocation2 + $0x1b8] sm:$0xff] %v4738_v20 }
  0x50   : > { %501 = vst [vmem:[#allocation2 + $0x1c0] sm:$0xff] %v4738_v20  ;;  %502 = vst [vmem:[#allocation2 + $0x1c8] sm:$0xff] %v4738_v20 }
  0x51   : > { %503 = vst [vmem:[#allocation2 + $0x1d0] sm:$0xff] %v4738_v20  ;;  %504 = vst [vmem:[#allocation2 + $0x1d8] sm:$0xff] %v4738_v20 }
  0x52   : > { %505 = vst [vmem:[#allocation2 + $0x1e0] sm:$0xff] %v4738_v20  ;;  %506 = vst [vmem:[#allocation2 + $0x1e8] sm:$0xff] %v4738_v20 }
  0x53   : > { %507 = vst [vmem:[#allocation2 + $0x1f0] sm:$0xff] %v4738_v20  ;;  %508 = vst [vmem:[#allocation2 + $0x1f8] sm:$0xff] %v4738_v20 }
  0x54   : > { %509 = vst [vmem:[#allocation2 + $0x200] sm:$0xff] %v4738_v20  ;;  %510 = vst [vmem:[#allocation2 + $0x208] sm:$0xff] %v4738_v20 }
  0x55   : > { %511 = vst [vmem:[#allocation2 + $0x210] sm:$0xff] %v4738_v20  ;;  %512 = vst [vmem:[#allocation2 + $0x218] sm:$0xff] %v4738_v20 }
  0x56   : > { %513 = vst [vmem:[#allocation2 + $0x220] sm:$0xff] %v4738_v20  ;;  %514 = vst [vmem:[#allocation2 + $0x228] sm:$0xff] %v4738_v20 }
  0x57   : > { %515 = vst [vmem:[#allocation2 + $0x230] sm:$0xff] %v4738_v20  ;;  %516 = vst [vmem:[#allocation2 + $0x238] sm:$0xff] %v4738_v20 }
  0x58   : > { %517 = vst [vmem:[#allocation2 + $0x240] sm:$0xff] %v4738_v20  ;;  %518 = vst [vmem:[#allocation2 + $0x248] sm:$0xff] %v4738_v20 }
  0x59   : > { %519 = vst [vmem:[#allocation2 + $0x250] sm:$0xff] %v4738_v20  ;;  %520 = vst [vmem:[#allocation2 + $0x258] sm:$0xff] %v4738_v20 }
  0x5a   : > { %521 = vst [vmem:[#allocation2 + $0x260] sm:$0xff] %v4738_v20  ;;  %522 = vst [vmem:[#allocation2 + $0x268] sm:$0xff] %v4738_v20 }
  0x5b   : > { %523 = vst [vmem:[#allocation2 + $0x270] sm:$0xff] %v4738_v20  ;;  %524 = vst [vmem:[#allocation2 + $0x278] sm:$0xff] %v4738_v20 }
  0x5c PF: > { %v4400_v21 = vld [vmem:[%s4892_s18 + $0x4] ss:$16 sps:$4 sm:$0xff]   ;;  %v4402_v22 = vld [vmem:[%s4892_s18 + $0xc] ss:$16 sps:$4 sm:$0xff]   ;;  %v4739_v23 = vmov 0   ;;  %p3861_p13 = scmp.ne.s32.totalorder %s4720_s26, 4 }
  0x5d   : > { %909 = vmatprep.mubr.bf16.mxu0 %v4739_v23  ;;  %1042 = vmatprep.mubr.bf16.mxu1 %v4739_v23  ;;  %v4404_v24 = vld [vmem:[%s4892_s18] ss:$16 sps:$4 sm:$0xff]   ;;  %v4405_v25 = vld [vmem:[%s4892_s18 + $0x8] ss:$16 sps:$4 sm:$0xff]   ;;  %v4406_v26 = vld [vmem:[%s4892_s18 + $0x24] ss:$16 sps:$4 sm:$0xff]  }
  0x5e   : > { %877 = vmatprep.subr.bf16.mxu0 %v4400_v21  ;;  %1010 = vmatprep.subr.bf16.mxu1 %v4402_v22  ;;  %v4408_v27 = vld [vmem:[%s4892_s18 + $0x2c] ss:$16 sps:$4 sm:$0xff]   ;;  %v4410_v28 = vld [vmem:[%s4892_s18 + $0x20] ss:$16 sps:$4 sm:$0xff]   ;;  %v4411_v29 = vld [vmem:[%s4892_s18 + $0x28] ss:$16 sps:$4 sm:$0xff]  }
  0x5f   : > { %878 = vmatpush1.bf16.msra.mxu0 %v4404_v24  ;;  %1011 = vmatpush1.bf16.msra.mxu1 %v4405_v25  ;;  %v4412_v30 = vld [vmem:[%s4892_s18 + $0x44] ss:$16 sps:$4 sm:$0xff]   ;;  %v4414_v31 = vld [vmem:[%s4892_s18 + $0x4c] ss:$16 sps:$4 sm:$0xff]   ;;  %v4416_v32 = vld [vmem:[%s4892_s18 + $0x40] ss:$16 sps:$4 sm:$0xff]  }
  0x60   : > { %879 = vmatprep.subr.bf16.mxu0 %v4406_v26  ;;  %1012 = vmatprep.subr.bf16.mxu1 %v4408_v27  ;;  %v4417_v33 = vld [vmem:[%s4892_s18 + $0x48] ss:$16 sps:$4 sm:$0xff]   ;;  %v4418_v34 = vld [vmem:[%s4892_s18 + $0x64] ss:$16 sps:$4 sm:$0xff]   ;;  %v4420_v35 = vld [vmem:[%s4892_s18 + $0x6c] ss:$16 sps:$4 sm:$0xff]  }
  0x61   : > { %v4422_v36 = vld [vmem:[%s4892_s18 + $0x60] ss:$16 sps:$4 sm:$0xff]   ;;  %v4423_v37 = vld [vmem:[%s4892_s18 + $0x68] ss:$16 sps:$4 sm:$0xff]   ;;  %v4424_v38 = vld [vmem:[%s4892_s18 + $0x84] ss:$16 sps:$4 sm:$0xff]  }
  0x62   : > { %v4426_v39 = vld [vmem:[%s4892_s18 + $0x8c] ss:$16 sps:$4 sm:$0xff]   ;;  %v4428_v40 = vld [vmem:[%s4892_s18 + $0x80] ss:$16 sps:$4 sm:$0xff]   ;;  %v4429_v41 = vld [vmem:[%s4892_s18 + $0x88] ss:$16 sps:$4 sm:$0xff]  }
  0x63   : > { %880 = vmatpush1.bf16.msra.mxu0 %v4410_v28  ;;  %1013 = vmatpush1.bf16.msra.mxu1 %v4411_v29  ;;  %v4430_v42 = vld [vmem:[%s4892_s18 + $0xa4] ss:$16 sps:$4 sm:$0xff]   ;;  %v4432_v43 = vld [vmem:[%s4892_s18 + $0xac] ss:$16 sps:$4 sm:$0xff]   ;;  %v4434_v44 = vld [vmem:[%s4892_s18 + $0xa0] ss:$16 sps:$4 sm:$0xff]  }
  0x64   : > { %881 = vmatprep.subr.bf16.mxu0 %v4412_v30  ;;  %1014 = vmatprep.subr.bf16.mxu1 %v4414_v31  ;;  %v4435_v45 = vld [vmem:[%s4892_s18 + $0xa8] ss:$16 sps:$4 sm:$0xff]   ;;  %v4436_v46 = vld [vmem:[%s4892_s18 + $0xc4] ss:$16 sps:$4 sm:$0xff]   ;;  %v4438_v47 = vld [vmem:[%s4892_s18 + $0xcc] ss:$16 sps:$4 sm:$0xff]  }
  0x65   : > { %v4440_v48 = vld [vmem:[%s4892_s18 + $0xc0] ss:$16 sps:$4 sm:$0xff]   ;;  %v4441_v49 = vld [vmem:[%s4892_s18 + $0xc8] ss:$16 sps:$4 sm:$0xff]   ;;  %v4442_v50 = vld [vmem:[%s4892_s18 + $0xe4] ss:$16 sps:$4 sm:$0xff]  }
  0x66   : > { %v4444_v51 = vld [vmem:[%s4892_s18 + $0xec] ss:$16 sps:$4 sm:$0xff]   ;;  %v4446_v52 = vld [vmem:[%s4892_s18 + $0xe0] ss:$16 sps:$4 sm:$0xff]   ;;  %v4447_v53 = vld [vmem:[%s4892_s18 + $0xe8] ss:$16 sps:$4 sm:$0xff]  }
  0x67   : > { %882 = vmatpush1.bf16.msra.mxu0 %v4416_v32  ;;  %1015 = vmatpush1.bf16.msra.mxu1 %v4417_v33  ;;  %v4448_v54 = vld [vmem:[%s4899_s24] sm:$0xff]   ;;  %v4449_v55 = vld [vmem:[%s4899_s24 + $0x8] sm:$0xff]   ;;  %v4450_v56 = vld [vmem:[%s4899_s24 + $0x10] sm:$0xff]  }
  0x68   : > { %883 = vmatprep.subr.bf16.mxu0 %v4418_v34  ;;  %1016 = vmatprep.subr.bf16.mxu1 %v4420_v35  ;;  %v4451_v57 = vld [vmem:[%s4899_s24 + $0x18] sm:$0xff]   ;;  %v4452_v58 = vld [vmem:[%s4899_s24 + $0x20] sm:$0xff]   ;;  %v4453_v59 = vld [vmem:[%s4899_s24 + $0x28] sm:$0xff]  }
  0x69   : > { %v4454_v60 = vld [vmem:[%s4899_s24 + $0x30] sm:$0xff]   ;;  %v4455_v61 = vld [vmem:[%s4899_s24 + $0x38] sm:$0xff]   ;;  %v4456_v62 = vld [vmem:[%s4899_s24 + $0x40] sm:$0xff]  }
  0x6a   : > { %v4457_v63 = vld [vmem:[%s4899_s24 + $0x48] sm:$0xff]   ;;  %v525_v0 = vld [vmem:[#allocation2] sm:$0xff]  ;;  %v527_v1 = vld [vmem:[#allocation2 + $0x10] sm:$0xff] }
  0x6b   : > { %884 = vmatpush1.bf16.msra.mxu0 %v4422_v36  ;;  %1017 = vmatpush1.bf16.msra.mxu1 %v4423_v37  ;;  %v526_v2 = vld [vmem:[#allocation2 + $0x8] sm:$0xff]  ;;  %v528_v3 = vld [vmem:[#allocation2 + $0x18] sm:$0xff]  ;;  %v529_v6 = vld [vmem:[#allocation2 + $0x20] sm:$0xff] }
  0x6c   : > { %885 = vmatprep.subr.bf16.mxu0 %v4424_v38  ;;  %1018 = vmatprep.subr.bf16.mxu1 %v4426_v39  ;;  %v531_v7 = vld [vmem:[#allocation2 + $0x30] sm:$0xff]  ;;  %v530_v12 = vld [vmem:[#allocation2 + $0x28] sm:$0xff]  ;;  %v532_v13 = vld [vmem:[#allocation2 + $0x38] sm:$0xff] }
  0x6d   : > { %v533_v24 = vld [vmem:[#allocation2 + $0x40] sm:$0xff]  ;;  %v535_v25 = vld [vmem:[#allocation2 + $0x50] sm:$0xff]  ;;  %v534_v26 = vld [vmem:[#allocation2 + $0x48] sm:$0xff] }
  0x6e   : > { %v536_v27 = vld [vmem:[#allocation2 + $0x58] sm:$0xff]  ;;  %v537_v30 = vld [vmem:[#allocation2 + $0x60] sm:$0xff]  ;;  %v539_v31 = vld [vmem:[#allocation2 + $0x70] sm:$0xff] }
  0x6f   : > { %886 = vmatpush1.bf16.msra.mxu0 %v4428_v40  ;;  %1019 = vmatpush1.bf16.msra.mxu1 %v4429_v41  ;;  %v538_v36 = vld [vmem:[#allocation2 + $0x68] sm:$0xff]  ;;  %v540_v37 = vld [vmem:[#allocation2 + $0x78] sm:$0xff] }
  0x70   : > { %887 = vmatprep.subr.bf16.mxu0 %v4430_v42  ;;  %1020 = vmatprep.subr.bf16.mxu1 %v4432_v43 }
  0x73   : > { %888 = vmatpush1.bf16.msra.mxu0 %v4434_v44  ;;  %1021 = vmatpush1.bf16.msra.mxu1 %v4435_v45 }
  0x74   : > { %889 = vmatprep.subr.bf16.mxu0 %v4436_v46  ;;  %1022 = vmatprep.subr.bf16.mxu1 %v4438_v47 }
  0x77   : > { %890 = vmatpush1.bf16.msra.mxu0 %v4440_v48  ;;  %1023 = vmatpush1.bf16.msra.mxu1 %v4441_v49  ;;  %v541_v48 = vld [vmem:[#allocation2 + $0x80] sm:$0xff]  ;;  %v543_v49 = vld [vmem:[#allocation2 + $0x90] sm:$0xff] }
  0x78   : > { %891 = vmatprep.subr.bf16.mxu0 %v4442_v50  ;;  %1024 = vmatprep.subr.bf16.mxu1 %v4444_v51  ;;  %v542_v50 = vld [vmem:[#allocation2 + $0x88] sm:$0xff]  ;;  %v544_v51 = vld [vmem:[#allocation2 + $0x98] sm:$0xff] }
  0x7b   : > { %892 = vmatpush1.bf16.msra.mxu0 %v4446_v52  ;;  %1025 = vmatpush1.bf16.msra.mxu1 %v4447_v53 }
  0x7e   : > { %910 = vmatmul.mubr.bf16.vlgmr.msra.gmra.mrb[0].mxu0 %v4448_v54  ;;  %1043 = vmatmul.mubr.bf16.vlgmr.msra.gmra.mrb[0].mxu1 %v4448_v54  ;;  %v545_v54 = vld [vmem:[#allocation2 + $0xa0] sm:$0xff] }
  0x7f   : > { %919 = vmatprep.mubr.bf16.mxu0 %v4739_v23  ;;  %1052 = vmatprep.mubr.bf16.mxu1 %v4739_v23 }
  0x86   : > { %920 = vmatmul.mubr.bf16.gmra.mrb[4].mxu0 %v4449_v55  ;;  %1053 = vmatmul.mubr.bf16.gmra.mrb[4].mxu1 %v4449_v55  ;;  %v547_v55 = vld [vmem:[#allocation2 + $0xb0] sm:$0xff] }
  0x87   : > { %929 = vmatprep.mubr.bf16.mxu0 %v4739_v23  ;;  %1062 = vmatprep.mubr.bf16.mxu1 %v4739_v23 }
  0x8e   : > { %930 = vmatmul.mubr.bf16.gmra.mrb[8].mxu0 %v4450_v56  ;;  %1063 = vmatmul.mubr.bf16.gmra.mrb[8].mxu1 %v4450_v56 }
  0x8f   : > { %939 = vmatprep.mubr.bf16.mxu0 %v4739_v23  ;;  %1072 = vmatprep.mubr.bf16.mxu1 %v4739_v23 }
  0x96   : > { %940 = vmatmul.mubr.bf16.gmra.mrb[12].mxu0 %v4451_v57  ;;  %1073 = vmatmul.mubr.bf16.gmra.mrb[12].mxu1 %v4451_v57 }
  0x97   : > { %949 = vmatprep.mubr.bf16.mxu0 %v4739_v23  ;;  %1082 = vmatprep.mubr.bf16.mxu1 %v4739_v23 }
  0x9e   : > { %950 = vmatmul.mubr.bf16.gmra.mrb[16].mxu0 %v4452_v58  ;;  %1083 = vmatmul.mubr.bf16.gmra.mrb[16].mxu1 %v4452_v58 }
  0x9f   : > { %959 = vmatprep.mubr.bf16.mxu0 %v4739_v23  ;;  %1092 = vmatprep.mubr.bf16.mxu1 %v4739_v23 }
  0xa6   : > { %960 = vmatmul.mubr.bf16.gmra.mrb[20].mxu0 %v4453_v59  ;;  %1093 = vmatmul.mubr.bf16.gmra.mrb[20].mxu1 %v4453_v59 }
  0xa7   : > { %969 = vmatprep.mubr.bf16.mxu0 %v4739_v23  ;;  %1102 = vmatprep.mubr.bf16.mxu1 %v4739_v23 }
  0xae   : > { %970 = vmatmul.mubr.bf16.gmra.mrb[24].mxu0 %v4454_v60  ;;  %1103 = vmatmul.mubr.bf16.gmra.mrb[24].mxu1 %v4454_v60  ;;  %v546_v60 = vld [vmem:[#allocation2 + $0xa8] sm:$0xff] }
  0xaf   : > { %979 = vmatprep.mubr.bf16.mxu0 %v4739_v23  ;;  %1112 = vmatprep.mubr.bf16.mxu1 %v4739_v23 }
  0xb6   : > { %980 = vmatmul.mubr.bf16.gmra.mrb[28].mxu0 %v4455_v61  ;;  %1113 = vmatmul.mubr.bf16.gmra.mrb[28].mxu1 %v4455_v61  ;;  %v548_v61 = vld [vmem:[#allocation2 + $0xb8] sm:$0xff] }
  0xb7   : > { %989 = vmatprep.mubr.bf16.mxu0 %v4739_v23  ;;  %1122 = vmatprep.mubr.bf16.mxu1 %v4739_v23 }
  0xbe   : > { %990 = vmatmul.mubr.bf16.gmra.mrb[32].mxu0 %v4456_v62  ;;  %1123 = vmatmul.mubr.bf16.gmra.mrb[32].mxu1 %v4456_v62 }
  0xbf   : > { %999 = vmatprep.mubr.bf16.mxu0 %v4739_v23  ;;  %1132 = vmatprep.mubr.bf16.mxu1 %v4739_v23 }
  0xc6   : > { %1000 = vmatmul.mubr.bf16.gmra.mrb[36].mxu0 %v4457_v63  ;;  %1133 = vmatmul.mubr.bf16.gmra.mrb[36].mxu1 %v4457_v63 }
 0x151   : > { %v911_v4 = vpop.f32.mrb[0].mxu0  ;;  %v1044_v5 = vpop.f32.mrb[0].mxu1 }
 0x152   : > { %v1143_v8 = vadd.f32 %v911_v4, %v525_v0  ;;  %v1145_v9 = vadd.f32 %v1044_v5, %v527_v1  ;;  %v913_v10 = vpop.f32.mrb[1].mxu0  ;;  %v1046_v11 = vpop.f32.mrb[1].mxu1 }
 0x153   : > { %v1144_v14 = vadd.f32 %v913_v10, %v526_v2  ;;  %v1146_v15 = vadd.f32 %v1046_v11, %v528_v3  ;;  %v915_v16 = vpop.f32.mrb[2].mxu0  ;;  %v1048_v17 = vpop.f32.mrb[2].mxu1  ;;  %v550_v10 = vld [vmem:[#allocation2 + $0xc8] sm:$0xff]  ;;  %v552_v11 = vld [vmem:[#allocation2 + $0xd8] sm:$0xff] }
 0x154   : > { %1223 = vst [vmem:[#allocation2] sm:$0xff] %v1143_v8  ;;  %1225 = vst [vmem:[#allocation2 + $0x10] sm:$0xff] %v1145_v9  ;;  %v1147_v18 = vadd.f32 %v915_v16, %v529_v6  ;;  %v1149_v19 = vadd.f32 %v1048_v17, %v531_v7  ;;  %v917_v20 = vpop.f32.mrb[3].mxu0  ;;  %v1050_v21 = vpop.f32.mrb[3].mxu1  ;;  %v549_v8 = vld [vmem:[#allocation2 + $0xc0] sm:$0xff]  ;;  %v551_v9 = vld [vmem:[#allocation2 + $0xd0] sm:$0xff] }
 0x155   : > { %1224 = vst [vmem:[#allocation2 + $0x8] sm:$0xff] %v1144_v14  ;;  %1226 = vst [vmem:[#allocation2 + $0x18] sm:$0xff] %v1146_v15  ;;  %v1148_v22 = vadd.f32 %v917_v20, %v530_v12  ;;  %v1150_v23 = vadd.f32 %v1050_v21, %v532_v13  ;;  %v553_v14 = vld [vmem:[#allocation2 + $0xe0] sm:$0xff]  ;;  %v555_v15 = vld [vmem:[#allocation2 + $0xf0] sm:$0xff] }
 0x156   : > { %1227 = vst [vmem:[#allocation2 + $0x20] sm:$0xff] %v1147_v18  ;;  %1229 = vst [vmem:[#allocation2 + $0x30] sm:$0xff] %v1149_v19  ;;  %v554_v20 = vld [vmem:[#allocation2 + $0xe8] sm:$0xff]  ;;  %v556_v21 = vld [vmem:[#allocation2 + $0xf8] sm:$0xff] }
 0x157   : > { %1228 = vst [vmem:[#allocation2 + $0x28] sm:$0xff] %v1148_v22  ;;  %1230 = vst [vmem:[#allocation2 + $0x38] sm:$0xff] %v1150_v23 }
 0x159   : > { %v921_v28 = vpop.f32.mrb[4].mxu0  ;;  %v1054_v29 = vpop.f32.mrb[4].mxu1 }
 0x15a   : > { %v1151_v32 = vadd.f32 %v921_v28, %v533_v24  ;;  %v1153_v33 = vadd.f32 %v1054_v29, %v535_v25  ;;  %v923_v34 = vpop.f32.mrb[5].mxu0  ;;  %v1056_v35 = vpop.f32.mrb[5].mxu1 }
 0x15b   : > { %v1152_v38 = vadd.f32 %v923_v34, %v534_v26  ;;  %v1154_v39 = vadd.f32 %v1056_v35, %v536_v27  ;;  %v925_v40 = vpop.f32.mrb[6].mxu0  ;;  %v1058_v41 = vpop.f32.mrb[6].mxu1  ;;  %v558_v34 = vld [vmem:[#allocation2 + $0x108] sm:$0xff]  ;;  %v560_v35 = vld [vmem:[#allocation2 + $0x118] sm:$0xff] }
 0x15c   : > { %1231 = vst [vmem:[#allocation2 + $0x40] sm:$0xff] %v1151_v32  ;;  %1233 = vst [vmem:[#allocation2 + $0x50] sm:$0xff] %v1153_v33  ;;  %v1155_v42 = vadd.f32 %v925_v40, %v537_v30  ;;  %v1157_v43 = vadd.f32 %v1058_v41, %v539_v31  ;;  %v927_v44 = vpop.f32.mrb[7].mxu0  ;;  %v1060_v45 = vpop.f32.mrb[7].mxu1  ;;  %v557_v32 = vld [vmem:[#allocation2 + $0x100] sm:$0xff]  ;;  %v559_v33 = vld [vmem:[#allocation2 + $0x110] sm:$0xff] }
 0x15d   : > { %1232 = vst [vmem:[#allocation2 + $0x48] sm:$0xff] %v1152_v38  ;;  %1234 = vst [vmem:[#allocation2 + $0x58] sm:$0xff] %v1154_v39  ;;  %v1156_v46 = vadd.f32 %v927_v44, %v538_v36  ;;  %v1158_v47 = vadd.f32 %v1060_v45, %v540_v37  ;;  %v561_v38 = vld [vmem:[#allocation2 + $0x120] sm:$0xff]  ;;  %v563_v39 = vld [vmem:[#allocation2 + $0x130] sm:$0xff] }
 0x15e   : > { %1235 = vst [vmem:[#allocation2 + $0x60] sm:$0xff] %v1155_v42  ;;  %1237 = vst [vmem:[#allocation2 + $0x70] sm:$0xff] %v1157_v43  ;;  %v562_v44 = vld [vmem:[#allocation2 + $0x128] sm:$0xff]  ;;  %v564_v45 = vld [vmem:[#allocation2 + $0x138] sm:$0xff] }
 0x15f   : > { %1236 = vst [vmem:[#allocation2 + $0x68] sm:$0xff] %v1156_v46  ;;  %1238 = vst [vmem:[#allocation2 + $0x78] sm:$0xff] %v1158_v47 }
 0x161   : > { %v931_v52 = vpop.f32.mrb[8].mxu0  ;;  %v1064_v53 = vpop.f32.mrb[8].mxu1 }
 0x162   : > { %v1159_v56 = vadd.f32 %v931_v52, %v541_v48  ;;  %v1161_v57 = vadd.f32 %v1064_v53, %v543_v49  ;;  %v933_v58 = vpop.f32.mrb[9].mxu0  ;;  %v1066_v59 = vpop.f32.mrb[9].mxu1 }
 0x163   : > { %v1160_v62 = vadd.f32 %v933_v58, %v542_v50  ;;  %v1162_v63 = vadd.f32 %v1066_v59, %v544_v51  ;;  %v935_v0 = vpop.f32.mrb[10].mxu0  ;;  %v1068_v1 = vpop.f32.mrb[10].mxu1  ;;  %v566_v58 = vld [vmem:[#allocation2 + $0x148] sm:$0xff]  ;;  %v568_v59 = vld [vmem:[#allocation2 + $0x158] sm:$0xff] }
 0x164   : > { %1239 = vst [vmem:[#allocation2 + $0x80] sm:$0xff] %v1159_v56  ;;  %1241 = vst [vmem:[#allocation2 + $0x90] sm:$0xff] %v1161_v57  ;;  %v1163_v2 = vadd.f32 %v935_v0, %v545_v54  ;;  %v1165_v3 = vadd.f32 %v1068_v1, %v547_v55  ;;  %v937_v4 = vpop.f32.mrb[11].mxu0  ;;  %v1070_v5 = vpop.f32.mrb[11].mxu1  ;;  %v565_v56 = vld [vmem:[#allocation2 + $0x140] sm:$0xff]  ;;  %v567_v57 = vld [vmem:[#allocation2 + $0x150] sm:$0xff] }
 0x165   : > { %1240 = vst [vmem:[#allocation2 + $0x88] sm:$0xff] %v1160_v62  ;;  %1242 = vst [vmem:[#allocation2 + $0x98] sm:$0xff] %v1162_v63  ;;  %v1164_v6 = vadd.f32 %v937_v4, %v546_v60  ;;  %v1166_v7 = vadd.f32 %v1070_v5, %v548_v61  ;;  %v569_v62 = vld [vmem:[#allocation2 + $0x160] sm:$0xff]  ;;  %v571_v63 = vld [vmem:[#allocation2 + $0x170] sm:$0xff] }
 0x166   : > { %1243 = vst [vmem:[#allocation2 + $0xa0] sm:$0xff] %v1163_v2  ;;  %1245 = vst [vmem:[#allocation2 + $0xb0] sm:$0xff] %v1165_v3  ;;  %v570_v4 = vld [vmem:[#allocation2 + $0x168] sm:$0xff]  ;;  %v572_v5 = vld [vmem:[#allocation2 + $0x178] sm:$0xff] }
 0x167   : > { %1244 = vst [vmem:[#allocation2 + $0xa8] sm:$0xff] %v1164_v6  ;;  %1246 = vst [vmem:[#allocation2 + $0xb8] sm:$0xff] %v1166_v7 }
 0x169   : > { %v941_v12 = vpop.f32.mrb[12].mxu0  ;;  %v1074_v13 = vpop.f32.mrb[12].mxu1 }
 0x16a   : > { %v1167_v16 = vadd.f32 %v941_v12, %v549_v8  ;;  %v1169_v17 = vadd.f32 %v1074_v13, %v551_v9  ;;  %v943_v18 = vpop.f32.mrb[13].mxu0  ;;  %v1076_v19 = vpop.f32.mrb[13].mxu1 }
 0x16b   : > { %v1168_v22 = vadd.f32 %v943_v18, %v550_v10  ;;  %v1170_v23 = vadd.f32 %v1076_v19, %v552_v11  ;;  %v945_v24 = vpop.f32.mrb[14].mxu0  ;;  %v1078_v25 = vpop.f32.mrb[14].mxu1  ;;  %v574_v18 = vld [vmem:[#allocation2 + $0x188] sm:$0xff]  ;;  %v576_v19 = vld [vmem:[#allocation2 + $0x198] sm:$0xff] }
 0x16c   : > { %1247 = vst [vmem:[#allocation2 + $0xc0] sm:$0xff] %v1167_v16  ;;  %1249 = vst [vmem:[#allocation2 + $0xd0] sm:$0xff] %v1169_v17  ;;  %v1171_v26 = vadd.f32 %v945_v24, %v553_v14  ;;  %v1173_v27 = vadd.f32 %v1078_v25, %v555_v15  ;;  %v947_v28 = vpop.f32.mrb[15].mxu0  ;;  %v1080_v29 = vpop.f32.mrb[15].mxu1  ;;  %v573_v16 = vld [vmem:[#allocation2 + $0x180] sm:$0xff]  ;;  %v575_v17 = vld [vmem:[#allocation2 + $0x190] sm:$0xff] }
 0x16d   : > { %1248 = vst [vmem:[#allocation2 + $0xc8] sm:$0xff] %v1168_v22  ;;  %1250 = vst [vmem:[#allocation2 + $0xd8] sm:$0xff] %v1170_v23  ;;  %v1172_v30 = vadd.f32 %v947_v28, %v554_v20  ;;  %v1174_v31 = vadd.f32 %v1080_v29, %v556_v21  ;;  %v577_v22 = vld [vmem:[#allocation2 + $0x1a0] sm:$0xff]  ;;  %v579_v23 = vld [vmem:[#allocation2 + $0x1b0] sm:$0xff] }
 0x16e   : > { %1251 = vst [vmem:[#allocation2 + $0xe0] sm:$0xff] %v1171_v26  ;;  %1253 = vst [vmem:[#allocation2 + $0xf0] sm:$0xff] %v1173_v27  ;;  %v578_v28 = vld [vmem:[#allocation2 + $0x1a8] sm:$0xff]  ;;  %v580_v29 = vld [vmem:[#allocation2 + $0x1b8] sm:$0xff] }
 0x16f   : > { %1252 = vst [vmem:[#allocation2 + $0xe8] sm:$0xff] %v1172_v30  ;;  %1254 = vst [vmem:[#allocation2 + $0xf8] sm:$0xff] %v1174_v31 }
 0x171   : > { %v951_v36 = vpop.f32.mrb[16].mxu0  ;;  %v1084_v37 = vpop.f32.mrb[16].mxu1 }
 0x172   : > { %v1175_v40 = vadd.f32 %v951_v36, %v557_v32  ;;  %v1177_v41 = vadd.f32 %v1084_v37, %v559_v33  ;;  %v953_v42 = vpop.f32.mrb[17].mxu0  ;;  %v1086_v43 = vpop.f32.mrb[17].mxu1 }
 0x173   : > { %v1176_v46 = vadd.f32 %v953_v42, %v558_v34  ;;  %v1178_v47 = vadd.f32 %v1086_v43, %v560_v35  ;;  %v955_v48 = vpop.f32.mrb[18].mxu0  ;;  %v1088_v49 = vpop.f32.mrb[18].mxu1  ;;  %v582_v42 = vld [vmem:[#allocation2 + $0x1c8] sm:$0xff]  ;;  %v584_v43 = vld [vmem:[#allocation2 + $0x1d8] sm:$0xff] }
 0x174   : > { %1255 = vst [vmem:[#allocation2 + $0x100] sm:$0xff] %v1175_v40  ;;  %1257 = vst [vmem:[#allocation2 + $0x110] sm:$0xff] %v1177_v41  ;;  %v1179_v50 = vadd.f32 %v955_v48, %v561_v38  ;;  %v1181_v51 = vadd.f32 %v1088_v49, %v563_v39  ;;  %v957_v52 = vpop.f32.mrb[19].mxu0  ;;  %v1090_v53 = vpop.f32.mrb[19].mxu1  ;;  %v581_v40 = vld [vmem:[#allocation2 + $0x1c0] sm:$0xff]  ;;  %v583_v41 = vld [vmem:[#allocation2 + $0x1d0] sm:$0xff] }
 0x175   : > { %1256 = vst [vmem:[#allocation2 + $0x108] sm:$0xff] %v1176_v46  ;;  %1258 = vst [vmem:[#allocation2 + $0x118] sm:$0xff] %v1178_v47  ;;  %v1180_v54 = vadd.f32 %v957_v52, %v562_v44  ;;  %v1182_v55 = vadd.f32 %v1090_v53, %v564_v45  ;;  %v585_v46 = vld [vmem:[#allocation2 + $0x1e0] sm:$0xff]  ;;  %v587_v47 = vld [vmem:[#allocation2 + $0x1f0] sm:$0xff] }
 0x176   : > { %1259 = vst [vmem:[#allocation2 + $0x120] sm:$0xff] %v1179_v50  ;;  %1261 = vst [vmem:[#allocation2 + $0x130] sm:$0xff] %v1181_v51  ;;  %v586_v52 = vld [vmem:[#allocation2 + $0x1e8] sm:$0xff]  ;;  %v588_v53 = vld [vmem:[#allocation2 + $0x1f8] sm:$0xff] }
 0x177   : > { %1260 = vst [vmem:[#allocation2 + $0x128] sm:$0xff] %v1180_v54  ;;  %1262 = vst [vmem:[#allocation2 + $0x138] sm:$0xff] %v1182_v55 }
 0x179   : > { %v961_v60 = vpop.f32.mrb[20].mxu0  ;;  %v1094_v61 = vpop.f32.mrb[20].mxu1 }
 0x17a   : > { %v1183_v0 = vadd.f32 %v961_v60, %v565_v56  ;;  %v1185_v1 = vadd.f32 %v1094_v61, %v567_v57  ;;  %v963_v2 = vpop.f32.mrb[21].mxu0  ;;  %v1096_v3 = vpop.f32.mrb[21].mxu1 }
 0x17b   : > { %v1184_v6 = vadd.f32 %v963_v2, %v566_v58  ;;  %v1186_v7 = vadd.f32 %v1096_v3, %v568_v59  ;;  %v965_v8 = vpop.f32.mrb[22].mxu0  ;;  %v1098_v9 = vpop.f32.mrb[22].mxu1  ;;  %v590_v2 = vld [vmem:[#allocation2 + $0x208] sm:$0xff]  ;;  %v592_v3 = vld [vmem:[#allocation2 + $0x218] sm:$0xff] }
 0x17c   : > { %1263 = vst [vmem:[#allocation2 + $0x140] sm:$0xff] %v1183_v0  ;;  %1265 = vst [vmem:[#allocation2 + $0x150] sm:$0xff] %v1185_v1  ;;  %v1187_v10 = vadd.f32 %v965_v8, %v569_v62  ;;  %v1189_v11 = vadd.f32 %v1098_v9, %v571_v63  ;;  %v967_v12 = vpop.f32.mrb[23].mxu0  ;;  %v1100_v13 = vpop.f32.mrb[23].mxu1  ;;  %v589_v0 = vld [vmem:[#allocation2 + $0x200] sm:$0xff]  ;;  %v591_v1 = vld [vmem:[#allocation2 + $0x210] sm:$0xff] }
 0x17d   : > { %1264 = vst [vmem:[#allocation2 + $0x148] sm:$0xff] %v1184_v6  ;;  %1266 = vst [vmem:[#allocation2 + $0x158] sm:$0xff] %v1186_v7  ;;  %v1188_v14 = vadd.f32 %v967_v12, %v570_v4  ;;  %v1190_v15 = vadd.f32 %v1100_v13, %v572_v5  ;;  %v593_v6 = vld [vmem:[#allocation2 + $0x220] sm:$0xff]  ;;  %v595_v7 = vld [vmem:[#allocation2 + $0x230] sm:$0xff] }
 0x17e   : > { %1267 = vst [vmem:[#allocation2 + $0x160] sm:$0xff] %v1187_v10  ;;  %1269 = vst [vmem:[#allocation2 + $0x170] sm:$0xff] %v1189_v11  ;;  %v594_v12 = vld [vmem:[#allocation2 + $0x228] sm:$0xff]  ;;  %v596_v13 = vld [vmem:[#allocation2 + $0x238] sm:$0xff] }
 0x17f   : > { %1268 = vst [vmem:[#allocation2 + $0x168] sm:$0xff] %v1188_v14  ;;  %1270 = vst [vmem:[#allocation2 + $0x178] sm:$0xff] %v1190_v15 }
 0x181   : > { %v971_v20 = vpop.f32.mrb[24].mxu0  ;;  %v1104_v21 = vpop.f32.mrb[24].mxu1 }
 0x182   : > { %v1191_v24 = vadd.f32 %v971_v20, %v573_v16  ;;  %v1193_v25 = vadd.f32 %v1104_v21, %v575_v17  ;;  %v973_v26 = vpop.f32.mrb[25].mxu0  ;;  %v1106_v27 = vpop.f32.mrb[25].mxu1 }
 0x183   : > { %v1192_v30 = vadd.f32 %v973_v26, %v574_v18  ;;  %v1194_v31 = vadd.f32 %v1106_v27, %v576_v19  ;;  %v975_v32 = vpop.f32.mrb[26].mxu0  ;;  %v1108_v33 = vpop.f32.mrb[26].mxu1  ;;  %v598_v26 = vld [vmem:[#allocation2 + $0x248] sm:$0xff]  ;;  %v600_v27 = vld [vmem:[#allocation2 + $0x258] sm:$0xff] }
 0x184   : > { %1271 = vst [vmem:[#allocation2 + $0x180] sm:$0xff] %v1191_v24  ;;  %1273 = vst [vmem:[#allocation2 + $0x190] sm:$0xff] %v1193_v25  ;;  %v1195_v34 = vadd.f32 %v975_v32, %v577_v22  ;;  %v1197_v35 = vadd.f32 %v1108_v33, %v579_v23  ;;  %v977_v36 = vpop.f32.mrb[27].mxu0  ;;  %v1110_v37 = vpop.f32.mrb[27].mxu1  ;;  %v597_v24 = vld [vmem:[#allocation2 + $0x240] sm:$0xff]  ;;  %v599_v25 = vld [vmem:[#allocation2 + $0x250] sm:$0xff] }
 0x185   : > { %1272 = vst [vmem:[#allocation2 + $0x188] sm:$0xff] %v1192_v30  ;;  %1274 = vst [vmem:[#allocation2 + $0x198] sm:$0xff] %v1194_v31  ;;  %v1196_v38 = vadd.f32 %v977_v36, %v578_v28  ;;  %v1198_v39 = vadd.f32 %v1110_v37, %v580_v29  ;;  %v601_v30 = vld [vmem:[#allocation2 + $0x260] sm:$0xff]  ;;  %v603_v31 = vld [vmem:[#allocation2 + $0x270] sm:$0xff] }
 0x186   : > { %1275 = vst [vmem:[#allocation2 + $0x1a0] sm:$0xff] %v1195_v34  ;;  %1277 = vst [vmem:[#allocation2 + $0x1b0] sm:$0xff] %v1197_v35  ;;  %v602_v36 = vld [vmem:[#allocation2 + $0x268] sm:$0xff]  ;;  %v604_v37 = vld [vmem:[#allocation2 + $0x278] sm:$0xff] }
 0x187   : > { %1276 = vst [vmem:[#allocation2 + $0x1a8] sm:$0xff] %v1196_v38  ;;  %1278 = vst [vmem:[#allocation2 + $0x1b8] sm:$0xff] %v1198_v39 }
 0x189   : > { %v981_v44 = vpop.f32.mrb[28].mxu0  ;;  %v1114_v45 = vpop.f32.mrb[28].mxu1 }
 0x18a   : > { %v1199_v48 = vadd.f32 %v981_v44, %v581_v40  ;;  %v1201_v49 = vadd.f32 %v1114_v45, %v583_v41  ;;  %v983_v50 = vpop.f32.mrb[29].mxu0  ;;  %v1116_v51 = vpop.f32.mrb[29].mxu1 }
 0x18b   : > { %v1200_v54 = vadd.f32 %v983_v50, %v582_v42  ;;  %v1202_v55 = vadd.f32 %v1116_v51, %v584_v43  ;;  %v985_v56 = vpop.f32.mrb[30].mxu0  ;;  %v1118_v57 = vpop.f32.mrb[30].mxu1  ;;  %v4462_v50 = vld [vmem:[%s5804_s3] ss:$16 sps:$4 sm:$0xff] (!%p3861_p13)   ;;  %v4463_v51 = vld [vmem:[%s5804_s3 + $0x8] ss:$16 sps:$4 sm:$0xff] (!%p3861_p13)  }
 0x18c   : > { %1279 = vst [vmem:[#allocation2 + $0x1c0] sm:$0xff] %v1199_v48  ;;  %1281 = vst [vmem:[#allocation2 + $0x1d0] sm:$0xff] %v1201_v49  ;;  %v1203_v58 = vadd.f32 %v985_v56, %v585_v46  ;;  %v1205_v59 = vadd.f32 %v1118_v57, %v587_v47  ;;  %v987_v60 = vpop.f32.mrb[31].mxu0  ;;  %v1120_v61 = vpop.f32.mrb[31].mxu1  ;;  %v4458_v48 = vld [vmem:[%s5804_s3 + $0x4] ss:$16 sps:$4 sm:$0xff] (!%p3861_p13)  }
 0x18d   : > { %1280 = vst [vmem:[#allocation2 + $0x1c8] sm:$0xff] %v1200_v54  ;;  %1282 = vst [vmem:[#allocation2 + $0x1d8] sm:$0xff] %v1202_v55  ;;  %v1204_v62 = vadd.f32 %v987_v60, %v586_v52  ;;  %v1206_v63 = vadd.f32 %v1120_v61, %v588_v53  ;;  %v4460_v49 = vld [vmem:[%s5804_s3 + $0xc] ss:$16 sps:$4 sm:$0xff] (!%p3861_p13)   ;;  %2479 = vmatprep.subr.bf16.mxu0 (!%p3861_p13), %v4458_v48  ;;  %v4464_v52 = vld [vmem:[%s5804_s3 + $0x24] ss:$16 sps:$4 sm:$0xff] (!%p3861_p13)  }
 0x18e   : > { %1283 = vst [vmem:[#allocation2 + $0x1e0] sm:$0xff] %v1203_v58  ;;  %1285 = vst [vmem:[#allocation2 + $0x1f0] sm:$0xff] %v1205_v59  ;;  %2745 = vmatprep.subr.bf16.mxu1 (!%p3861_p13), %v4460_v49  ;;  %2480 = vmatpush1.bf16.msra.mxu0 (!%p3861_p13), %v4462_v50  ;;  %v4466_v53 = vld [vmem:[%s5804_s3 + $0x2c] ss:$16 sps:$4 sm:$0xff] (!%p3861_p13)   ;;  %v4468_v54 = vld [vmem:[%s5804_s3 + $0x20] ss:$16 sps:$4 sm:$0xff] (!%p3861_p13)  }
 0x18f   : > { %1284 = vst [vmem:[#allocation2 + $0x1e8] sm:$0xff] %v1204_v62  ;;  %1286 = vst [vmem:[#allocation2 + $0x1f8] sm:$0xff] %v1206_v63  ;;  %2746 = vmatpush1.bf16.msra.mxu1 (!%p3861_p13), %v4463_v51  ;;  %2481 = vmatprep.subr.bf16.mxu0 (!%p3861_p13), %v4464_v52  ;;  %v4469_v55 = vld [vmem:[%s5804_s3 + $0x28] ss:$16 sps:$4 sm:$0xff] (!%p3861_p13)   ;;  %v4470_v56 = vld [vmem:[%s5804_s3 + $0x44] ss:$16 sps:$4 sm:$0xff] (!%p3861_p13)  }
 0x190   : > { %2747 = vmatprep.subr.bf16.mxu1 (!%p3861_p13), %v4466_v53  ;;  %v4472_v57 = vld [vmem:[%s5804_s3 + $0x4c] ss:$16 sps:$4 sm:$0xff] (!%p3861_p13)   ;;  %v4474_v58 = vld [vmem:[%s5804_s3 + $0x40] ss:$16 sps:$4 sm:$0xff] (!%p3861_p13)   ;;  %v4475_v59 = vld [vmem:[%s5804_s3 + $0x48] ss:$16 sps:$4 sm:$0xff] (!%p3861_p13)  }
 0x191   : > { %v991_v4 = vpop.f32.mrb[32].mxu0  ;;  %v1124_v5 = vpop.f32.mrb[32].mxu1  ;;  %v4476_v60 = vld [vmem:[%s5804_s3 + $0x64] ss:$16 sps:$4 sm:$0xff] (!%p3861_p13)   ;;  %v4478_v61 = vld [vmem:[%s5804_s3 + $0x6c] ss:$16 sps:$4 sm:$0xff] (!%p3861_p13)  }
 0x192   : > { %v1207_v8 = vadd.f32 %v991_v4, %v589_v0  ;;  %v1209_v9 = vadd.f32 %v1124_v5, %v591_v1  ;;  %v993_v10 = vpop.f32.mrb[33].mxu0  ;;  %v1126_v11 = vpop.f32.mrb[33].mxu1  ;;  %2482 = vmatpush1.bf16.msra.mxu0 (!%p3861_p13), %v4468_v54  ;;  %v4480_v62 = vld [vmem:[%s5804_s3 + $0x60] ss:$16 sps:$4 sm:$0xff] (!%p3861_p13)   ;;  %v4481_v63 = vld [vmem:[%s5804_s3 + $0x68] ss:$16 sps:$4 sm:$0xff] (!%p3861_p13)  }
 0x193   : > { %v1208_v14 = vadd.f32 %v993_v10, %v590_v2  ;;  %v1210_v15 = vadd.f32 %v1126_v11, %v592_v3  ;;  %v995_v16 = vpop.f32.mrb[34].mxu0  ;;  %v1128_v17 = vpop.f32.mrb[34].mxu1  ;;  %2748 = vmatpush1.bf16.msra.mxu1 (!%p3861_p13), %v4469_v55  ;;  %2483 = vmatprep.subr.bf16.mxu0 (!%p3861_p13), %v4470_v56  ;;  %v4482_v0 = vld [vmem:[%s5804_s3 + $0x84] ss:$16 sps:$4 sm:$0xff] (!%p3861_p13)   ;;  %v4484_v1 = vld [vmem:[%s5804_s3 + $0x8c] ss:$16 sps:$4 sm:$0xff] (!%p3861_p13)  }
 0x194   : > { %1287 = vst [vmem:[#allocation2 + $0x200] sm:$0xff] %v1207_v8  ;;  %1289 = vst [vmem:[#allocation2 + $0x210] sm:$0xff] %v1209_v9  ;;  %v1211_v18 = vadd.f32 %v995_v16, %v593_v6  ;;  %v1213_v19 = vadd.f32 %v1128_v17, %v595_v7  ;;  %v997_v20 = vpop.f32.mrb[35].mxu0  ;;  %v1130_v21 = vpop.f32.mrb[35].mxu1  ;;  %2749 = vmatprep.subr.bf16.mxu1 (!%p3861_p13), %v4472_v57  ;;  %v4486_v2 = vld [vmem:[%s5804_s3 + $0x80] ss:$16 sps:$4 sm:$0xff] (!%p3861_p13)  }
 0x195   : > { %1288 = vst [vmem:[#allocation2 + $0x208] sm:$0xff] %v1208_v14  ;;  %1290 = vst [vmem:[#allocation2 + $0x218] sm:$0xff] %v1210_v15  ;;  %v1212_v22 = vadd.f32 %v997_v20, %v594_v12  ;;  %v1214_v23 = vadd.f32 %v1130_v21, %v596_v13  ;;  %v4487_v3 = vld [vmem:[%s5804_s3 + $0x88] ss:$16 sps:$4 sm:$0xff] (!%p3861_p13)   ;;  %v4488_v4 = vld [vmem:[%s5804_s3 + $0xa4] ss:$16 sps:$4 sm:$0xff] (!%p3861_p13)   ;;  %v1389_v21 = vlaneseq (!%p3861_p13) }
 0x196   : > { %1291 = vst [vmem:[#allocation2 + $0x220] sm:$0xff] %v1211_v18  ;;  %1293 = vst [vmem:[#allocation2 + $0x230] sm:$0xff] %v1213_v19  ;;  %2484 = vmatpush1.bf16.msra.mxu0 (!%p3861_p13), %v4474_v58  ;;  %v4490_v5 = vld [vmem:[%s5804_s3 + $0xac] ss:$16 sps:$4 sm:$0xff] (!%p3861_p13)   ;;  %v4492_v6 = vld [vmem:[%s5804_s3 + $0xa0] ss:$16 sps:$4 sm:$0xff] (!%p3861_p13)  }
 0x197   : > { %1292 = vst [vmem:[#allocation2 + $0x228] sm:$0xff] %v1212_v22  ;;  %1294 = vst [vmem:[#allocation2 + $0x238] sm:$0xff] %v1214_v23  ;;  %2750 = vmatpush1.bf16.msra.mxu1 (!%p3861_p13), %v4475_v59  ;;  %2485 = vmatprep.subr.bf16.mxu0 (!%p3861_p13), %v4476_v60  ;;  %v4493_v7 = vld [vmem:[%s5804_s3 + $0xa8] ss:$16 sps:$4 sm:$0xff] (!%p3861_p13)   ;;  %v4494_v8 = vld [vmem:[%s5804_s3 + $0xc4] ss:$16 sps:$4 sm:$0xff] (!%p3861_p13)  }
 0x198   : > { %2751 = vmatprep.subr.bf16.mxu1 (!%p3861_p13), %v4478_v61  ;;  %v4496_v9 = vld [vmem:[%s5804_s3 + $0xcc] ss:$16 sps:$4 sm:$0xff] (!%p3861_p13)   ;;  %v4498_v10 = vld [vmem:[%s5804_s3 + $0xc0] ss:$16 sps:$4 sm:$0xff] (!%p3861_p13)   ;;  %v4499_v11 = vld [vmem:[%s5804_s3 + $0xc8] ss:$16 sps:$4 sm:$0xff] (!%p3861_p13)  }
 0x199   : > { %v1001_v28 = vpop.f32.mrb[36].mxu0  ;;  %v1134_v29 = vpop.f32.mrb[36].mxu1  ;;  %1306 = sbr.rel (%p3861_p13) target bundleno = 1057 (0x421), region = 97  ;;  %v4500_v12 = vld [vmem:[%s5804_s3 + $0xe4] ss:$16 sps:$4 sm:$0xff] (!%p3861_p13)   ;;  %v1316_v58 = vld [vmem:[#allocation2 + $0x48] sm:$0xff] (!%p3861_p13) }
 0x19a   : > { %v1215_v32 = vadd.f32 %v1001_v28, %v597_v24  ;;  %v1217_v33 = vadd.f32 %v1134_v29, %v599_v25  ;;  %v1003_v34 = vpop.f32.mrb[37].mxu0  ;;  %v1136_v35 = vpop.f32.mrb[37].mxu1  ;;  %2486 = vmatpush1.bf16.msra.mxu0 (!%p3861_p13), %v4480_v62  ;;  %v4502_v13 = vld [vmem:[%s5804_s3 + $0xec] ss:$16 sps:$4 sm:$0xff] (!%p3861_p13)   ;;  %v4504_v14 = vld [vmem:[%s5804_s3 + $0xe0] ss:$16 sps:$4 sm:$0xff] (!%p3861_p13)  }
 0x19b   : > { %v1216_v38 = vadd.f32 %v1003_v34, %v598_v26  ;;  %v1218_v39 = vadd.f32 %v1136_v35, %v600_v27  ;;  %v1005_v40 = vpop.f32.mrb[38].mxu0  ;;  %v1138_v41 = vpop.f32.mrb[38].mxu1  ;;  %2752 = vmatpush1.bf16.msra.mxu1 (!%p3861_p13), %v4481_v63  ;;  %2487 = vmatprep.subr.bf16.mxu0 (!%p3861_p13), %v4482_v0  ;;  %v4505_v15 = vld [vmem:[%s5804_s3 + $0xe8] ss:$16 sps:$4 sm:$0xff] (!%p3861_p13)   ;;  %v4506_v16 = vld [vmem:[%s5804_s3 + $0x104] ss:$16 sps:$4 sm:$0xff] (!%p3861_p13)  }
 0x19c   : > { %1295 = vst [vmem:[#allocation2 + $0x240] sm:$0xff] %v1215_v32  ;;  %1297 = vst [vmem:[#allocation2 + $0x250] sm:$0xff] %v1217_v33  ;;  %v1219_v42 = vadd.f32 %v1005_v40, %v601_v30  ;;  %v1221_v43 = vadd.f32 %v1138_v41, %v603_v31  ;;  %v1007_v44 = vpop.f32.mrb[39].mxu0  ;;  %v1140_v45 = vpop.f32.mrb[39].mxu1  ;;  %2753 = vmatprep.subr.bf16.mxu1 (!%p3861_p13), %v4484_v1  ;;  %v4508_v17 = vld [vmem:[%s5804_s3 + $0x10c] ss:$16 sps:$4 sm:$0xff] (!%p3861_p13)  }
 0x19d   : > { %1296 = vst [vmem:[#allocation2 + $0x248] sm:$0xff] %v1216_v38  ;;  %1298 = vst [vmem:[#allocation2 + $0x258] sm:$0xff] %v1218_v39  ;;  %v1220_v46 = vadd.f32 %v1007_v44, %v602_v36  ;;  %v1222_v47 = vadd.f32 %v1140_v45, %v604_v37  ;;  %v4510_v18 = vld [vmem:[%s5804_s3 + $0x100] ss:$16 sps:$4 sm:$0xff] (!%p3861_p13)   ;;  %v4511_v19 = vld [vmem:[%s5804_s3 + $0x108] ss:$16 sps:$4 sm:$0xff] (!%p3861_p13)  }
 0x19e   : > { %1299 = vst [vmem:[#allocation2 + $0x260] sm:$0xff] %v1219_v42  ;;  %1301 = vst [vmem:[#allocation2 + $0x270] sm:$0xff] %v1221_v43  ;;  %2488 = vmatpush1.bf16.msra.mxu0 (!%p3861_p13), %v4486_v2  ;;  %v4512_v20 = vld [vmem:[%s5804_s3 + $0x124] ss:$16 sps:$4 sm:$0xff] (!%p3861_p13)   ;;  %v4514_v22 = vld [vmem:[%s5804_s3 + $0x12c] ss:$16 sps:$4 sm:$0xff] (!%p3861_p13)  }
 0x19f   : > { %1300 = vst [vmem:[#allocation2 + $0x268] sm:$0xff] %v1220_v46  ;;  %1302 = vst [vmem:[#allocation2 + $0x278] sm:$0xff] %v1222_v47  ;;  %2754 = vmatpush1.bf16.msra.mxu1 (!%p3861_p13), %v4487_v3  ;;  %2489 = vmatprep.subr.bf16.mxu0 (!%p3861_p13), %v4488_v4  ;;  %v4516_v23 = vld [vmem:[%s5804_s3 + $0x120] ss:$16 sps:$4 sm:$0xff] (!%p3861_p13)   ;;  %v4517_v24 = vld [vmem:[%s5804_s3 + $0x128] ss:$16 sps:$4 sm:$0xff] (!%p3861_p13)  }
 0x1a0   : > { %2755 = vmatprep.subr.bf16.mxu1 %v4490_v5  ;;  %v4518_v25 = vld [vmem:[%s5804_s3 + $0x144] ss:$16 sps:$4 sm:$0xff]   ;;  %v5168_v26 = vshrl.u32 %v1389_v21, 7  ;;  %v4520_v27 = vld [vmem:[%s5804_s3 + $0x14c] ss:$16 sps:$4 sm:$0xff]  }
 0x1a1   : > { %v4522_v28 = vld [vmem:[%s5804_s3 + $0x140] ss:$16 sps:$4 sm:$0xff]   ;;  %v4523_v29 = vld [vmem:[%s5804_s3 + $0x148] ss:$16 sps:$4 sm:$0xff]   ;;  %v4524_v30 = vld [vmem:[%s5804_s3 + $0x164] ss:$16 sps:$4 sm:$0xff]  }
 0x1a2   : > { %2490 = vmatpush1.bf16.msra.mxu0 %v4492_v6  ;;  %v1395_v31 = vsub.s32 1, %v5168_v26  ;;  %v4526_v32 = vld [vmem:[%s5804_s3 + $0x16c] ss:$16 sps:$4 sm:$0xff]   ;;  %v4528_v33 = vld [vmem:[%s5804_s3 + $0x160] ss:$16 sps:$4 sm:$0xff]   ;;  %v1391_v43 = vsub.s32 0, %v5168_v26 }
 0x1a3   : > { %2756 = vmatpush1.bf16.msra.mxu1 %v4493_v7  ;;  %2491 = vmatprep.subr.bf16.mxu0 %v4494_v8  ;;  %v1308_v34 = vld [vmem:[#allocation2 + $0x8] sm:$0xff]  ;;  %v5192_v36 = vld [vmem:[%s5803_s2] sm:$0xf]  ;;  %v4530_v39 = vld [vmem:[%s5804_s3 + $0x184] ss:$16 sps:$4 sm:$0xff]  }
 0x1a4   : > { %2757 = vmatprep.subr.bf16.mxu1 %v4496_v9  ;;  %v1312_v35 = vld [vmem:[#allocation2 + $0x28] sm:$0xff]  ;;  %v5200_v38 = vrot.slane %v5192_v36, %v1395_v31  ;;  %v4534_v44 = vld [vmem:[%s5804_s3 + $0x180] ss:$16 sps:$4 sm:$0xff]   ;;  %v4536_v48 = vld [vmem:[%s5804_s3 + $0x1a4] ss:$16 sps:$4 sm:$0xff]   ;;  %v5232_v54 = vrot.slane %v5192_v36, %v1391_v43 }
 0x1a5   : > { %v4529_v37 = vld [vmem:[%s5804_s3 + $0x168] ss:$16 sps:$4 sm:$0xff]   ;;  %v4532_v40 = vld [vmem:[%s5804_s3 + $0x18c] ss:$16 sps:$4 sm:$0xff]   ;;  %v4540_v50 = vld [vmem:[%s5804_s3 + $0x1a0] ss:$16 sps:$4 sm:$0xff]  }
 0x1a6   : > { %2492 = vmatpush1.bf16.msra.mxu0 %v4498_v10  ;;  %v1410_v41 = vadd.f32 %v5200_v38, %v1308_v34  ;;  %v1414_v42 = vadd.f32 %v5200_v38, %v1312_v35  ;;  %v4535_v45 = vld [vmem:[%s5804_s3 + $0x188] ss:$16 sps:$4 sm:$0xff]   ;;  %v4538_v49 = vld [vmem:[%s5804_s3 + $0x1ac] ss:$16 sps:$4 sm:$0xff]   ;;  %v1307_v53 = vld [vmem:[#allocation2] sm:$0xff]  ;;  %v1418_v2 = vadd.f32 %v5200_v38, %v1316_v58 }
 0x1a7   : > { %2758 = vmatpush1.bf16.msra.mxu1 %v4499_v11  ;;  %2493 = vmatprep.subr.bf16.mxu0 %v4500_v12  ;;  %v4541_v52 = vld [vmem:[%s5804_s3 + $0x1a8] ss:$16 sps:$4 sm:$0xff]   ;;  %v1311_v55 = vld [vmem:[#allocation2 + $0x20] sm:$0xff]  ;;  %v4544_v57 = vld [vmem:[%s5804_s3 + $0x1cc] ss:$16 sps:$4 sm:$0xff]   ;;  %v1409_v60 = vadd.f32 %v5232_v54, %v1307_v53 }
 0x1a8   : > { %2759 = vmatprep.subr.bf16.mxu1 %v4502_v13  ;;  %v1490_v46 = vmax.f32 %v1410_v41, 0.0  ;;  %v1494_v47 = vmax.f32 %v1414_v42, 0.0  ;;  %v4542_v56 = vld [vmem:[%s5804_s3 + $0x1c4] ss:$16 sps:$4 sm:$0xff]   ;;  %v1320_v59 = vld [vmem:[#allocation2 + $0x68] sm:$0xff]  ;;  %v1413_v61 = vadd.f32 %v5232_v54, %v1311_v55  ;;  %v1498_v12 = vmax.f32 %v1418_v2, 0.0 }
 0x1a9   : > { %v4546_v62 = vld [vmem:[%s5804_s3 + $0x1c0] ss:$16 sps:$4 sm:$0xff]   ;;  %v4547_v63 = vld [vmem:[%s5804_s3 + $0x1c8] ss:$16 sps:$4 sm:$0xff]   ;;  %v4548_v0 = vld [vmem:[%s5804_s3 + $0x1e4] ss:$16 sps:$4 sm:$0xff]   ;;  %v1422_v3 = vadd.f32 %v5200_v38, %v1320_v59 }
 0x1aa   : > { %2494 = vmatpush1.bf16.msra.mxu0 %v4504_v14  ;;  %v1570_v51 = vpack.c.bf16 %v1494_v47, %v1490_v46  ;;  %v4550_v1 = vld [vmem:[%s5804_s3 + $0x1ec] ss:$16 sps:$4 sm:$0xff]   ;;  %v4552_v4 = vld [vmem:[%s5804_s3 + $0x1e0] ss:$16 sps:$4 sm:$0xff]   ;;  %v4553_v5 = vld [vmem:[%s5804_s3 + $0x1e8] ss:$16 sps:$4 sm:$0xff]  }
 0x1ab   : > { %2760 = vmatpush1.bf16.msra.mxu1 %v4505_v15  ;;  %2495 = vmatprep.subr.bf16.mxu0 %v4506_v16  ;;  %v1489_v6 = vmax.f32 %v1409_v60, 0.0  ;;  %v1493_v7 = vmax.f32 %v1413_v61, 0.0  ;;  %v1315_v8 = vld [vmem:[#allocation2 + $0x40] sm:$0xff]  ;;  %v4559_v11 = vld [vmem:[%s5804_s3 + $0x20c] ss:$16 sps:$4 sm:$0xff]   ;;  %v1502_v13 = vmax.f32 %v1422_v3, 0.0 }
 0x1ac   : > { %2761 = vmatprep.subr.bf16.mxu1 %v4508_v17  ;;  %2511 = vmatprep.mubr.bf16.mxu0 %v1570_v51  ;;  %v1319_v9 = vld [vmem:[#allocation2 + $0x60] sm:$0xff]  ;;  %v1324_v14 = vld [vmem:[#allocation2 + $0x88] sm:$0xff] }
 0x1ad   : > { %2777 = vmatprep.mubr.bf16.mxu1 %v1570_v51  ;;  %v4556_v10 = vld [vmem:[%s5804_s3 + $0x204] ss:$16 sps:$4 sm:$0xff]   ;;  %v1328_v15 = vld [vmem:[#allocation2 + $0xa8] sm:$0xff]  ;;  %v1569_v16 = vpack.c.bf16 %v1493_v7, %v1489_v6  ;;  %v4554_v17 = vld [vmem:[%s5804_s3 + $0x200] ss:$16 sps:$4 sm:$0xff]  }
 0x1ae   : > { %2496 = vmatpush1.bf16.msra.mxu0 %v4510_v18  ;;  %v1417_v18 = vadd.f32 %v5232_v54, %v1315_v8  ;;  %v4562_v21 = vld [vmem:[%s5804_s3 + $0x224] ss:$16 sps:$4 sm:$0xff]   ;;  %v1336_v41 = vld [vmem:[#allocation2 + $0xe8] sm:$0xff]  ;;  %v4566_v46 = vld [vmem:[%s5804_s3 + $0x240] ss:$16 sps:$4 sm:$0xff]  }
 0x1af   : > { %2762 = vmatpush1.bf16.msra.mxu1 %v4511_v19  ;;  %2497 = vmatprep.subr.bf16.mxu0 %v4512_v20  ;;  %v1421_v19 = vadd.f32 %v5232_v54, %v1319_v9  ;;  %v4557_v20 = vld [vmem:[%s5804_s3 + $0x208] ss:$16 sps:$4 sm:$0xff]   ;;  %v1323_v34 = vld [vmem:[#allocation2 + $0x80] sm:$0xff]  ;;  %v4577_v55 = vld [vmem:[%s5804_s3 + $0x26c] ss:$16 sps:$4 sm:$0xff]  }
 0x1b0   : > { %2763 = vmatprep.subr.bf16.mxu1 %v4514_v22  ;;  %v1574_v22 = vpack.c.bf16 %v1502_v13, %v1498_v12  ;;  %v1327_v35 = vld [vmem:[#allocation2 + $0xa0] sm:$0xff]  ;;  %v4569_v47 = vld [vmem:[%s5804_s3 + $0x248] ss:$16 sps:$4 sm:$0xff]   ;;  %v4589_v12 = vld [vmem:[%s5804_s3 + $0x2ac] ss:$16 sps:$4 sm:$0xff]  }
 0x1b1   : > { %v4574_v51 = vld [vmem:[%s5804_s3 + $0x264] ss:$16 sps:$4 sm:$0xff]   ;;  %v4575_v53 = vld [vmem:[%s5804_s3 + $0x268] ss:$16 sps:$4 sm:$0xff]  }
 0x1b2   : > { %2498 = vmatpush1.bf16.msra.mxu0 %v4516_v23  ;;  %v1426_v23 = vadd.f32 %v5200_v38, %v1324_v14  ;;  %v4580_v58 = vld [vmem:[%s5804_s3 + $0x284] ss:$16 sps:$4 sm:$0xff]   ;;  %v4581_v9 = vld [vmem:[%s5804_s3 + $0x288] ss:$16 sps:$4 sm:$0xff]  }
 0x1b3   : > { %2764 = vmatpush1.bf16.msra.mxu1 %v4517_v24  ;;  %2499 = vmatprep.subr.bf16.mxu0 %v4518_v25  ;;  %v1430_v24 = vadd.f32 %v5200_v38, %v1328_v15  ;;  %v4560_v25 = vld [vmem:[%s5804_s3 + $0x220] ss:$16 sps:$4 sm:$0xff]   ;;  %v4587_v15 = vld [vmem:[%s5804_s3 + $0x2a8] ss:$16 sps:$4 sm:$0xff]  }
 0x1b4   : > { %2765 = vmatprep.subr.bf16.mxu1 %v4520_v27  ;;  %v4563_v27 = vld [vmem:[%s5804_s3 + $0x228] ss:$16 sps:$4 sm:$0xff]   ;;  %v1331_v59 = vld [vmem:[#allocation2 + $0xc0] sm:$0xff] }
 0x1b5   : > { %v1433_v3 = vadd.f32 %v5232_v54, %v1331_v59  ;;  %v4605_v59 = vld [vmem:[%s5804_s3 + $0x308] ss:$16 sps:$4 sm:$0xff]  }
 0x1b6   : > { %2500 = vmatpush1.bf16.msra.mxu0 %v4522_v28  ;;  %v4565_v28 = vld [vmem:[%s5804_s3 + $0x22c] ss:$16 sps:$4 sm:$0xff]  }
 0x1b7   : > { %2766 = vmatpush1.bf16.msra.mxu1 %v4523_v29  ;;  %2501 = vmatprep.subr.bf16.mxu0 %v4524_v30  ;;  %v1497_v29 = vmax.f32 %v1417_v18, 0.0  ;;  %v1501_v30 = vmax.f32 %v1421_v19, 0.0  ;;  %v1513_v13 = vmax.f32 %v1433_v3, 0.0  ;;  %v1339_v19 = vld [vmem:[#allocation2 + $0x100] sm:$0xff] }
 0x1b8   : > { %2767 = vmatprep.subr.bf16.mxu1 %v4526_v32  ;;  %v4568_v32 = vld [vmem:[%s5804_s3 + $0x244] ss:$16 sps:$4 sm:$0xff]  }
 0x1b9   : > { %v1573_v42 = vpack.c.bf16 %v1501_v30, %v1497_v29  ;;  %v1355_v3 = vld [vmem:[#allocation2 + $0x180] sm:$0xff] }
 0x1ba   : > { %2502 = vmatpush1.bf16.msra.mxu0 %v4528_v33  ;;  %v4571_v33 = vld [vmem:[%s5804_s3 + $0x24c] ss:$16 sps:$4 sm:$0xff]  }
 0x1bb   : > { %2768 = vmatpush1.bf16.msra.mxu1 %v4529_v37  ;;  %2503 = vmatprep.subr.bf16.mxu0 %v4530_v39  ;;  %v1332_v37 = vld [vmem:[#allocation2 + $0xc8] sm:$0xff]  ;;  %v1506_v39 = vmax.f32 %v1426_v23, 0.0 }
 0x1bc   : > { %2769 = vmatprep.subr.bf16.mxu1 %v4532_v40  ;;  %v1510_v40 = vmax.f32 %v1430_v24, 0.0  ;;  %v4595_v23 = vld [vmem:[%s5804_s3 + $0x2cc] ss:$16 sps:$4 sm:$0xff]  }
 0x1be   : > { %2504 = vmatpush1.bf16.msra.mxu0 %v4534_v44  ;;  %v1425_v44 = vadd.f32 %v5232_v54, %v1323_v34  ;;  %v4596_v34 = vld [vmem:[%s5804_s3 + $0x2e0] ss:$16 sps:$4 sm:$0xff]  }
 0x1bf   : > { %2770 = vmatpush1.bf16.msra.mxu1 %v4535_v45  ;;  %2505 = vmatprep.subr.bf16.mxu0 %v4536_v48  ;;  %v1429_v45 = vadd.f32 %v5232_v54, %v1327_v35  ;;  %v1434_v48 = vadd.f32 %v5200_v38, %v1332_v37  ;;  %v4598_v35 = vld [vmem:[%s5804_s3 + $0x2e4] ss:$16 sps:$4 sm:$0xff]   ;;  %v4601_v37 = vld [vmem:[%s5804_s3 + $0x2ec] ss:$16 sps:$4 sm:$0xff]  }
 0x1c0   : > { %2771 = vmatprep.subr.bf16.mxu1 %v4538_v49  ;;  %v1438_v49 = vadd.f32 %v5200_v38, %v1336_v41 }
 0x1c1   : > { %v1514_v60 = vmax.f32 %v1434_v48, 0.0  ;;  %v1356_v48 = vld [vmem:[#allocation2 + $0x188] sm:$0xff] }
 0x1c2   : > { %2506 = vmatpush1.bf16.msra.mxu0 %v4540_v50  ;;  %v1578_v50 = vpack.c.bf16 %v1510_v40, %v1506_v39  ;;  %v1518_v61 = vmax.f32 %v1438_v49, 0.0  ;;  %v1347_v39 = vld [vmem:[#allocation2 + $0x140] sm:$0xff]  ;;  %v1360_v49 = vld [vmem:[#allocation2 + $0x1a8] sm:$0xff] }
 0x1c3   : > { %2772 = vmatpush1.bf16.msra.mxu1 %v4541_v52  ;;  %2507 = vmatprep.subr.bf16.mxu0 %v4542_v56  ;;  %v4572_v52 = vld [vmem:[%s5804_s3 + $0x260] ss:$16 sps:$4 sm:$0xff]   ;;  %v1505_v56 = vmax.f32 %v1425_v44, 0.0 }
 0x1c4   : > { %2773 = vmatprep.subr.bf16.mxu1 %v4544_v57  ;;  %v1509_v57 = vmax.f32 %v1429_v45, 0.0  ;;  %v1582_v6 = vpack.c.bf16 %v1518_v61, %v1514_v60  ;;  %v1351_v44 = vld [vmem:[#allocation2 + $0x160] sm:$0xff]  ;;  %v4613_v61 = vld [vmem:[%s5804_s3 + $0x32c] ss:$16 sps:$4 sm:$0xff]  }
 0x1c5   : > { %v4610_v60 = vld [vmem:[%s5804_s3 + $0x324] ss:$16 sps:$4 sm:$0xff]  }
 0x1c6   : > { %2508 = vmatpush1.bf16.msra.mxu0 %v4546_v62  ;;  %v1335_v62 = vld [vmem:[#allocation2 + $0xe0] sm:$0xff]  ;;  %v1577_v2 = vpack.c.bf16 %v1509_v57, %v1505_v56  ;;  %v1458_v57 = vadd.f32 %v5200_v38, %v1356_v48 }
 0x1c7   : > { %2774 = vmatpush1.bf16.msra.mxu1 %v4547_v63  ;;  %2509 = vmatprep.subr.bf16.mxu0 %v4548_v0  ;;  %v4583_v63 = vld [vmem:[%s5804_s3 + $0x28c] ss:$16 sps:$4 sm:$0xff]   ;;  %v4602_v56 = vld [vmem:[%s5804_s3 + $0x300] ss:$16 sps:$4 sm:$0xff]  }
 0x1c8   : > { %2775 = vmatprep.subr.bf16.mxu1 %v4550_v1  ;;  %v1340_v0 = vld [vmem:[#allocation2 + $0x108] sm:$0xff] }
 0x1c9   : > { %v1344_v1 = vld [vmem:[#allocation2 + $0x128] sm:$0xff]  ;;  %v1442_v7 = vadd.f32 %v5200_v38, %v1340_v0  ;;  %v4608_v0 = vld [vmem:[%s5804_s3 + $0x320] ss:$16 sps:$4 sm:$0xff]  }
 0x1ca   : > { %2510 = vmatpush1.bf16.msra.mxu0 %v4552_v4  ;;  %v1437_v4 = vadd.f32 %v5232_v54, %v1335_v62  ;;  %v1446_v8 = vadd.f32 %v5200_v38, %v1344_v1  ;;  %v1538_v1 = vmax.f32 %v1458_v57, 0.0  ;;  %v4632_v57 = vld [vmem:[%s5804_s3 + $0x3a0] ss:$16 sps:$4 sm:$0xff]  }
 0x1cb   : > { %2776 = vmatpush1.bf16.msra.mxu1 %v4553_v5  ;;  %2612 = vmatprep.subr.bf16.mxu0 %v4556_v10  ;;  %v4578_v5 = vld [vmem:[%s5804_s3 + $0x280] ss:$16 sps:$4 sm:$0xff]  }
 0x1cc   : > { %2878 = vmatprep.subr.bf16.mxu1 %v4559_v11  ;;  %v4584_v10 = vld [vmem:[%s5804_s3 + $0x2a0] ss:$16 sps:$4 sm:$0xff]   ;;  %v4586_v11 = vld [vmem:[%s5804_s3 + $0x2a4] ss:$16 sps:$4 sm:$0xff]   ;;  %v1517_v14 = vmax.f32 %v1437_v4, 0.0  ;;  %v1526_v18 = vmax.f32 %v1446_v8, 0.0 }
 0x1cd   : > { %2512 = vmatmul.mubr.bf16.vlgmr.msra.gmra.mrb[0].mxu0 %v1569_v16  ;;  %v1359_v4 = vld [vmem:[#allocation2 + $0x1a0] sm:$0xff] }
 0x1ce   : > { %2778 = vmatmul.mubr.bf16.vlgmr.msra.gmra.mrb[0].mxu1 %v1569_v16  ;;  %2613 = vmatpush1.bf16.msra.mxu0 %v4554_v17  ;;  %v4592_v16 = vld [vmem:[%s5804_s3 + $0x2c4] ss:$16 sps:$4 sm:$0xff]   ;;  %v1522_v17 = vmax.f32 %v1442_v7, 0.0  ;;  %v1581_v24 = vpack.c.bf16 %v1517_v14, %v1513_v13  ;;  %v1368_v7 = vld [vmem:[#allocation2 + $0x1e8] sm:$0xff] }
 0x1cf   : > { %2879 = vmatpush1.bf16.msra.mxu1 %v4557_v20  ;;  %2614 = vmatprep.subr.bf16.mxu0 %v4562_v21  ;;  %v1343_v20 = vld [vmem:[#allocation2 + $0x120] sm:$0xff]  ;;  %v1348_v21 = vld [vmem:[#allocation2 + $0x148] sm:$0xff] }
 0x1d0   : > { %2521 = vmatprep.mubr.bf16.mxu0 %v1574_v22  ;;  %2787 = vmatprep.mubr.bf16.mxu1 %v1574_v22  ;;  %v1352_v22 = vld [vmem:[#allocation2 + $0x168] sm:$0xff]  ;;  %v1586_v29 = vpack.c.bf16 %v1526_v18, %v1522_v17  ;;  %v1450_v30 = vadd.f32 %v5200_v38, %v1348_v21  ;;  %v4616_v8 = vld [vmem:[%s5804_s3 + $0x344] ss:$16 sps:$4 sm:$0xff]  }
 0x1d1   : > { %2880 = vmatprep.subr.bf16.mxu1 %v4565_v28  ;;  %v4590_v28 = vld [vmem:[%s5804_s3 + $0x2c0] ss:$16 sps:$4 sm:$0xff]   ;;  %v4617_v17 = vld [vmem:[%s5804_s3 + $0x348] ss:$16 sps:$4 sm:$0xff]   ;;  %v4622_v18 = vld [vmem:[%s5804_s3 + $0x364] ss:$16 sps:$4 sm:$0xff]  }
 0x1d2   : > { %2615 = vmatpush1.bf16.msra.mxu0 %v4560_v25  ;;  %v1441_v25 = vadd.f32 %v5232_v54, %v1339_v19  ;;  %v1530_v45 = vmax.f32 %v1450_v30, 0.0  ;;  %v1363_v19 = vld [vmem:[#allocation2 + $0x1c0] sm:$0xff]  ;;  %v4625_v21 = vld [vmem:[%s5804_s3 + $0x36c] ss:$16 sps:$4 sm:$0xff]  }
 0x1d3   : > { %2881 = vmatpush1.bf16.msra.mxu1 %v4563_v27  ;;  %2616 = vmatprep.subr.bf16.mxu0 %v4568_v32  ;;  %v1445_v27 = vadd.f32 %v5232_v54, %v1343_v20  ;;  %v1454_v32 = vadd.f32 %v5200_v38, %v1352_v22  ;;  %v1367_v20 = vld [vmem:[#allocation2 + $0x1e0] sm:$0xff]  ;;  %v1465_v30 = vadd.f32 %v5232_v54, %v1363_v19 }
 0x1d4   : > { %2882 = vmatprep.subr.bf16.mxu1 %v4571_v33  ;;  %v4593_v33 = vld [vmem:[%s5804_s3 + $0x2c8] ss:$16 sps:$4 sm:$0xff]   ;;  %v1521_v40 = vmax.f32 %v1441_v25, 0.0  ;;  %v4650_v19 = vld [vmem:[%s5806_s5 + $0x40] sm:$0xff]  }
 0x1d5   : > { %2522 = vmatmul.mubr.bf16.gmra.mrb[4].mxu0 %v1573_v42  ;;  %v1525_v41 = vmax.f32 %v1445_v27, 0.0  ;;  %v1372_v27 = vld [vmem:[#allocation2 + $0x208] sm:$0xff] }
 0x1d6   : > { %2788 = vmatmul.mubr.bf16.gmra.mrb[4].mxu1 %v1573_v42  ;;  %2617 = vmatpush1.bf16.msra.mxu0 %v4566_v46  ;;  %v4599_v42 = vld [vmem:[%s5804_s3 + $0x2e8] ss:$16 sps:$4 sm:$0xff]   ;;  %v1534_v46 = vmax.f32 %v1454_v32, 0.0  ;;  %v1469_v32 = vadd.f32 %v5232_v54, %v1367_v20  ;;  %v4652_v20 = vld [vmem:[%s5806_s5 + $0xc0] sm:$0xff]  }
 0x1d7   : > { %2883 = vmatpush1.bf16.msra.mxu1 %v4569_v47  ;;  %2531 = vmatprep.mubr.bf16.mxu0 %v1578_v50  ;;  %v4604_v47 = vld [vmem:[%s5804_s3 + $0x304] ss:$16 sps:$4 sm:$0xff]  }
 0x1d8   : > { %2618 = vmatprep.subr.bf16.mxu0 %v4574_v51  ;;  %2797 = vmatprep.mubr.bf16.mxu1 %v1578_v50  ;;  %v4607_v50 = vld [vmem:[%s5804_s3 + $0x30c] ss:$16 sps:$4 sm:$0xff]   ;;  %v1585_v51 = vpack.c.bf16 %v1525_v41, %v1521_v40  ;;  %v1474_v40 = vadd.f32 %v5200_v38, %v1372_v27  ;;  %v1549_v48 = vmax.f32 %v1469_v32, 0.0 }
 0x1d9   : > { %2884 = vmatprep.subr.bf16.mxu1 %v4577_v55  ;;  %v1590_v55 = vpack.c.bf16 %v1534_v46, %v1530_v45  ;;  %v4629_v45 = vld [vmem:[%s5804_s3 + $0x388] ss:$16 sps:$4 sm:$0xff]   ;;  %v1403_v46 = vsub.s32 3, %v5168_v26 }
 0x1da   : > { %2619 = vmatpush1.bf16.msra.mxu0 %v4572_v52  ;;  %v1449_v52 = vadd.f32 %v5232_v54, %v1347_v39  ;;  %v1318_v32 = vld [vmem:[#allocation2 + $0x58] sm:$0xff] }
 0x1db   : > { %2885 = vmatpush1.bf16.msra.mxu1 %v4575_v53  ;;  %2620 = vmatprep.subr.bf16.mxu0 %v4580_v58  ;;  %v1453_v53 = vadd.f32 %v5232_v54, %v1351_v44  ;;  %v1462_v58 = vadd.f32 %v5200_v38, %v1360_v49  ;;  %v4626_v44 = vld [vmem:[%s5804_s3 + $0x380] ss:$16 sps:$4 sm:$0xff]  }
 0x1dc   : > { %2886 = vmatprep.subr.bf16.mxu1 %v4583_v63  ;;  %v1529_v62 = vmax.f32 %v1449_v52, 0.0  ;;  %v1375_v49 = vld [vmem:[#allocation2 + $0x220] sm:$0xff]  ;;  %v1380_v52 = vld [vmem:[#allocation2 + $0x248] sm:$0xff] }
 0x1dd   : > { %2532 = vmatmul.mubr.bf16.gmra.mrb[8].mxu0 %v1577_v2  ;;  %v1533_v63 = vmax.f32 %v1453_v53, 0.0  ;;  %v4637_v53 = vld [vmem:[%s5804_s3 + $0x3ac] ss:$16 sps:$4 sm:$0xff]  }
 0x1de   : > { %2798 = vmatmul.mubr.bf16.gmra.mrb[8].mxu1 %v1577_v2  ;;  %2621 = vmatpush1.bf16.msra.mxu0 %v4578_v5  ;;  %v1542_v2 = vmax.f32 %v1462_v58, 0.0  ;;  %v4611_v5 = vld [vmem:[%s5804_s3 + $0x328] ss:$16 sps:$4 sm:$0xff]  }
 0x1df   : > { %2541 = vmatprep.mubr.bf16.mxu0 %v1582_v6  ;;  %2807 = vmatprep.mubr.bf16.mxu1 %v1582_v6  ;;  %v1364_v6 = vld [vmem:[#allocation2 + $0x1c8] sm:$0xff] }
 0x1e0   : > { %2887 = vmatpush1.bf16.msra.mxu1 %v4581_v9  ;;  %2622 = vmatprep.subr.bf16.mxu0 %v4586_v11  ;;  %v4619_v9 = vld [vmem:[%s5804_s3 + $0x34c] ss:$16 sps:$4 sm:$0xff]   ;;  %v1457_v11 = vadd.f32 %v5232_v54, %v1355_v3  ;;  %v1594_v13 = vpack.c.bf16 %v1542_v2, %v1538_v1  ;;  %v1466_v14 = vadd.f32 %v5200_v38, %v1364_v6  ;;  %v4635_v58 = vld [vmem:[%s5804_s3 + $0x3a8] ss:$16 sps:$4 sm:$0xff]   ;;  %v4638_v2 = vld [vmem:[%s5804_s3 + $0x3c0] ss:$16 sps:$4 sm:$0xff]  }
 0x1e1   : > { %2888 = vmatprep.subr.bf16.mxu1 %v4589_v12  ;;  %v1461_v12 = vadd.f32 %v5232_v54, %v1359_v4  ;;  %v4641_v3 = vld [vmem:[%s5804_s3 + $0x3c8] ss:$16 sps:$4 sm:$0xff]  }
 0x1e2   : > { %2623 = vmatpush1.bf16.msra.mxu0 %v4584_v10  ;;  %v1589_v10 = vpack.c.bf16 %v1533_v63, %v1529_v62  ;;  %v1537_v22 = vmax.f32 %v1457_v11, 0.0  ;;  %v1384_v63 = vld [vmem:[#allocation2 + $0x268] sm:$0xff] }
 0x1e3   : > { %2624 = vmatprep.subr.bf16.mxu0 %v4592_v16  ;;  %v4614_v16 = vld [vmem:[%s5804_s3 + $0x340] ss:$16 sps:$4 sm:$0xff]   ;;  %v1486_v6 = vadd.f32 %v5200_v38, %v1384_v63  ;;  %v4649_v11 = vld [vmem:[%s5804_s3 + $0x3ec] ss:$16 sps:$4 sm:$0xff]  }
 0x1e4   : > { %2889 = vmatpush1.bf16.msra.mxu1 %v4587_v15  ;;  %v1470_v15 = vadd.f32 %v5200_v38, %v1368_v7  ;;  %v4656_v63 = vld [vmem:[%s5806_s5 + $0xc8] sm:$0xff]  }
 0x1e5   : > { %2890 = vmatprep.subr.bf16.mxu1 %v4595_v23  ;;  %2542 = vmatmul.mubr.bf16.gmra.mrb[12].mxu0 %v1581_v24  ;;  %v1541_v23 = vmax.f32 %v1461_v12, 0.0  ;;  %v1566_v12 = vmax.f32 %v1486_v6, 0.0  ;;  %v1334_v6 = vld [vmem:[#allocation2 + $0xd8] sm:$0xff] }
 0x1e6   : > { %2808 = vmatmul.mubr.bf16.gmra.mrb[12].mxu1 %v1581_v24  ;;  %2551 = vmatprep.mubr.bf16.mxu0 %v1586_v29  ;;  %v1546_v24 = vmax.f32 %v1466_v14, 0.0  ;;  %v1550_v25 = vmax.f32 %v1470_v15, 0.0  ;;  %v1310_v14 = vld [vmem:[#allocation2 + $0x18] sm:$0xff]  ;;  %v5490_v15 = vrot.slane %v5192_v36, %v1403_v46 }
 0x1e7   : > { %2625 = vmatpush1.bf16.msra.mxu0 %v4590_v28  ;;  %2817 = vmatprep.mubr.bf16.mxu1 %v1586_v29  ;;  %v1376_v28 = vld [vmem:[#allocation2 + $0x228] sm:$0xff]  ;;  %v4620_v29 = vld [vmem:[%s5804_s3 + $0x360] ss:$16 sps:$4 sm:$0xff]   ;;  %v1593_v39 = vpack.c.bf16 %v1541_v23, %v1537_v22 }
 0x1e8   : > { %2891 = vmatpush1.bf16.msra.mxu1 %v4593_v33  ;;  %2626 = vmatprep.subr.bf16.mxu0 %v4598_v35  ;;  %v4623_v33 = vld [vmem:[%s5804_s3 + $0x368] ss:$16 sps:$4 sm:$0xff]   ;;  %v4631_v35 = vld [vmem:[%s5804_s3 + $0x38c] ss:$16 sps:$4 sm:$0xff]   ;;  %v1478_v41 = vadd.f32 %v5200_v38, %v1376_v28  ;;  %v1309_v28 = vld [vmem:[#allocation2 + $0x10] sm:$0xff] }
 0x1e9   : > { %2892 = vmatprep.subr.bf16.mxu1 %v4601_v37  ;;  %v1371_v37 = vld [vmem:[#allocation2 + $0x200] sm:$0xff] }
 0x1eb   : > { %2627 = vmatpush1.bf16.msra.mxu0 %v4596_v34  ;;  %v4628_v34 = vld [vmem:[%s5804_s3 + $0x384] ss:$16 sps:$4 sm:$0xff]  }
 0x1ec   : > { %2893 = vmatpush1.bf16.msra.mxu1 %v4599_v42  ;;  %2628 = vmatprep.subr.bf16.mxu0 %v4604_v47  ;;  %v1598_v42 = vpack.c.bf16 %v1550_v25, %v1546_v24  ;;  %v1545_v47 = vmax.f32 %v1465_v30, 0.0  ;;  %v1412_v24 = vadd.f32 %v5490_v15, %v1310_v14 }
 0x1ed   : > { %2894 = vmatprep.subr.bf16.mxu1 %v4607_v50  ;;  %2552 = vmatmul.mubr.bf16.gmra.mrb[16].mxu0 %v1585_v51  ;;  %v1473_v50 = vadd.f32 %v5232_v54, %v1371_v37 }
 0x1ee   : > { %2818 = vmatmul.mubr.bf16.gmra.mrb[16].mxu1 %v1585_v51  ;;  %2561 = vmatprep.mubr.bf16.mxu0 %v1590_v55  ;;  %v4634_v51 = vld [vmem:[%s5804_s3 + $0x3a4] ss:$16 sps:$4 sm:$0xff]   ;;  %v1597_v1 = vpack.c.bf16 %v1549_v48, %v1545_v47 }
 0x1ef   : > { %2827 = vmatprep.mubr.bf16.mxu1 %v1590_v55  ;;  %2629 = vmatpush1.bf16.msra.mxu0 %v4602_v56  ;;  %v1554_v55 = vmax.f32 %v1474_v40, 0.0  ;;  %v1558_v56 = vmax.f32 %v1478_v41, 0.0  ;;  %v1553_v62 = vmax.f32 %v1473_v50, 0.0 }
 0x1f0   : > { %2895 = vmatpush1.bf16.msra.mxu1 %v4605_v59  ;;  %2630 = vmatprep.subr.bf16.mxu0 %v4610_v60  ;;  %v1477_v59 = vadd.f32 %v5232_v54, %v1375_v49  ;;  %v4640_v60 = vld [vmem:[%s5804_s3 + $0x3c4] ss:$16 sps:$4 sm:$0xff]   ;;  %v1326_v49 = vld [vmem:[#allocation2 + $0x98] sm:$0xff] }
 0x1f1   : > { %2896 = vmatprep.subr.bf16.mxu1 %v4613_v61  ;;  %v1482_v61 = vadd.f32 %v5200_v38, %v1380_v52  ;;  %v1602_v4 = vpack.c.bf16 %v1558_v56, %v1554_v55  ;;  %v4644_v38 = vld [vmem:[%s5804_s3 + $0x3e0] ss:$16 sps:$4 sm:$0xff]   ;;  %v1330_v52 = vld [vmem:[#allocation2 + $0xb8] sm:$0xff] }
 0x1f3   : > { %2631 = vmatpush1.bf16.msra.mxu0 %v4608_v0  ;;  %v4643_v0 = vld [vmem:[%s5804_s3 + $0x3cc] ss:$16 sps:$4 sm:$0xff]   ;;  %v1562_v7 = vmax.f32 %v1482_v61, 0.0  ;;  %v1432_v61 = vadd.f32 %v5490_v15, %v1330_v52 }
 0x1f4   : > { %2897 = vmatpush1.bf16.msra.mxu1 %v4611_v5  ;;  %2632 = vmatprep.subr.bf16.mxu0 %v4616_v8  ;;  %v1557_v5 = vmax.f32 %v1477_v59, 0.0  ;;  %v1379_v8 = vld [vmem:[#allocation2 + $0x240] sm:$0xff] }
 0x1f5   : > { %2898 = vmatprep.subr.bf16.mxu1 %v4619_v9  ;;  %2562 = vmatmul.mubr.bf16.gmra.mrb[20].mxu0 %v1589_v10  ;;  %v4646_v9 = vld [vmem:[%s5804_s3 + $0x3e4] ss:$16 sps:$4 sm:$0xff]   ;;  %v1606_v23 = vpack.c.bf16 %v1566_v12, %v1562_v7  ;;  %v1338_v7 = vld [vmem:[#allocation2 + $0xf8] sm:$0xff] }
 0x1f6   : > { %2828 = vmatmul.mubr.bf16.gmra.mrb[20].mxu1 %v1589_v10  ;;  %2571 = vmatprep.mubr.bf16.mxu0 %v1594_v13  ;;  %v1383_v10 = vld [vmem:[#allocation2 + $0x260] sm:$0xff] }
 0x1f7   : > { %2837 = vmatprep.mubr.bf16.mxu1 %v1594_v13  ;;  %2633 = vmatpush1.bf16.msra.mxu0 %v4614_v16  ;;  %v4647_v13 = vld [vmem:[%s5804_s3 + $0x3e8] ss:$16 sps:$4 sm:$0xff]   ;;  %v1485_v22 = vadd.f32 %v5232_v54, %v1383_v10  ;;  %v4658_v10 = vld [vmem:[%s5806_s5 + $0x50] sm:$0xff]  }
 0x1f8   : > { %2899 = vmatpush1.bf16.msra.mxu1 %v4617_v17  ;;  %2634 = vmatprep.subr.bf16.mxu0 %v4622_v18  ;;  %v1314_v16 = vld [vmem:[#allocation2 + $0x38] sm:$0xff]  ;;  %v1399_v17 = vsub.s32 2, %v5168_v26  ;;  %v1481_v18 = vadd.f32 %v5232_v54, %v1379_v8  ;;  %v4655_v8 = vld [vmem:[%s5806_s5 + $0x8] sm:$0xff]  }
 0x1f9   : > { %2900 = vmatprep.subr.bf16.mxu1 %v4625_v21  ;;  %v1601_v21 = vpack.c.bf16 %v1557_v5, %v1553_v62  ;;  %v1416_v25 = vadd.f32 %v5490_v15, %v1314_v16  ;;  %v1565_v54 = vmax.f32 %v1485_v22, 0.0  ;;  %v4654_v62 = vld [vmem:[%s5806_s5 + $0x48] sm:$0xff]   ;;  %v1329_v5 = vld [vmem:[#allocation2 + $0xb0] sm:$0xff]  ;;  %v1436_v16 = vadd.f32 %v5490_v15, %v1334_v6  ;;  %v4664_v22 = vld [vmem:[%s5806_s5 + $0xd8] sm:$0xff]  }
 0x1fa   : > { %v1561_v27 = vmax.f32 %v1481_v18, 0.0  ;;  %v5506_v30 = vrot.slane %v5192_v36, %v1399_v17  ;;  %v1440_v18 = vadd.f32 %v5490_v15, %v1338_v7  ;;  %v4677_v6 = vld [vmem:[%s5806_s5 + $0xb0] sm:$0xff]  }
 0x1fb   : > { %2635 = vmatpush1.bf16.msra.mxu0 %v4620_v29  ;;  %v1313_v29 = vld [vmem:[#allocation2 + $0x30] sm:$0xff] }
 0x1fc   : > { %2901 = vmatpush1.bf16.msra.mxu1 %v4623_v33  ;;  %2636 = vmatprep.subr.bf16.mxu0 %v4628_v34  ;;  %v1492_v33 = vmax.f32 %v1412_v24, 0.0  ;;  %v1496_v34 = vmax.f32 %v1416_v25, 0.0  ;;  %v1605_v37 = vpack.c.bf16 %v1565_v54, %v1561_v27  ;;  %v1415_v40 = vadd.f32 %v5506_v30, %v1313_v29  ;;  %v1337_v29 = vld [vmem:[#allocation2 + $0xf0] sm:$0xff]  ;;  %v1342_v54 = vld [vmem:[#allocation2 + $0x118] sm:$0xff] }
 0x1fd   : > { %2902 = vmatprep.subr.bf16.mxu1 %v4631_v35  ;;  %2572 = vmatmul.mubr.bf16.gmra.mrb[24].mxu0 %v1593_v39  ;;  %v1322_v35 = vld [vmem:[#allocation2 + $0x78] sm:$0xff]  ;;  %v1516_v25 = vmax.f32 %v1436_v16, 0.0  ;;  %v1520_v27 = vmax.f32 %v1440_v18, 0.0 }
 0x1fe   : > { %2838 = vmatmul.mubr.bf16.gmra.mrb[24].mxu1 %v1593_v39  ;;  %2581 = vmatprep.mubr.bf16.mxu0 %v1598_v42  ;;  %v1411_v39 = vadd.f32 %v5506_v30, %v1309_v28  ;;  %v1572_v41 = vpack.c.bf16 %v1496_v34, %v1492_v33  ;;  %v1424_v36 = vadd.f32 %v5490_v15, %v1322_v35  ;;  %v1495_v48 = vmax.f32 %v1415_v40, 0.0  ;;  %v1333_v28 = vld [vmem:[#allocation2 + $0xd0] sm:$0xff]  ;;  %v4663_v33 = vld [vmem:[%s5806_s5 + $0x18] sm:$0xff]   ;;  %v4666_v35 = vld [vmem:[%s5806_s5 + $0x60] sm:$0xff]  }
 0x1ff   : > { %2847 = vmatprep.mubr.bf16.mxu1 %v1598_v42  ;;  %2637 = vmatpush1.bf16.msra.mxu0 %v4626_v44  ;;  %v1420_v42 = vadd.f32 %v5490_v15, %v1318_v32  ;;  %v1317_v44 = vld [vmem:[#allocation2 + $0x50] sm:$0xff]  ;;  %v1346_v32 = vld [vmem:[#allocation2 + $0x138] sm:$0xff]  ;;  %v1435_v40 = vadd.f32 %v5506_v30, %v1333_v28 }
 0x200   : > { %2903 = vmatpush1.bf16.msra.mxu1 %v4629_v45  ;;  %2638 = vmatprep.subr.bf16.mxu0 %v4634_v51  ;;  %v1321_v45 = vld [vmem:[#allocation2 + $0x70] sm:$0xff]  ;;  %v1491_v47 = vmax.f32 %v1411_v39, 0.0  ;;  %v1504_v51 = vmax.f32 %v1424_v36, 0.0  ;;  %v1419_v55 = vadd.f32 %v5506_v30, %v1317_v44  ;;  %v4665_v34 = vld [vmem:[%s5806_s5 + $0x98] sm:$0xff]   ;;  %v1444_v36 = vadd.f32 %v5490_v15, %v1342_v54 }
 0x201   : > { %2904 = vmatprep.subr.bf16.mxu1 %v4637_v53  ;;  %v1500_v50 = vmax.f32 %v1420_v42, 0.0  ;;  %v1423_v56 = vadd.f32 %v5506_v30, %v1321_v45  ;;  %v1584_v42 = vpack.c.bf16 %v1520_v27, %v1516_v25  ;;  %v1448_v44 = vadd.f32 %v5490_v15, %v1346_v32  ;;  %v4667_v45 = vld [vmem:[%s5806_s5 + $0x20] sm:$0xff]   ;;  %v1357_v27 = vld [vmem:[#allocation2 + $0x190] sm:$0xff]  ;;  %v1370_v54 = vld [vmem:[#allocation2 + $0x1f8] sm:$0xff] }
 0x202   : > { %v1571_v53 = vpack.c.bf16 %v1495_v48, %v1491_v47  ;;  %v4669_v47 = vld [vmem:[%s5806_s5 + $0xa0] sm:$0xff]   ;;  %v4670_v48 = vld [vmem:[%s5806_s5 + $0x68] sm:$0xff]   ;;  %v1524_v52 = vmax.f32 %v1444_v36, 0.0  ;;  %v1361_v28 = vld [vmem:[#allocation2 + $0x1b0] sm:$0xff] }
 0x203   : > { %2639 = vmatpush1.bf16.msra.mxu0 %v4632_v57  ;;  %v4651_v57 = vld [vmem:[%s5806_s5] sm:$0xff]   ;;  %v1576_v59 = vpack.c.bf16 %v1504_v51, %v1500_v50  ;;  %v1515_v50 = vmax.f32 %v1435_v40, 0.0 }
 0x204   : > { %2905 = vmatpush1.bf16.msra.mxu1 %v4635_v58  ;;  %2640 = vmatprep.subr.bf16.mxu0 %v4640_v60  ;;  %v4653_v58 = vld [vmem:[%s5806_s5 + $0x80] sm:$0xff]   ;;  %v1428_v60 = vadd.f32 %v5490_v15, %v1326_v49  ;;  %v4672_v49 = vld [vmem:[%s5806_s5 + $0xe8] sm:$0xff]  }
 0x205   : > { %2906 = vmatprep.subr.bf16.mxu1 %v4643_v0  ;;  %2582 = vmatmul.mubr.bf16.gmra.mrb[28].mxu0 %v1597_v1  ;;  %v1499_v0 = vmax.f32 %v1419_v55, 0.0  ;;  %v1341_v55 = vld [vmem:[#allocation2 + $0x110] sm:$0xff] }
 0x206   : > { %2848 = vmatmul.mubr.bf16.gmra.mrb[28].mxu1 %v1597_v1  ;;  %2591 = vmatprep.mubr.bf16.mxu0 %v1602_v4  ;;  %v1503_v1 = vmax.f32 %v1423_v56, 0.0  ;;  %v1345_v56 = vld [vmem:[#allocation2 + $0x130] sm:$0xff] }
 0x207   : > { %2857 = vmatprep.mubr.bf16.mxu1 %v1602_v4  ;;  %2641 = vmatpush1.bf16.msra.mxu0 %v4638_v2  ;;  %v1508_v2 = vmax.f32 %v1428_v60, 0.0  ;;  %v1325_v4 = vld [vmem:[#allocation2 + $0x90] sm:$0xff]  ;;  %v4673_v60 = vld [vmem:[%s5806_s5 + $0xa8] sm:$0xff]  }
 0x208   : > { %2907 = vmatpush1.bf16.msra.mxu1 %v4641_v3  ;;  %2642 = vmatprep.subr.bf16.mxu0 %v4646_v9  ;;  %v1512_v3 = vmax.f32 %v1432_v61, 0.0  ;;  %v4657_v9 = vld [vmem:[%s5806_s5 + $0x88] sm:$0xff]   ;;  %v1427_v12 = vadd.f32 %v5506_v30, %v1325_v4  ;;  %v4674_v61 = vld [vmem:[%s5806_s5 + $0x70] sm:$0xff]  }
 0x209   : > { %2908 = vmatprep.subr.bf16.mxu1 %v4649_v11  ;;  %v4660_v11 = vld [vmem:[%s5806_s5 + $0xd0] sm:$0xff]  }
 0x20a   : > { %v1580_v14 = vpack.c.bf16 %v1512_v3, %v1508_v2 }
 0x20b   : > { %2643 = vmatpush1.bf16.msra.mxu0 %v4644_v38  ;;  %v1575_v38 = vpack.c.bf16 %v1503_v1, %v1499_v0  ;;  %v1443_v0 = vadd.f32 %v5506_v30, %v1341_v55  ;;  %v1447_v1 = vadd.f32 %v5506_v30, %v1345_v56 }
 0x20c   : > { %2909 = vmatpush1.bf16.msra.mxu1 %v4647_v13  ;;  %4026 = vmatprep.subr.bf16.mxu0 %v4650_v19  ;;  %v1431_v13 = vadd.f32 %v5506_v30, %v1329_v5  ;;  %v4659_v19 = vld [vmem:[%s5806_s5 + $0x10] sm:$0xff]  }
 0x20d   : > { %4102 = vmatprep.subr.bf16.mxu1 %v4652_v20  ;;  %2592 = vmatmul.mubr.bf16.gmra.mrb[32].mxu0 %v1601_v21  ;;  %v4661_v20 = vld [vmem:[%s5806_s5 + $0x90] sm:$0xff]   ;;  %v1523_v7 = vmax.f32 %v1443_v0, 0.0 }
 0x20e   : > { %2858 = vmatmul.mubr.bf16.gmra.mrb[32].mxu1 %v1601_v21  ;;  %2601 = vmatprep.mubr.bf16.mxu0 %v1606_v23  ;;  %v4662_v21 = vld [vmem:[%s5806_s5 + $0x58] sm:$0xff]   ;;  %v1511_v24 = vmax.f32 %v1431_v13, 0.0  ;;  %v4675_v5 = vld [vmem:[%s5806_s5 + $0x30] sm:$0xff]  }
 0x20f   : > { %2867 = vmatprep.mubr.bf16.mxu1 %v1606_v23  ;;  %v1507_v23 = vmax.f32 %v1427_v12, 0.0  ;;  %v1358_v12 = vld [vmem:[#allocation2 + $0x198] sm:$0xff] }
 0x210   : > { %v1362_v13 = vld [vmem:[#allocation2 + $0x1b8] sm:$0xff] }
 0x211   : > { %v1579_v39 = vpack.c.bf16 %v1511_v24, %v1507_v23 }
 0x215   : > { %2602 = vmatmul.mubr.bf16.gmra.mrb[36].mxu0 %v1605_v37 }
 0x216   : > { %2868 = vmatmul.mubr.bf16.gmra.mrb[36].mxu1 %v1605_v37  ;;  %2644 = vmatprep.mubr.bf16.mxu0 %v1572_v41  ;;  %v4668_v37 = vld [vmem:[%s5806_s5 + $0xe0] sm:$0xff]  }
 0x217   : > { %2910 = vmatprep.mubr.bf16.mxu1 %v1572_v41  ;;  %v1439_v41 = vadd.f32 %v5506_v30, %v1337_v29  ;;  %v1366_v29 = vld [vmem:[#allocation2 + $0x1d8] sm:$0xff] }
 0x219   : > { %v1519_v51 = vmax.f32 %v1439_v41, 0.0 }
 0x21d   : > { %2645 = vmatmul.mubr.bf16.vlgmr.msra.gmra.mrb[0].mxu0 %v1571_v53 }
 0x21e   : > { %2911 = vmatmul.mubr.bf16.vlgmr.msra.gmra.mrb[0].mxu1 %v1571_v53  ;;  %2654 = vmatprep.mubr.bf16.mxu0 %v1576_v59  ;;  %v1528_v53 = vmax.f32 %v1448_v44, 0.0  ;;  %v1365_v44 = vld [vmem:[#allocation2 + $0x1d0] sm:$0xff] }
 0x21f   : > { %2920 = vmatprep.mubr.bf16.mxu1 %v1576_v59  ;;  %4027 = vmatpush3.bf16.msra.mxu0 %v4651_v57  ;;  %v1350_v57 = vld [vmem:[#allocation2 + $0x158] sm:$0xff]  ;;  %v4671_v59 = vld [vmem:[%s5806_s5 + $0x28] sm:$0xff]  }
 0x220   : > { %4103 = vmatpush3.bf16.msra.mxu1 %v4653_v58  ;;  %4028 = vmatprep.subr.bf16.mxu0 %v4654_v62  ;;  %v1354_v58 = vld [vmem:[#allocation2 + $0x178] sm:$0xff]  ;;  %v4676_v62 = vld [vmem:[%s5806_s5 + $0xf0] sm:$0xff]   ;;  %v1588_v2 = vpack.c.bf16 %v1528_v53, %v1524_v52  ;;  %v1452_v3 = vadd.f32 %v5490_v15, %v1350_v57 }
 0x221   : > { %4104 = vmatprep.subr.bf16.mxu1 %v4656_v63  ;;  %v1583_v63 = vpack.c.bf16 %v1519_v51, %v1515_v50  ;;  %v1456_v4 = vadd.f32 %v5490_v15, %v1354_v58  ;;  %v1467_v50 = vadd.f32 %v5506_v30, %v1365_v44 }
 0x223   : > { %4029 = vmatpush3.bf16.msra.mxu0 %v4655_v8  ;;  %v1527_v8 = vmax.f32 %v1447_v1, 0.0  ;;  %v1547_v56 = vmax.f32 %v1467_v50, 0.0 }
 0x224   : > { %4105 = vmatpush3.bf16.msra.mxu1 %v4657_v9  ;;  %4030 = vmatprep.subr.bf16.mxu0 %v4658_v10  ;;  %v1532_v9 = vmax.f32 %v1452_v3, 0.0  ;;  %v1536_v10 = vmax.f32 %v1456_v4, 0.0 }
 0x225   : > { %4106 = vmatprep.subr.bf16.mxu1 %v4660_v11  ;;  %2655 = vmatmul.mubr.bf16.gmra.mrb[4].mxu0 %v1575_v38  ;;  %v1349_v11 = vld [vmem:[#allocation2 + $0x150] sm:$0xff] }
 0x226   : > { %2921 = vmatmul.mubr.bf16.gmra.mrb[4].mxu1 %v1575_v38  ;;  %2664 = vmatprep.mubr.bf16.mxu0 %v1580_v14  ;;  %v1353_v38 = vld [vmem:[#allocation2 + $0x170] sm:$0xff]  ;;  %v1451_v16 = vadd.f32 %v5506_v30, %v1349_v11 }
 0x227   : > { %2930 = vmatprep.mubr.bf16.mxu1 %v1580_v14  ;;  %4031 = vmatpush3.bf16.msra.mxu0 %v4659_v19  ;;  %v1587_v14 = vpack.c.bf16 %v1527_v8, %v1523_v7  ;;  %v1455_v18 = vadd.f32 %v5506_v30, %v1353_v38  ;;  %v1592_v19 = vpack.c.bf16 %v1536_v10, %v1532_v9  ;;  %v1381_v10 = vld [vmem:[#allocation2 + $0x250] sm:$0xff] }
 0x228   : > { %4107 = vmatpush3.bf16.msra.mxu1 %v4661_v20  ;;  %4032 = vmatprep.subr.bf16.mxu0 %v4662_v21  ;;  %v1460_v20 = vadd.f32 %v5490_v15, %v1358_v12  ;;  %v1464_v21 = vadd.f32 %v5490_v15, %v1362_v13  ;;  %v1385_v11 = vld [vmem:[#allocation2 + $0x270] sm:$0xff]  ;;  %v1483_v12 = vadd.f32 %v5506_v30, %v1381_v10 }
 0x229   : > { %4108 = vmatprep.subr.bf16.mxu1 %v4664_v22  ;;  %v1531_v22 = vmax.f32 %v1451_v16, 0.0  ;;  %v1535_v23 = vmax.f32 %v1455_v18, 0.0  ;;  %v1487_v13 = vadd.f32 %v5506_v30, %v1385_v11 }
 0x22a   : > { %v1540_v24 = vmax.f32 %v1460_v20, 0.0  ;;  %v1544_v25 = vmax.f32 %v1464_v21, 0.0  ;;  %v1563_v16 = vmax.f32 %v1483_v12, 0.0  ;;  %v4680_v20 = vld [vmem:[%s5806_s5 + $0xf8] sm:$0xff]  }
 0x22b   : > { %4033 = vmatpush3.bf16.msra.mxu0 %v4663_v33  ;;  %v1591_v32 = vpack.c.bf16 %v1535_v23, %v1531_v22  ;;  %v1459_v33 = vadd.f32 %v5506_v30, %v1357_v27  ;;  %v4681_v21 = vld [vmem:[%s5806_s5 + $0xb8] sm:$0xff]   ;;  %v1817_v22 = vld [vmem:[%s5805_s4] sm:$0xf] }
 0x22c   : > { %4109 = vmatpush3.bf16.msra.mxu1 %v4665_v34  ;;  %4034 = vmatprep.subr.bf16.mxu0 %v4666_v35  ;;  %v1463_v34 = vadd.f32 %v5506_v30, %v1361_v28  ;;  %v1596_v35 = vpack.c.bf16 %v1544_v25, %v1540_v24  ;;  %v5641_v23 = vrot.slane %v1817_v22, %v1391_v43 }
 0x22d   : > { %4110 = vmatprep.subr.bf16.mxu1 %v4668_v37  ;;  %2665 = vmatmul.mubr.bf16.gmra.mrb[8].mxu0 %v1579_v39  ;;  %v1468_v37 = vadd.f32 %v5490_v15, %v1366_v29  ;;  %v1539_v40 = vmax.f32 %v1459_v33, 0.0  ;;  %v5645_v24 = vrot.slane %v1817_v22, %v1399_v17  ;;  %v5649_v25 = vrot.slane %v1817_v22, %v1395_v31 }
 0x22e   : > { %2931 = vmatmul.mubr.bf16.gmra.mrb[8].mxu1 %v1579_v39  ;;  %2674 = vmatprep.mubr.bf16.mxu0 %v1584_v42  ;;  %v1472_v39 = vadd.f32 %v5490_v15, %v1370_v54  ;;  %v1543_v41 = vmax.f32 %v1463_v34, 0.0  ;;  %v5653_v27 = vrot.slane %v1817_v22, %v1403_v46 }
 0x22f   : > { %2940 = vmatprep.mubr.bf16.mxu1 %v1584_v42  ;;  %4035 = vmatpush3.bf16.msra.mxu0 %v4667_v45  ;;  %v1548_v42 = vmax.f32 %v1468_v37, 0.0  ;;  %v1369_v45 = vld [vmem:[#allocation2 + $0x1f0] sm:$0xff] }
 0x230   : > { %4111 = vmatpush3.bf16.msra.mxu1 %v4669_v47  ;;  %4036 = vmatprep.subr.bf16.mxu0 %v4670_v48  ;;  %v1552_v36 = vmax.f32 %v1472_v39, 0.0  ;;  %v1374_v47 = vld [vmem:[#allocation2 + $0x218] sm:$0xff]  ;;  %v1471_v51 = vadd.f32 %v5506_v30, %v1369_v45 }
 0x231   : > { %4112 = vmatprep.subr.bf16.mxu1 %v4672_v49  ;;  %v1378_v48 = vld [vmem:[#allocation2 + $0x238] sm:$0xff]  ;;  %v1595_v49 = vpack.c.bf16 %v1543_v41, %v1539_v40  ;;  %v1476_v53 = vadd.f32 %v5490_v15, %v1374_v47 }
 0x232   : > { %v1600_v52 = vpack.c.bf16 %v1552_v36, %v1548_v42  ;;  %v1480_v55 = vadd.f32 %v5490_v15, %v1378_v48  ;;  %v1551_v57 = vmax.f32 %v1471_v51, 0.0 }
 0x233   : > { %4037 = vmatpush3.bf16.msra.mxu0 %v4671_v59  ;;  %v1556_v58 = vmax.f32 %v1476_v53, 0.0 }
 0x234   : > { %4113 = vmatpush3.bf16.msra.mxu1 %v4673_v60  ;;  %4038 = vmatprep.subr.bf16.mxu0 %v4674_v61  ;;  %v1560_v59 = vmax.f32 %v1480_v55, 0.0  ;;  %v1373_v60 = vld [vmem:[#allocation2 + $0x210] sm:$0xff]  ;;  %v1599_v0 = vpack.c.bf16 %v1551_v57, %v1547_v56 }
 0x235   : > { %4114 = vmatprep.subr.bf16.mxu1 %v4676_v62  ;;  %2675 = vmatmul.mubr.bf16.gmra.mrb[12].mxu0 %v1583_v63  ;;  %v1377_v61 = vld [vmem:[#allocation2 + $0x230] sm:$0xff]  ;;  %v1382_v62 = vld [vmem:[#allocation2 + $0x258] sm:$0xff]  ;;  %v1475_v1 = vadd.f32 %v5506_v30, %v1373_v60 }
 0x236   : > { %2941 = vmatmul.mubr.bf16.gmra.mrb[12].mxu1 %v1583_v63  ;;  %2684 = vmatprep.mubr.bf16.mxu0 %v1588_v2  ;;  %v1386_v63 = vld [vmem:[#allocation2 + $0x278] sm:$0xff]  ;;  %v1604_v3 = vpack.c.bf16 %v1560_v59, %v1556_v58  ;;  %v1484_v4 = vadd.f32 %v5490_v15, %v1382_v62 }
 0x237   : > { %2950 = vmatprep.mubr.bf16.mxu1 %v1588_v2  ;;  %4039 = vmatpush3.bf16.msra.mxu0 %v4675_v5  ;;  %v1479_v2 = vadd.f32 %v5506_v30, %v1377_v61  ;;  %v1488_v5 = vadd.f32 %v5490_v15, %v1386_v63  ;;  %v1567_v15 = vmax.f32 %v1487_v13, 0.0  ;;  %v4679_v30 = vld [vmem:[%s5806_s5 + $0x38] sm:$0xff]  }
 0x238   : > { %4115 = vmatpush3.bf16.msra.mxu1 %v4677_v6  ;;  %v1555_v6 = vmax.f32 %v1475_v1, 0.0  ;;  %v1564_v8 = vmax.f32 %v1484_v4, 0.0 }
 0x239   : > { %v1559_v7 = vmax.f32 %v1479_v2, 0.0  ;;  %v1568_v9 = vmax.f32 %v1488_v5, 0.0  ;;  %v1607_v18 = vpack.c.bf16 %v1567_v15, %v1563_v16  ;;  %4116 = vmatprep.subr.bf16.mxu1 %v4680_v20 }
 0x23b   : > { %v1603_v38 = vpack.c.bf16 %v1559_v7, %v1555_v6 }
 0x23c   : > { %4117 = vmatpush3.bf16.msra.mxu1 %v4681_v21 }
 0x23d   : > { %2685 = vmatmul.mubr.bf16.gmra.mrb[16].mxu0 %v1587_v14 }
 0x23e   : > { %2951 = vmatmul.mubr.bf16.gmra.mrb[16].mxu1 %v1587_v14  ;;  %2694 = vmatprep.mubr.bf16.mxu0 %v1592_v19  ;;  %v1608_v14 = vpack.c.bf16 %v1568_v9, %v1564_v8 }
 0x23f   : > { %2960 = vmatprep.mubr.bf16.mxu1 %v1592_v19  ;;  %v4678_v19 = vld [vmem:[%s5806_s5 + $0x78] sm:$0xff]  }
 0x240   : > { %4040 = vmatprep.subr.bf16.mxu0 %v4678_v19 }
 0x241   : > { %4041 = vmatpush3.bf16.msra.mxu0 %v4679_v30 }
 0x245   : > { %2695 = vmatmul.mubr.bf16.gmra.mrb[20].mxu0 %v1591_v32 }
 0x246   : > { %2961 = vmatmul.mubr.bf16.gmra.mrb[20].mxu1 %v1591_v32  ;;  %2704 = vmatprep.mubr.bf16.mxu0 %v1596_v35 }
 0x247   : > { %2970 = vmatprep.mubr.bf16.mxu1 %v1596_v35 }
 0x24d   : > { %2705 = vmatmul.mubr.bf16.gmra.mrb[24].mxu0 %v1595_v49 }
 0x24e   : > { %2971 = vmatmul.mubr.bf16.gmra.mrb[24].mxu1 %v1595_v49  ;;  %2714 = vmatprep.mubr.bf16.mxu0 %v1600_v52 }
 0x24f   : > { %2980 = vmatprep.mubr.bf16.mxu1 %v1600_v52 }
 0x255   : > { %2715 = vmatmul.mubr.bf16.gmra.mrb[28].mxu0 %v1599_v0 }
 0x256   : > { %2981 = vmatmul.mubr.bf16.gmra.mrb[28].mxu1 %v1599_v0  ;;  %2724 = vmatprep.mubr.bf16.mxu0 %v1604_v3 }
 0x257   : > { %2990 = vmatprep.mubr.bf16.mxu1 %v1604_v3 }
 0x25d   : > { %2725 = vmatmul.mubr.bf16.gmra.mrb[32].mxu0 %v1603_v38 }
 0x25e   : > { %2991 = vmatmul.mubr.bf16.gmra.mrb[32].mxu1 %v1603_v38  ;;  %2734 = vmatprep.mubr.bf16.mxu0 %v1608_v14 }
 0x25f   : > { %3000 = vmatprep.mubr.bf16.mxu1 %v1608_v14 }
 0x265   : > { %2735 = vmatmul.mubr.bf16.gmra.mrb[36].mxu0 %v1607_v18 }
 0x266   : > { %3001 = vmatmul.mubr.bf16.gmra.mrb[36].mxu1 %v1607_v18 }
 0x2f0   : > { %v2646_v28 = vpop.f32.mrb[0].mxu0 }
 0x2f1   : > { %v2912_v29 = vpop.f32.mrb[0].mxu1  ;;  %v4178_v54 = vadd.f32 %v2646_v28, %v5641_v23  ;;  %v2648_v43 = vpop.f32.mrb[1].mxu0 }
 0x2f2   : > { %v4218_v32 = vadd.f32 %v2912_v29, %v5645_v24  ;;  %v2914_v33 = vpop.f32.mrb[1].mxu1  ;;  %v4179_v34 = vadd.f32 %v2648_v43, %v5649_v25  ;;  %v2650_v35 = vpop.f32.mrb[2].mxu0 }
 0x2f3   : > { %v4219_v17 = vadd.f32 %v2914_v33, %v5653_v27  ;;  %v2916_v37 = vpop.f32.mrb[2].mxu1  ;;  %v4180_v31 = vadd.f32 %v2650_v35, %v5641_v23  ;;  %v2652_v46 = vpop.f32.mrb[3].mxu0  ;;  %v3011_v42 = vmax.f32 %v4178_v54, 0.0 }
 0x2f4   : > { %v4220_v26 = vadd.f32 %v2916_v37, %v5645_v24  ;;  %v2918_v39 = vpop.f32.mrb[3].mxu1  ;;  %v4181_v40 = vadd.f32 %v2652_v46, %v5649_v25  ;;  %v3013_v36 = vmax.f32 %v4218_v32, 0.0  ;;  %v3012_v47 = vmax.f32 %v4179_v34, 0.0 }
 0x2f5   : > { %v4221_v41 = vadd.f32 %v2918_v39, %v5653_v27  ;;  %v3015_v44 = vmax.f32 %v4180_v31, 0.0  ;;  %v3014_v48 = vmax.f32 %v4219_v17, 0.0 }
 0x2f6   : > { %v3017_v45 = vmax.f32 %v4220_v26, 0.0  ;;  %v3016_v49 = vmax.f32 %v4181_v40, 0.0 }
 0x2f7   : > { %v3018_v50 = vmax.f32 %v4221_v41, 0.0  ;;  %v3091_v51 = vpack.c.bf16 %v3015_v44, %v3011_v42 }
 0x2f8   : > { %v3093_v52 = vpack.c.bf16 %v3017_v45, %v3013_v36  ;;  %v3092_v53 = vpack.c.bf16 %v3016_v49, %v3012_v47  ;;  %v2656_v56 = vpop.f32.mrb[4].mxu0 }
 0x2f9   : > { %v3094_v55 = vpack.c.bf16 %v3018_v50, %v3014_v48  ;;  %v2922_v57 = vpop.f32.mrb[4].mxu1  ;;  %v4182_v58 = vadd.f32 %v2656_v56, %v5641_v23  ;;  %v2658_v60 = vpop.f32.mrb[5].mxu0 }
 0x2fa   : > { %v4222_v59 = vadd.f32 %v2922_v57, %v5645_v24  ;;  %v2924_v61 = vpop.f32.mrb[5].mxu1  ;;  %v4183_v62 = vadd.f32 %v2658_v60, %v5649_v25  ;;  %v2660_v0 = vpop.f32.mrb[6].mxu0  ;;  %3506 = vmatprep.mubr.bf16.mxu0 %v3092_v53 }
 0x2fb   : > { %v4223_v63 = vadd.f32 %v2924_v61, %v5653_v27  ;;  %v2926_v1 = vpop.f32.mrb[6].mxu1  ;;  %3619 = vmatprep.mubr.bf16.mxu1 %v3094_v55  ;;  %v4184_v2 = vadd.f32 %v2660_v0, %v5641_v23  ;;  %v2662_v4 = vpop.f32.mrb[7].mxu0  ;;  %3507 = vmatmul.mubr.bf16.vlgmr.msra.gmra.mrb[40].mxu0 %v3091_v51  ;;  %v3019_v8 = vmax.f32 %v4182_v58, 0.0 }
 0x2fc   : > { %v4224_v3 = vadd.f32 %v2926_v1, %v5645_v24  ;;  %v2928_v5 = vpop.f32.mrb[7].mxu1  ;;  %3620 = vmatmul.mubr.bf16.vlgmr.msra.gmra.mrb[40].mxu1 %v3093_v52  ;;  %v4185_v6 = vadd.f32 %v2662_v4, %v5649_v25  ;;  %v3021_v9 = vmax.f32 %v4222_v59, 0.0  ;;  %v3020_v38 = vmax.f32 %v4183_v62, 0.0 }
 0x2fd   : > { %v4225_v7 = vadd.f32 %v2928_v5, %v5653_v27  ;;  %v3023_v10 = vmax.f32 %v4184_v2, 0.0  ;;  %v3022_v12 = vmax.f32 %v4223_v63, 0.0 }
 0x2fe   : > { %v3025_v11 = vmax.f32 %v4224_v3, 0.0  ;;  %v3024_v13 = vmax.f32 %v4185_v6, 0.0 }
 0x2ff   : > { %v3026_v14 = vmax.f32 %v4225_v7, 0.0  ;;  %v3095_v16 = vpack.c.bf16 %v3023_v10, %v3019_v8 }
 0x300   : > { %v3097_v15 = vpack.c.bf16 %v3025_v11, %v3021_v9  ;;  %v3096_v18 = vpack.c.bf16 %v3024_v13, %v3020_v38  ;;  %v2666_v20 = vpop.f32.mrb[8].mxu0 }
 0x301   : > { %v3098_v19 = vpack.c.bf16 %v3026_v14, %v3022_v12  ;;  %v2932_v30 = vpop.f32.mrb[8].mxu1  ;;  %v4186_v21 = vadd.f32 %v2666_v20, %v5641_v23  ;;  %v2668_v28 = vpop.f32.mrb[9].mxu0 }
 0x302   : > { %v4226_v22 = vadd.f32 %v2932_v30, %v5645_v24  ;;  %v2934_v29 = vpop.f32.mrb[9].mxu1  ;;  %v4187_v54 = vadd.f32 %v2668_v28, %v5649_v25  ;;  %v2670_v43 = vpop.f32.mrb[10].mxu0  ;;  %3514 = vmatprep.mubr.bf16.mxu0 %v3096_v18 }
 0x303   : > { %v4227_v32 = vadd.f32 %v2934_v29, %v5653_v27  ;;  %v2936_v33 = vpop.f32.mrb[10].mxu1  ;;  %3627 = vmatprep.mubr.bf16.mxu1 %v3098_v19  ;;  %v4188_v34 = vadd.f32 %v2670_v43, %v5641_v23  ;;  %v2672_v35 = vpop.f32.mrb[11].mxu0  ;;  %3515 = vmatmul.mubr.bf16.gmra.mrb[44].mxu0 %v3095_v16  ;;  %v3027_v46 = vmax.f32 %v4186_v21, 0.0 }
 0x304   : > { %v4228_v17 = vadd.f32 %v2936_v33, %v5645_v24  ;;  %v2938_v37 = vpop.f32.mrb[11].mxu1  ;;  %3628 = vmatmul.mubr.bf16.gmra.mrb[44].mxu1 %v3097_v15  ;;  %v4189_v31 = vadd.f32 %v2672_v35, %v5649_v25  ;;  %v3029_v39 = vmax.f32 %v4226_v22, 0.0  ;;  %v3028_v42 = vmax.f32 %v4187_v54, 0.0 }
 0x305   : > { %v4229_v26 = vadd.f32 %v2938_v37, %v5653_v27  ;;  %v3031_v40 = vmax.f32 %v4188_v34, 0.0  ;;  %v3030_v36 = vmax.f32 %v4227_v32, 0.0 }
 0x306   : > { %v3033_v41 = vmax.f32 %v4228_v17, 0.0  ;;  %v3032_v44 = vmax.f32 %v4189_v31, 0.0 }
 0x307   : > { %v3034_v45 = vmax.f32 %v4229_v26, 0.0  ;;  %v3099_v47 = vpack.c.bf16 %v3031_v40, %v3027_v46 }
 0x308   : > { %v3101_v48 = vpack.c.bf16 %v3033_v41, %v3029_v39  ;;  %v3100_v49 = vpack.c.bf16 %v3032_v44, %v3028_v42  ;;  %v2676_v51 = vpop.f32.mrb[12].mxu0 }
 0x309   : > { %v3102_v50 = vpack.c.bf16 %v3034_v45, %v3030_v36  ;;  %v2942_v52 = vpop.f32.mrb[12].mxu1  ;;  %v4190_v53 = vadd.f32 %v2676_v51, %v5641_v23  ;;  %v2678_v56 = vpop.f32.mrb[13].mxu0 }
 0x30a   : > { %v4230_v55 = vadd.f32 %v2942_v52, %v5645_v24  ;;  %v2944_v57 = vpop.f32.mrb[13].mxu1  ;;  %v4191_v58 = vadd.f32 %v2678_v56, %v5649_v25  ;;  %v2680_v60 = vpop.f32.mrb[14].mxu0  ;;  %3522 = vmatprep.mubr.bf16.mxu0 %v3100_v49 }
 0x30b   : > { %v4231_v59 = vadd.f32 %v2944_v57, %v5653_v27  ;;  %v2946_v61 = vpop.f32.mrb[14].mxu1  ;;  %3635 = vmatprep.mubr.bf16.mxu1 %v3102_v50  ;;  %v4192_v62 = vadd.f32 %v2680_v60, %v5641_v23  ;;  %v2682_v0 = vpop.f32.mrb[15].mxu0  ;;  %3523 = vmatmul.mubr.bf16.gmra.mrb[48].mxu0 %v3099_v47  ;;  %v3035_v4 = vmax.f32 %v4190_v53, 0.0 }
 0x30c   : > { %v4232_v63 = vadd.f32 %v2946_v61, %v5645_v24  ;;  %v2948_v1 = vpop.f32.mrb[15].mxu1  ;;  %3636 = vmatmul.mubr.bf16.gmra.mrb[48].mxu1 %v3101_v48  ;;  %v4193_v2 = vadd.f32 %v2682_v0, %v5649_v25  ;;  %v3037_v5 = vmax.f32 %v4230_v55, 0.0  ;;  %v3036_v8 = vmax.f32 %v4191_v58, 0.0 }
 0x30d   : > { %v4233_v3 = vadd.f32 %v2948_v1, %v5653_v27  ;;  %v3039_v6 = vmax.f32 %v4192_v62, 0.0  ;;  %v3038_v9 = vmax.f32 %v4231_v59, 0.0 }
 0x30e   : > { %v3041_v7 = vmax.f32 %v4232_v63, 0.0  ;;  %v3040_v10 = vmax.f32 %v4193_v2, 0.0 }
 0x30f   : > { %v3042_v11 = vmax.f32 %v4233_v3, 0.0  ;;  %v3103_v38 = vpack.c.bf16 %v3039_v6, %v3035_v4 }
 0x310   : > { %v3105_v12 = vpack.c.bf16 %v3041_v7, %v3037_v5  ;;  %v3104_v13 = vpack.c.bf16 %v3040_v10, %v3036_v8  ;;  %v2686_v16 = vpop.f32.mrb[16].mxu0 }
 0x311   : > { %v3106_v14 = vpack.c.bf16 %v3042_v11, %v3038_v9  ;;  %v2952_v15 = vpop.f32.mrb[16].mxu1  ;;  %v4194_v18 = vadd.f32 %v2686_v16, %v5641_v23  ;;  %v2688_v20 = vpop.f32.mrb[17].mxu0 }
 0x312   : > { %v4234_v19 = vadd.f32 %v2952_v15, %v5645_v24  ;;  %v2954_v30 = vpop.f32.mrb[17].mxu1  ;;  %v4195_v21 = vadd.f32 %v2688_v20, %v5649_v25  ;;  %v2690_v28 = vpop.f32.mrb[18].mxu0  ;;  %3530 = vmatprep.mubr.bf16.mxu0 %v3104_v13 }
 0x313   : > { %v4235_v22 = vadd.f32 %v2954_v30, %v5653_v27  ;;  %v2956_v29 = vpop.f32.mrb[18].mxu1  ;;  %3643 = vmatprep.mubr.bf16.mxu1 %v3106_v14  ;;  %v4196_v54 = vadd.f32 %v2690_v28, %v5641_v23  ;;  %v2692_v43 = vpop.f32.mrb[19].mxu0  ;;  %3531 = vmatmul.mubr.bf16.gmra.mrb[52].mxu0 %v3103_v38  ;;  %v3043_v35 = vmax.f32 %v4194_v18, 0.0 }
 0x314   : > { %v4236_v32 = vadd.f32 %v2956_v29, %v5645_v24  ;;  %v2958_v33 = vpop.f32.mrb[19].mxu1  ;;  %3644 = vmatmul.mubr.bf16.gmra.mrb[52].mxu1 %v3105_v12  ;;  %v4197_v34 = vadd.f32 %v2692_v43, %v5649_v25  ;;  %v3045_v37 = vmax.f32 %v4234_v19, 0.0  ;;  %v3044_v46 = vmax.f32 %v4195_v21, 0.0 }
 0x315   : > { %v4237_v17 = vadd.f32 %v2958_v33, %v5653_v27  ;;  %v3047_v31 = vmax.f32 %v4196_v54, 0.0  ;;  %v3046_v39 = vmax.f32 %v4235_v22, 0.0 }
 0x316   : > { %v3049_v26 = vmax.f32 %v4236_v32, 0.0  ;;  %v3048_v40 = vmax.f32 %v4197_v34, 0.0 }
 0x317   : > { %v3050_v41 = vmax.f32 %v4237_v17, 0.0  ;;  %v3107_v42 = vpack.c.bf16 %v3047_v31, %v3043_v35 }
 0x318   : > { %v3109_v36 = vpack.c.bf16 %v3049_v26, %v3045_v37  ;;  %v3108_v44 = vpack.c.bf16 %v3048_v40, %v3044_v46  ;;  %v2696_v47 = vpop.f32.mrb[20].mxu0 }
 0x319   : > { %v3110_v45 = vpack.c.bf16 %v3050_v41, %v3046_v39  ;;  %v2962_v48 = vpop.f32.mrb[20].mxu1  ;;  %v4198_v49 = vadd.f32 %v2696_v47, %v5641_v23  ;;  %v2698_v51 = vpop.f32.mrb[21].mxu0 }
 0x31a   : > { %v4238_v50 = vadd.f32 %v2962_v48, %v5645_v24  ;;  %v2964_v52 = vpop.f32.mrb[21].mxu1  ;;  %v4199_v53 = vadd.f32 %v2698_v51, %v5649_v25  ;;  %v2700_v56 = vpop.f32.mrb[22].mxu0  ;;  %3538 = vmatprep.mubr.bf16.mxu0 %v3108_v44 }
 0x31b   : > { %v4239_v55 = vadd.f32 %v2964_v52, %v5653_v27  ;;  %v2966_v57 = vpop.f32.mrb[22].mxu1  ;;  %3651 = vmatprep.mubr.bf16.mxu1 %v3110_v45  ;;  %v4200_v58 = vadd.f32 %v2700_v56, %v5641_v23  ;;  %v2702_v60 = vpop.f32.mrb[23].mxu0  ;;  %3539 = vmatmul.mubr.bf16.gmra.mrb[56].mxu0 %v3107_v42  ;;  %v3051_v0 = vmax.f32 %v4198_v49, 0.0 }
 0x31c   : > { %v4240_v59 = vadd.f32 %v2966_v57, %v5645_v24  ;;  %v2968_v61 = vpop.f32.mrb[23].mxu1  ;;  %3652 = vmatmul.mubr.bf16.gmra.mrb[56].mxu1 %v3109_v36  ;;  %v4201_v62 = vadd.f32 %v2702_v60, %v5649_v25  ;;  %v3053_v1 = vmax.f32 %v4238_v50, 0.0  ;;  %v3052_v4 = vmax.f32 %v4199_v53, 0.0 }
 0x31d   : > { %v4241_v63 = vadd.f32 %v2968_v61, %v5653_v27  ;;  %v3055_v2 = vmax.f32 %v4200_v58, 0.0  ;;  %v3054_v5 = vmax.f32 %v4239_v55, 0.0 }
 0x31e   : > { %v3057_v3 = vmax.f32 %v4240_v59, 0.0  ;;  %v3056_v6 = vmax.f32 %v4201_v62, 0.0 }
 0x31f   : > { %v3058_v7 = vmax.f32 %v4241_v63, 0.0  ;;  %v3111_v8 = vpack.c.bf16 %v3055_v2, %v3051_v0 }
 0x320   : > { %v3113_v9 = vpack.c.bf16 %v3057_v3, %v3053_v1  ;;  %v3112_v10 = vpack.c.bf16 %v3056_v6, %v3052_v4  ;;  %v2706_v38 = vpop.f32.mrb[24].mxu0 }
 0x321   : > { %v3114_v11 = vpack.c.bf16 %v3058_v7, %v3054_v5  ;;  %v2972_v12 = vpop.f32.mrb[24].mxu1  ;;  %v4202_v13 = vadd.f32 %v2706_v38, %v5641_v23  ;;  %v2708_v16 = vpop.f32.mrb[25].mxu0 }
 0x322   : > { %v4242_v14 = vadd.f32 %v2972_v12, %v5645_v24  ;;  %v2974_v15 = vpop.f32.mrb[25].mxu1  ;;  %v4203_v18 = vadd.f32 %v2708_v16, %v5649_v25  ;;  %v2710_v20 = vpop.f32.mrb[26].mxu0  ;;  %3546 = vmatprep.mubr.bf16.mxu0 %v3112_v10 }
 0x323   : > { %v4243_v19 = vadd.f32 %v2974_v15, %v5653_v27  ;;  %v2976_v30 = vpop.f32.mrb[26].mxu1  ;;  %3659 = vmatprep.mubr.bf16.mxu1 %v3114_v11  ;;  %v4204_v21 = vadd.f32 %v2710_v20, %v5641_v23  ;;  %v2712_v28 = vpop.f32.mrb[27].mxu0  ;;  %3547 = vmatmul.mubr.bf16.gmra.mrb[60].mxu0 %v3111_v8  ;;  %v3059_v43 = vmax.f32 %v4202_v13, 0.0 }
 0x324   : > { %v4244_v22 = vadd.f32 %v2976_v30, %v5645_v24  ;;  %v2978_v29 = vpop.f32.mrb[27].mxu1  ;;  %3660 = vmatmul.mubr.bf16.gmra.mrb[60].mxu1 %v3113_v9  ;;  %v4205_v54 = vadd.f32 %v2712_v28, %v5649_v25  ;;  %v3061_v33 = vmax.f32 %v4242_v14, 0.0  ;;  %v3060_v35 = vmax.f32 %v4203_v18, 0.0 }
 0x325   : > { %v4245_v32 = vadd.f32 %v2978_v29, %v5653_v27  ;;  %v3063_v34 = vmax.f32 %v4204_v21, 0.0  ;;  %v3062_v37 = vmax.f32 %v4243_v19, 0.0 }
 0x326   : > { %v3065_v17 = vmax.f32 %v4244_v22, 0.0  ;;  %v3064_v31 = vmax.f32 %v4205_v54, 0.0 }
 0x327   : > { %v3066_v26 = vmax.f32 %v4245_v32, 0.0  ;;  %v3115_v46 = vpack.c.bf16 %v3063_v34, %v3059_v43 }
 0x328   : > { %v3117_v39 = vpack.c.bf16 %v3065_v17, %v3061_v33  ;;  %v3116_v40 = vpack.c.bf16 %v3064_v31, %v3060_v35  ;;  %v2716_v42 = vpop.f32.mrb[28].mxu0 }
 0x329   : > { %v3118_v41 = vpack.c.bf16 %v3066_v26, %v3062_v37  ;;  %v2982_v36 = vpop.f32.mrb[28].mxu1  ;;  %v4206_v44 = vadd.f32 %v2716_v42, %v5641_v23  ;;  %v2718_v47 = vpop.f32.mrb[29].mxu0 }
 0x32a   : > { %v4246_v45 = vadd.f32 %v2982_v36, %v5645_v24  ;;  %v2984_v48 = vpop.f32.mrb[29].mxu1  ;;  %v4207_v49 = vadd.f32 %v2718_v47, %v5649_v25  ;;  %v2720_v51 = vpop.f32.mrb[30].mxu0  ;;  %3554 = vmatprep.mubr.bf16.mxu0 %v3116_v40 }
 0x32b   : > { %v4247_v50 = vadd.f32 %v2984_v48, %v5653_v27  ;;  %v2986_v52 = vpop.f32.mrb[30].mxu1  ;;  %3667 = vmatprep.mubr.bf16.mxu1 %v3118_v41  ;;  %v4208_v53 = vadd.f32 %v2720_v51, %v5641_v23  ;;  %v2722_v56 = vpop.f32.mrb[31].mxu0  ;;  %3555 = vmatmul.mubr.bf16.gmra.mrb[64].mxu0 %v3115_v46  ;;  %v3067_v60 = vmax.f32 %v4206_v44, 0.0 }
 0x32c   : > { %v4248_v55 = vadd.f32 %v2986_v52, %v5645_v24  ;;  %v2988_v57 = vpop.f32.mrb[31].mxu1  ;;  %3668 = vmatmul.mubr.bf16.gmra.mrb[64].mxu1 %v3117_v39  ;;  %v4209_v58 = vadd.f32 %v2722_v56, %v5649_v25  ;;  %v3069_v61 = vmax.f32 %v4246_v45, 0.0  ;;  %v3068_v0 = vmax.f32 %v4207_v49, 0.0 }
 0x32d   : > { %v4249_v59 = vadd.f32 %v2988_v57, %v5653_v27  ;;  %v3071_v62 = vmax.f32 %v4208_v53, 0.0  ;;  %v3070_v1 = vmax.f32 %v4247_v50, 0.0 }
 0x32e   : > { %v3073_v63 = vmax.f32 %v4248_v55, 0.0  ;;  %v3072_v2 = vmax.f32 %v4209_v58, 0.0 }
 0x32f   : > { %v3074_v3 = vmax.f32 %v4249_v59, 0.0  ;;  %v3119_v4 = vpack.c.bf16 %v3071_v62, %v3067_v60 }
 0x330   : > { %v3121_v5 = vpack.c.bf16 %v3073_v63, %v3069_v61  ;;  %v3120_v6 = vpack.c.bf16 %v3072_v2, %v3068_v0  ;;  %v2726_v8 = vpop.f32.mrb[32].mxu0 }
 0x331   : > { %v3122_v7 = vpack.c.bf16 %v3074_v3, %v3070_v1  ;;  %v2992_v9 = vpop.f32.mrb[32].mxu1  ;;  %v4210_v10 = vadd.f32 %v2726_v8, %v5641_v23  ;;  %v2728_v38 = vpop.f32.mrb[33].mxu0 }
 0x332   : > { %v4250_v11 = vadd.f32 %v2992_v9, %v5645_v24  ;;  %v2994_v12 = vpop.f32.mrb[33].mxu1  ;;  %v4211_v13 = vadd.f32 %v2728_v38, %v5649_v25  ;;  %v2730_v16 = vpop.f32.mrb[34].mxu0  ;;  %3562 = vmatprep.mubr.bf16.mxu0 %v3120_v6 }
 0x333   : > { %v4251_v14 = vadd.f32 %v2994_v12, %v5653_v27  ;;  %v2996_v15 = vpop.f32.mrb[34].mxu1  ;;  %3675 = vmatprep.mubr.bf16.mxu1 %v3122_v7  ;;  %v4212_v18 = vadd.f32 %v2730_v16, %v5641_v23  ;;  %v2732_v20 = vpop.f32.mrb[35].mxu0  ;;  %3563 = vmatmul.mubr.bf16.gmra.mrb[68].mxu0 %v3119_v4  ;;  %v3075_v28 = vmax.f32 %v4210_v10, 0.0 }
 0x334   : > { %v4252_v19 = vadd.f32 %v2996_v15, %v5645_v24  ;;  %v2998_v30 = vpop.f32.mrb[35].mxu1  ;;  %3676 = vmatmul.mubr.bf16.gmra.mrb[68].mxu1 %v3121_v5  ;;  %v4213_v21 = vadd.f32 %v2732_v20, %v5649_v25  ;;  %v3077_v29 = vmax.f32 %v4250_v11, 0.0  ;;  %v3076_v43 = vmax.f32 %v4211_v13, 0.0 }
 0x335   : > { %v4253_v22 = vadd.f32 %v2998_v30, %v5653_v27  ;;  %v3079_v54 = vmax.f32 %v4212_v18, 0.0  ;;  %v3078_v33 = vmax.f32 %v4251_v14, 0.0 }
 0x336   : > { %v3081_v32 = vmax.f32 %v4252_v19, 0.0  ;;  %v3080_v34 = vmax.f32 %v4213_v21, 0.0 }
 0x337   : > { %v3082_v17 = vmax.f32 %v4253_v22, 0.0  ;;  %v3123_v35 = vpack.c.bf16 %v3079_v54, %v3075_v28 }
 0x338   : > { %v3125_v37 = vpack.c.bf16 %v3081_v32, %v3077_v29  ;;  %v3124_v31 = vpack.c.bf16 %v3080_v34, %v3076_v43  ;;  %v2736_v46 = vpop.f32.mrb[36].mxu0 }
 0x339   : > { %v3126_v26 = vpack.c.bf16 %v3082_v17, %v3078_v33  ;;  %v3002_v39 = vpop.f32.mrb[36].mxu1  ;;  %v4214_v40 = vadd.f32 %v2736_v46, %v5641_v23  ;;  %v2738_v42 = vpop.f32.mrb[37].mxu0 }
 0x33a   : > { %v4254_v41 = vadd.f32 %v3002_v39, %v5645_v24  ;;  %v3004_v36 = vpop.f32.mrb[37].mxu1  ;;  %v4215_v44 = vadd.f32 %v2738_v42, %v5649_v25  ;;  %v2740_v47 = vpop.f32.mrb[38].mxu0  ;;  %3570 = vmatprep.mubr.bf16.mxu0 %v3124_v31 }
 0x33b   : > { %v4255_v45 = vadd.f32 %v3004_v36, %v5653_v27  ;;  %v3006_v48 = vpop.f32.mrb[38].mxu1  ;;  %3683 = vmatprep.mubr.bf16.mxu1 %v3126_v26  ;;  %v4216_v49 = vadd.f32 %v2740_v47, %v5641_v23  ;;  %v2742_v51 = vpop.f32.mrb[39].mxu0  ;;  %3571 = vmatmul.mubr.bf16.gmra.mrb[72].mxu0 %v3123_v35  ;;  %v3083_v56 = vmax.f32 %v4214_v40, 0.0 }
 0x33c   : > { %v4256_v50 = vadd.f32 %v3006_v48, %v5645_v24  ;;  %v3008_v52 = vpop.f32.mrb[39].mxu1  ;;  %3684 = vmatmul.mubr.bf16.gmra.mrb[72].mxu1 %v3125_v37  ;;  %v4217_v53 = vadd.f32 %v2742_v51, %v5649_v25  ;;  %v3085_v57 = vmax.f32 %v4254_v41, 0.0  ;;  %v3084_v60 = vmax.f32 %v4215_v44, 0.0 }
 0x33d   : > { %v4257_v55 = vadd.f32 %v3008_v52, %v5653_v27  ;;  %v3087_v58 = vmax.f32 %v4216_v49, 0.0  ;;  %v3086_v61 = vmax.f32 %v4255_v45, 0.0  ;;  %v5738_v27 = vld [vmem:[%s5807_s6] ss:$0 sm:$0xff] }
 0x33e   : > { %v3089_v59 = vmax.f32 %v4256_v50, 0.0  ;;  %v3088_v62 = vmax.f32 %v4217_v53, 0.0 }
 0x33f   : > { %v3090_v63 = vmax.f32 %v4257_v55, 0.0  ;;  %v3127_v0 = vpack.c.bf16 %v3087_v58, %v3083_v56 }
 0x340   : > { %v3129_v23 = vpack.c.bf16 %v3089_v59, %v3085_v57  ;;  %v3128_v1 = vpack.c.bf16 %v3088_v62, %v3084_v60 }
 0x341   : > { %v3130_v24 = vpack.c.bf16 %v3090_v63, %v3086_v61 }
 0x342   : > { %3578 = vmatprep.mubr.bf16.mxu0 %v3128_v1 }
 0x343   : > { %3691 = vmatprep.mubr.bf16.mxu1 %v3130_v24  ;;  %3579 = vmatmul.mubr.bf16.gmra.mrb[76].mxu0 %v3127_v0 }
 0x344   : > { %3692 = vmatmul.mubr.bf16.gmra.mrb[76].mxu1 %v3129_v23 }
 0x3ce   : > { %v4042_v2 = vpop.f32.mrb[40].mxu0 }
 0x3cf   : > { %v4118_v25 = vpop.f32.mrb[40].mxu1  ;;  %v4043_v3 = vpop.f32.mrb[41].mxu0 }
 0x3d0   : > { %v4119_v4 = vpop.f32.mrb[41].mxu1  ;;  %v4044_v5 = vadd.f32 %v4043_v3, %v4042_v2  ;;  %v4045_v7 = vpop.f32.mrb[42].mxu0 }
 0x3d1   : > { %v4120_v6 = vadd.f32 %v4119_v4, %v4118_v25  ;;  %v4121_v8 = vpop.f32.mrb[42].mxu1  ;;  %v4046_v9 = vpop.f32.mrb[43].mxu0 }
 0x3d2   : > { %v4122_v10 = vpop.f32.mrb[43].mxu1  ;;  %v3509_v11 = vadd.f32 %v4044_v5, %v5738_v27  ;;  %v4047_v38 = vadd.f32 %v4046_v9, %v4045_v7 }
 0x3d3   : > { %v4123_v12 = vadd.f32 %v4122_v10, %v4121_v8 }
 0x3d4   : > { %v3622_v13 = vadd.f32 %v4120_v6, %v3509_v11  ;;  %v3512_v14 = vadd.f32 %v4047_v38, %v5738_v27 }
 0x3d6   : > { %3700 = vst [vmem:[%s4897_s22] sm:$0xff] %v3622_v13  ;;  %v3625_v16 = vadd.f32 %v4123_v12, %v3512_v14  ;;  %v4048_v15 = vpop.f32.mrb[44].mxu0 }
 0x3d7   : > { %v4124_v18 = vpop.f32.mrb[44].mxu1  ;;  %v4049_v19 = vpop.f32.mrb[45].mxu0 }
 0x3d8   : > { %v4125_v20 = vpop.f32.mrb[45].mxu1  ;;  %3701 = vst [vmem:[%s4897_s22 + $0x8] sm:$0xff] %v3625_v16  ;;  %v4050_v30 = vadd.f32 %v4049_v19, %v4048_v15  ;;  %v4051_v22 = vpop.f32.mrb[46].mxu0 }
 0x3d9   : > { %v4126_v21 = vadd.f32 %v4125_v20, %v4124_v18  ;;  %v4127_v28 = vpop.f32.mrb[46].mxu1  ;;  %v4052_v29 = vpop.f32.mrb[47].mxu0 }
 0x3da   : > { %v4128_v54 = vpop.f32.mrb[47].mxu1  ;;  %v3517_v32 = vadd.f32 %v4050_v30, %v5738_v27  ;;  %v4053_v43 = vadd.f32 %v4052_v29, %v4051_v22 }
 0x3db   : > { %v4129_v33 = vadd.f32 %v4128_v54, %v4127_v28 }
 0x3dc   : > { %v3630_v34 = vadd.f32 %v4126_v21, %v3517_v32  ;;  %v3520_v17 = vadd.f32 %v4053_v43, %v5738_v27 }
 0x3de   : > { %3702 = vst [vmem:[%s4897_s22 + $0x10] sm:$0xff] %v3630_v34  ;;  %v3633_v35 = vadd.f32 %v4129_v33, %v3520_v17  ;;  %v4054_v37 = vpop.f32.mrb[48].mxu0 }
 0x3df   : > { %v4130_v31 = vpop.f32.mrb[48].mxu1  ;;  %v4055_v26 = vpop.f32.mrb[49].mxu0 }
 0x3e0   : > { %v4131_v46 = vpop.f32.mrb[49].mxu1  ;;  %3703 = vst [vmem:[%s4897_s22 + $0x18] sm:$0xff] %v3633_v35  ;;  %v4056_v39 = vadd.f32 %v4055_v26, %v4054_v37  ;;  %v4057_v41 = vpop.f32.mrb[50].mxu0 }
 0x3e1   : > { %v4132_v40 = vadd.f32 %v4131_v46, %v4130_v31  ;;  %v4133_v42 = vpop.f32.mrb[50].mxu1  ;;  %v4058_v36 = vpop.f32.mrb[51].mxu0 }
 0x3e2   : > { %v4134_v44 = vpop.f32.mrb[51].mxu1  ;;  %v3525_v45 = vadd.f32 %v4056_v39, %v5738_v27  ;;  %v4059_v47 = vadd.f32 %v4058_v36, %v4057_v41 }
 0x3e3   : > { %v4135_v48 = vadd.f32 %v4134_v44, %v4133_v42 }
 0x3e4   : > { %v3638_v49 = vadd.f32 %v4132_v40, %v3525_v45  ;;  %v3528_v50 = vadd.f32 %v4059_v47, %v5738_v27 }
 0x3e6   : > { %3704 = vst [vmem:[%s4897_s22 + $0x20] sm:$0xff] %v3638_v49  ;;  %v3641_v51 = vadd.f32 %v4135_v48, %v3528_v50  ;;  %v4060_v52 = vpop.f32.mrb[52].mxu0 }
 0x3e7   : > { %v4136_v53 = vpop.f32.mrb[52].mxu1  ;;  %v4061_v55 = vpop.f32.mrb[53].mxu0 }
 0x3e8   : > { %v4137_v56 = vpop.f32.mrb[53].mxu1  ;;  %3705 = vst [vmem:[%s4897_s22 + $0x28] sm:$0xff] %v3641_v51  ;;  %v4062_v57 = vadd.f32 %v4061_v55, %v4060_v52  ;;  %v4063_v59 = vpop.f32.mrb[54].mxu0 }
 0x3e9   : > { %v4138_v58 = vadd.f32 %v4137_v56, %v4136_v53  ;;  %v4139_v60 = vpop.f32.mrb[54].mxu1  ;;  %v4064_v61 = vpop.f32.mrb[55].mxu0 }
 0x3ea   : > { %v4140_v62 = vpop.f32.mrb[55].mxu1  ;;  %v3533_v63 = vadd.f32 %v4062_v57, %v5738_v27  ;;  %v4065_v0 = vadd.f32 %v4064_v61, %v4063_v59 }
 0x3eb   : > { %v4141_v23 = vadd.f32 %v4140_v62, %v4139_v60 }
 0x3ec   : > { %v3646_v1 = vadd.f32 %v4138_v58, %v3533_v63  ;;  %v3536_v24 = vadd.f32 %v4065_v0, %v5738_v27 }
 0x3ee   : > { %3706 = vst [vmem:[%s4897_s22 + $0x30] sm:$0xff] %v3646_v1  ;;  %v3649_v2 = vadd.f32 %v4141_v23, %v3536_v24  ;;  %v4066_v25 = vpop.f32.mrb[56].mxu0 }
 0x3ef   : > { %v4142_v3 = vpop.f32.mrb[56].mxu1  ;;  %v4067_v4 = vpop.f32.mrb[57].mxu0 }
 0x3f0   : > { %v4143_v5 = vpop.f32.mrb[57].mxu1  ;;  %3707 = vst [vmem:[%s4897_s22 + $0x38] sm:$0xff] %v3649_v2  ;;  %v4068_v6 = vadd.f32 %v4067_v4, %v4066_v25  ;;  %v4069_v8 = vpop.f32.mrb[58].mxu0 }
 0x3f1   : > { %v4144_v7 = vadd.f32 %v4143_v5, %v4142_v3  ;;  %v4145_v9 = vpop.f32.mrb[58].mxu1  ;;  %v4070_v10 = vpop.f32.mrb[59].mxu0 }
 0x3f2   : > { %v4146_v11 = vpop.f32.mrb[59].mxu1  ;;  %v3541_v38 = vadd.f32 %v4068_v6, %v5738_v27  ;;  %v4071_v12 = vadd.f32 %v4070_v10, %v4069_v8 }
 0x3f3   : > { %v4147_v13 = vadd.f32 %v4146_v11, %v4145_v9 }
 0x3f4   : > { %v3654_v14 = vadd.f32 %v4144_v7, %v3541_v38  ;;  %v3544_v16 = vadd.f32 %v4071_v12, %v5738_v27 }
 0x3f6   : > { %3708 = vst [vmem:[%s4897_s22 + $0x40] sm:$0xff] %v3654_v14  ;;  %v3657_v15 = vadd.f32 %v4147_v13, %v3544_v16  ;;  %v4072_v18 = vpop.f32.mrb[60].mxu0 }
 0x3f7   : > { %v4148_v19 = vpop.f32.mrb[60].mxu1  ;;  %v4073_v20 = vpop.f32.mrb[61].mxu0 }
 0x3f8   : > { %v4149_v30 = vpop.f32.mrb[61].mxu1  ;;  %3709 = vst [vmem:[%s4897_s22 + $0x48] sm:$0xff] %v3657_v15  ;;  %v4074_v21 = vadd.f32 %v4073_v20, %v4072_v18  ;;  %v4075_v28 = vpop.f32.mrb[62].mxu0 }
 0x3f9   : > { %v4150_v22 = vadd.f32 %v4149_v30, %v4148_v19  ;;  %v4151_v29 = vpop.f32.mrb[62].mxu1  ;;  %v4076_v54 = vpop.f32.mrb[63].mxu0 }
 0x3fa   : > { %v4152_v32 = vpop.f32.mrb[63].mxu1  ;;  %v3549_v43 = vadd.f32 %v4074_v21, %v5738_v27  ;;  %v4077_v33 = vadd.f32 %v4076_v54, %v4075_v28 }
 0x3fb   : > { %v4153_v34 = vadd.f32 %v4152_v32, %v4151_v29 }
 0x3fc   : > { %v3662_v17 = vadd.f32 %v4150_v22, %v3549_v43  ;;  %v3552_v35 = vadd.f32 %v4077_v33, %v5738_v27 }
 0x3fe   : > { %3710 = vst [vmem:[%s4897_s22 + $0x50] sm:$0xff] %v3662_v17  ;;  %v3665_v37 = vadd.f32 %v4153_v34, %v3552_v35  ;;  %v4078_v31 = vpop.f32.mrb[64].mxu0 }
 0x3ff   : > { %v4154_v26 = vpop.f32.mrb[64].mxu1  ;;  %v4079_v46 = vpop.f32.mrb[65].mxu0 }
 0x400   : > { %v4155_v39 = vpop.f32.mrb[65].mxu1  ;;  %3711 = vst [vmem:[%s4897_s22 + $0x58] sm:$0xff] %v3665_v37  ;;  %v4080_v40 = vadd.f32 %v4079_v46, %v4078_v31  ;;  %v4081_v42 = vpop.f32.mrb[66].mxu0 }
 0x401   : > { %v4156_v41 = vadd.f32 %v4155_v39, %v4154_v26  ;;  %v4157_v36 = vpop.f32.mrb[66].mxu1  ;;  %v4082_v44 = vpop.f32.mrb[67].mxu0 }
 0x402   : > { %v4158_v45 = vpop.f32.mrb[67].mxu1  ;;  %v3557_v47 = vadd.f32 %v4080_v40, %v5738_v27  ;;  %v4083_v48 = vadd.f32 %v4082_v44, %v4081_v42 }
 0x403   : > { %v4159_v49 = vadd.f32 %v4158_v45, %v4157_v36 }
 0x404   : > { %v3670_v50 = vadd.f32 %v4156_v41, %v3557_v47  ;;  %v3560_v51 = vadd.f32 %v4083_v48, %v5738_v27 }
 0x406   : > { %3712 = vst [vmem:[%s4897_s22 + $0x60] sm:$0xff] %v3670_v50  ;;  %v3673_v52 = vadd.f32 %v4159_v49, %v3560_v51  ;;  %v4084_v53 = vpop.f32.mrb[68].mxu0 }
 0x407   : > { %v4160_v55 = vpop.f32.mrb[68].mxu1  ;;  %v4085_v56 = vpop.f32.mrb[69].mxu0 }
 0x408   : > { %v4161_v57 = vpop.f32.mrb[69].mxu1  ;;  %3713 = vst [vmem:[%s4897_s22 + $0x68] sm:$0xff] %v3673_v52  ;;  %v4086_v58 = vadd.f32 %v4085_v56, %v4084_v53  ;;  %v4087_v60 = vpop.f32.mrb[70].mxu0 }
 0x409   : > { %v4162_v59 = vadd.f32 %v4161_v57, %v4160_v55  ;;  %v4163_v61 = vpop.f32.mrb[70].mxu1  ;;  %v4088_v62 = vpop.f32.mrb[71].mxu0 }
 0x40a   : > { %v4164_v63 = vpop.f32.mrb[71].mxu1  ;;  %v3565_v0 = vadd.f32 %v4086_v58, %v5738_v27  ;;  %v4089_v23 = vadd.f32 %v4088_v62, %v4087_v60 }
 0x40b   : > { %v4165_v1 = vadd.f32 %v4164_v63, %v4163_v61 }
 0x40c   : > { %v3678_v24 = vadd.f32 %v4162_v59, %v3565_v0  ;;  %v3568_v2 = vadd.f32 %v4089_v23, %v5738_v27 }
 0x40e   : > { %3714 = vst [vmem:[%s4897_s22 + $0x70] sm:$0xff] %v3678_v24  ;;  %v3681_v25 = vadd.f32 %v4165_v1, %v3568_v2  ;;  %v4090_v3 = vpop.f32.mrb[72].mxu0 }
 0x40f   : > { %v4166_v4 = vpop.f32.mrb[72].mxu1  ;;  %v4091_v5 = vpop.f32.mrb[73].mxu0 }
 0x410   : > { %v4167_v6 = vpop.f32.mrb[73].mxu1  ;;  %3715 = vst [vmem:[%s4897_s22 + $0x78] sm:$0xff] %v3681_v25  ;;  %v4092_v7 = vadd.f32 %v4091_v5, %v4090_v3  ;;  %v4093_v9 = vpop.f32.mrb[74].mxu0 }
 0x411   : > { %v4168_v8 = vadd.f32 %v4167_v6, %v4166_v4  ;;  %v4169_v10 = vpop.f32.mrb[74].mxu1  ;;  %v4094_v11 = vpop.f32.mrb[75].mxu0 }
 0x412   : > { %v4170_v38 = vpop.f32.mrb[75].mxu1  ;;  %v3573_v12 = vadd.f32 %v4092_v7, %v5738_v27  ;;  %v4095_v13 = vadd.f32 %v4094_v11, %v4093_v9 }
 0x413   : > { %v4171_v14 = vadd.f32 %v4170_v38, %v4169_v10 }
 0x414   : > { %v3686_v16 = vadd.f32 %v4168_v8, %v3573_v12  ;;  %v3576_v15 = vadd.f32 %v4095_v13, %v5738_v27 }
 0x416   : > { %3716 = vst [vmem:[%s4897_s22 + $0x80] sm:$0xff] %v3686_v16  ;;  %v3689_v18 = vadd.f32 %v4171_v14, %v3576_v15  ;;  %v4096_v19 = vpop.f32.mrb[76].mxu0 }
 0x417   : > { %v4172_v20 = vpop.f32.mrb[76].mxu1  ;;  %v4097_v30 = vpop.f32.mrb[77].mxu0 }
 0x418   : > { %v4173_v21 = vpop.f32.mrb[77].mxu1  ;;  %3717 = vst [vmem:[%s4897_s22 + $0x88] sm:$0xff] %v3689_v18  ;;  %v4098_v22 = vadd.f32 %v4097_v30, %v4096_v19  ;;  %v4099_v29 = vpop.f32.mrb[78].mxu0 }
 0x419   : > { %v4174_v28 = vadd.f32 %v4173_v21, %v4172_v20  ;;  %v4175_v54 = vpop.f32.mrb[78].mxu1  ;;  %v4100_v32 = vpop.f32.mrb[79].mxu0 }
 0x41a   : > { %v4176_v43 = vpop.f32.mrb[79].mxu1  ;;  %v3581_v33 = vadd.f32 %v4098_v22, %v5738_v27  ;;  %v4101_v34 = vadd.f32 %v4100_v32, %v4099_v29 }
 0x41b   : > { %v4177_v17 = vadd.f32 %v4176_v43, %v4175_v54 }
 0x41c   : > { %v3694_v35 = vadd.f32 %v4174_v28, %v3581_v33  ;;  %v3584_v37 = vadd.f32 %v4101_v34, %v5738_v27 }
 0x41e   : > { %3718 = vst [vmem:[%s4897_s22 + $0x90] sm:$0xff] %v3694_v35  ;;  %v3697_v31 = vadd.f32 %v4177_v17, %v3584_v37 }
 0x420   : > { %3719 = vst [vmem:[%s4897_s22 + $0x98] sm:$0xff] %v3697_v31 }
 0x421 PF: > { %s17_s30 = sadd.s32 1, %s4736_s30   ;;  %s5809_s24 = smov %s4716_s25 }
 0x422   : > { %p14_p0 = scmp.ge.s32.totalorder %s17_s30, 12   ;;  %s5810_s25 = smov %s4831_s14 }
 0x423   : > { %s5811_s26 = smov %s4728_s28  ;;  %s5812_s27 = smov %s4732_s29 }
 0x424   : > { %s5813_s28 = smov %s5816_s8  ;;  %s5814_s29 = smov %s5820_s9 }
 0x425   :  { %16 = sbr.rel (!%p14_p0) target bundleno = 4 (0x4), region = 135 }

</bundles_post_ra>
